<compile_context>
chip_gen: v7x
topology: tpu7x:2x2x1
jax: 0.10.0
libtpu: 0.0.40
codegen_flags: <defaults>
</compile_context>

<pallas_src>
import numpy as np
import jax
import jax.numpy as jnp
from jax import lax
from jax.experimental import pallas as pl
from jax.experimental.pallas import tpu as pltpu


# ----------------------------------------------------------------------------
# Kernel builder (static shapes / blob offsets are closed over)
# ----------------------------------------------------------------------------
def _make_kernel(cfg):
    (H1, W1, C1), (H2, W2, C2), (H3, W3, C3), (H4, W4, C4) = cfg["feats"]
    C = cfg["C"]
    offs = cfg["offs"]
    skip32 = cfg["skip32"]
    f32, bf16 = jnp.float32, jnp.bfloat16

    def kernel(x1_ref, x2_ref, x3_ref, x4_ref, wb_ref, bb_ref, o_ref,
               pad3_ref, pad2_ref, pad1_ref):

        def wslice(name, rows, cols):
            # Static window into the packed bf16 weight blob (free ref view).
            o = offs[name]
            return wb_ref[o:o + rows, :cols]

        def bias(row):
            return bb_ref[row:row + 1, :]          # (1, C) f32

        def pw(x_ref, name, cin, brow):
            # 1x1 conv (+ folded-BN bias) + ReLU on the MXU (bf16 in, f32 acc).
            y = jnp.dot(x_ref[0], wslice(name, cin, C),
                        preferred_element_type=f32)
            return jnp.maximum(y + bias(brow), 0.0)

        def merge(s_flat, pad_ref, name, brow):
            # 3x3 conv (pad=1) + BN + ReLU as ONE im2col matmul.
            Hp, Wp, _ = pad_ref.shape
            H, W = Hp - 2, Wp - 2
            # Zero only the 1-wide halo; the interior is fully overwritten.
            pad_ref[0:1, :, :] = jnp.zeros((1, Wp, C), f32)
            pad_ref[Hp - 1:Hp, :, :] = jnp.zeros((1, Wp, C), f32)
            pad_ref[1:H + 1, 0:1, :] = jnp.zeros((H, 1, C), f32)
            pad_ref[1:H + 1, Wp - 1:Wp, :] = jnp.zeros((H, 1, C), f32)
            # Single slab store for the interior (was a per-row loop).
            pad_ref[1:H + 1, 1:W + 1, :] = s_flat.reshape(H, W, C)
            pad = pad_ref[...]
            taps = [pad[kh:kh + H, kw:kw + W, :].reshape(H * W, C).astype(bf16)
                    for kh in range(3) for kw in range(3)]
            col = jnp.concatenate(taps, axis=-1)            # (H*W, 9C) bf16
            y = jnp.dot(col, wslice(name, 9 * C, C),
                        preferred_element_type=f32)
            return jnp.maximum(y + bias(brow), 0.0)

        # 1x1 Conv_Blocks (conv1..conv4).
        o1 = pw(x1_ref, "w1", C1, 0)   # (H1*W1, C) f32
        o2 = pw(x2_ref, "w2", C2, 1)   # (H2*W2, C)
        o3 = pw(x3_ref, "w3", C3, 2)   # (H3*W3, C)
        o4 = pw(x4_ref, "w4", C4, 3)   # (H4*W4, C)

        # Top-down pathway: nearest upsample (0/1 selection matmul) + add + merge.
        up4 = jnp.dot(wslice("s43", H3 * W3, H4 * W4), o4.astype(bf16),
                      preferred_element_type=f32)
        o3 = merge(o3 + up4, pad3_ref, "wm3", 4)

        if skip32:
            up3 = o3                      # identity resize: H3xW3 == H2xW2
        else:
            up3 = jnp.dot(wslice("s32", H2 * W2, H3 * W3), o3.astype(bf16),
                          preferred_element_type=f32)
        o2 = merge(o2 + up3, pad2_ref, "wm2", 5)

        up2 = jnp.dot(wslice("s21", H1 * W1, H2 * W2), o2.astype(bf16),
                      preferred_element_type=f32)
        o1 = merge(o1 + up2, pad1_ref, "wm1", 6)

        # conv_out (Cout=1) + ReLU, kept in f32: VPU multiply + lane reduction.
        y = jnp.sum(o1 * bb_ref[7:8, :], axis=-1, keepdims=True) + bb_ref[8:9, 0:1]
        o_ref[0] = jnp.maximum(y, 0.0)

    return kernel


# ----------------------------------------------------------------------------
# Host-side helpers
# ----------------------------------------------------------------------------
def _nearest_select_matrix(src_h, src_w, dst_h, dst_w):
    # F.interpolate(mode='nearest'): src_idx = floor(dst_idx * src_size / dst_size)
    hi = (np.arange(dst_h) * src_h) // dst_h
    wi = (np.arange(dst_w) * src_w) // dst_w
    src_idx = (hi[:, None] * src_w + wi[None, :]).reshape(-1)
    sel = np.zeros((dst_h * dst_w, src_h * src_w), np.float32)
    sel[np.arange(dst_h * dst_w), src_idx] = 1.0
    return sel


def make_aux_forward(params, spatial_sizes):
    """Build the fused forward for fixed spatial sizes.

    spatial_sizes: ((H1,W1),(H2,W2),(H3,W3),(H4,W4)) of out1..out4 (NCHW inputs).
    Constant packing happens HERE (once), not per call.
    """
    (H1, W1), (H2, W2), (H3, W3), (H4, W4) = spatial_sizes
    C = params["conv1"][0].shape[-1]
    C1 = params["conv1"][0].shape[-2]
    C2 = params["conv2"][0].shape[-2]
    C3 = params["conv3"][0].shape[-2]
    C4 = params["conv4"][0].shape[-2]
    skip32 = (H3, W3) == (H2, W2)

    blob_cols = max(C, H4 * W4, H3 * W3, H2 * W2)

    def pad_cols(a):
        a = np.asarray(a, np.float32)
        if a.shape[1] < blob_cols:
            a = np.concatenate(
                [a, np.zeros((a.shape[0], blob_cols - a.shape[1]), np.float32)], 1)
        return a

    pieces, offs = [], {}

    def add(name, arr):
        offs[name] = sum(p.shape[0] for p in pieces)
        pieces.append(pad_cols(arr))

    # 1x1 conv weights (BN already folded), im2col-packed 3x3 merge weights,
    # and the nearest-neighbour 0/1 selection matrices -> one bf16 blob.
    add("w1", np.asarray(params["conv1"][0])[0, 0])
    add("w2", np.asarray(params["conv2"][0])[0, 0])
    add("w3", np.asarray(params["conv3"][0])[0, 0])
    add("w4", np.asarray(params["conv4"][0])[0, 0])
    add("wm3", np.asarray(params["merge3"][0]).reshape(9 * C, C))
    add("wm2", np.asarray(params["merge2"][0]).reshape(9 * C, C))
    add("wm1", np.asarray(params["merge1"][0]).reshape(9 * C, C))
    add("s43", _nearest_select_matrix(H4, W4, H3, W3))
    if not skip32:
        add("s32", _nearest_select_matrix(H3, W3, H2, W2))
    add("s21", _nearest_select_matrix(H2, W2, H1, W1))
    wblob = jnp.asarray(np.concatenate(pieces, axis=0), jnp.bfloat16)

    # Small f32 blob: per-block biases, conv_out weight vector, conv_out bias.
    bblob_np = np.zeros((16, C), np.float32)
    bblob_np[0] = np.asarray(params["conv1"][1])
    bblob_np[1] = np.asarray(params["conv2"][1])
    bblob_np[2] = np.asarray(params["conv3"][1])
    bblob_np[3] = np.asarray(params["conv4"][1])
    bblob_np[4] = np.asarray(params["merge3"][1])
    bblob_np[5] = np.asarray(params["merge2"][1])
    bblob_np[6] = np.asarray(params["merge1"][1])
    bblob_np[7] = np.asarray(params["conv_out"][0])[0, 0, :, 0]
    bblob_np[8, :] = float(np.asarray(params["conv_out"][1])[0])
    bblob = jnp.asarray(bblob_np)

    cfg = {"feats": ((H1, W1, C1), (H2, W2, C2), (H3, W3, C3), (H4, W4, C4)),
           "C": C, "offs": offs, "skip32": skip32}
    kernel = _make_kernel(cfg)

    def forward(out1, out2, out3, out4):
        """Inputs / output in NCHW to match the PyTorch module."""
        N = out1.shape[0]

        def to_rows(x):
            n, c, h, w = x.shape
            return (jnp.transpose(x, (0, 2, 3, 1))
                    .reshape(n, h * w, c).astype(jnp.bfloat16))

        x1, x2, x3, x4 = to_rows(out1), to_rows(out2), to_rows(out3), to_rows(out4)

        in_specs = [
            pl.BlockSpec((1, H1 * W1, C1), lambda n: (n, 0, 0)),
            pl.BlockSpec((1, H2 * W2, C2), lambda n: (n, 0, 0)),
            pl.BlockSpec((1, H3 * W3, C3), lambda n: (n, 0, 0)),
            pl.BlockSpec((1, H4 * W4, C4), lambda n: (n, 0, 0)),
            pl.BlockSpec(wblob.shape, lambda n: (0, 0)),
            pl.BlockSpec(bblob.shape, lambda n: (0, 0)),
        ]
        out_spec = pl.BlockSpec((1, H1 * W1, 1), lambda n: (n, 0, 0))

        out = pl.pallas_call(
            kernel,
            grid=(N,),
            in_specs=in_specs,
            out_specs=out_spec,
            out_shape=jax.ShapeDtypeStruct((N, H1 * W1, 1), jnp.float32),
            scratch_shapes=[
                pltpu.VMEM((H3 + 2, W3 + 2, C), jnp.float32),
                pltpu.VMEM((H2 + 2, W2 + 2, C), jnp.float32),
                pltpu.VMEM((H1 + 2, W1 + 2, C), jnp.float32),
            ],
            compiler_params=pltpu.CompilerParams(
                dimension_semantics=("parallel",)),
        )(x1, x2, x3, x4, wblob, bblob)

        # (N, H1*W1, 1) -> (N, 1, H1, W1): pure bitcast inside the jit.
        return out.reshape(N, 1, H1, W1)

    return forward


# ----------------------------------------------------------------------------
# Parameter construction (deterministic, synthetic) with inference-mode BN fold
# ----------------------------------------------------------------------------
def init_conv_block_params(key, cin, cout, k):
    kw_, kg, kb, km, kv = jax.random.split(key, 5)
    w = jax.random.normal(kw_, (cout, cin, k, k), jnp.float32) / jnp.sqrt(cin * k * k)
    gamma = 1.0 + 0.1 * jax.random.normal(kg, (cout,), jnp.float32)
    beta = 0.1 * jax.random.normal(kb, (cout,), jnp.float32)
    mean = 0.1 * jax.random.normal(km, (cout,), jnp.float32)
    var = 0.5 + jax.random.uniform(kv, (cout,), jnp.float32)
    eps = 1e-5
    # BatchNorm folded in inference mode: y = scale*conv(x) + (beta - mean*scale)
    scale = gamma / jnp.sqrt(var + eps)
    w_f = w * scale[:, None, None, None]
    b_f = beta - mean * scale
    w_hwio = jnp.transpose(w_f, (2, 3, 1, 0))   # (k, k, Cin, Cout)
    return w_hwio, b_f


def init_params(width_factor=1):
    c = int(64 * width_factor)
    key = jax.random.PRNGKey(0)
    keys = jax.random.split(key, 8)
    return {
        "conv1":    init_conv_block_params(keys[0], int(64 * width_factor), c, 1),
        "conv2":    init_conv_block_params(keys[1], int(80 * width_factor), c, 1),
        "conv3":    init_conv_block_params(keys[2], int(96 * width_factor), c, 1),
        "conv4":    init_conv_block_params(keys[3], int(144 * width_factor), c, 1),
        "merge1":   init_conv_block_params(keys[4], c, c, 3),
        "merge2":   init_conv_block_params(keys[5], c, c, 3),
        "merge3":   init_conv_block_params(keys[6], c, c, 3),
        "conv_out": init_conv_block_params(keys[7], c, 1, 1),
    }


# ----------------------------------------------------------------------------
# Pure-JAX reference (lax.conv, full f32) for correctness check
# ----------------------------------------------------------------------------
def nearest_resize_nhwc(x, h_out, w_out):
    N, H, W, C = x.shape
    hi = (jnp.arange(h_out) * H) // h_out
    wi = (jnp.arange(w_out) * W) // w_out
    return x[:, hi][:, :, wi]


def _ref_conv_block(x_nhwc, w_hwio, b, pad):
    y = lax.conv_general_dilated(
        x_nhwc, w_hwio, (1, 1), [(pad, pad), (pad, pad)],
        dimension_numbers=("NHWC", "HWIO", "NHWC"),
        precision=lax.Precision.HIGHEST)
    return jnp.maximum(y + b, 0.0)


def reference_forward(params, out1, out2, out3, out4):
    x1 = jnp.transpose(out1, (0, 2, 3, 1))
    x2 = jnp.transpose(out2, (0, 2, 3, 1))
    x3 = jnp.transpose(out3, (0, 2, 3, 1))
    x4 = jnp.transpose(out4, (0, 2, 3, 1))
    o1 = _ref_conv_block(x1, *params["conv1"], 0)
    o2 = _ref_conv_block(x2, *params["conv2"], 0)
    o3 = _ref_conv_block(x3, *params["conv3"], 0)
    o4 = _ref_conv_block(x4, *params["conv4"], 0)
    o3 = _ref_conv_block(o3 + nearest_resize_nhwc(o4, o3.shape[1], o3.shape[2]),
                         *params["merge3"], 1)
    o2 = _ref_conv_block(o2 + nearest_resize_nhwc(o3, o2.shape[1], o2.shape[2]),
                         *params["merge2"], 1)
    o1 = _ref_conv_block(o1 + nearest_resize_nhwc(o2, o1.shape[1], o1.shape[2]),
                         *params["merge1"], 1)
    out = _ref_conv_block(o1, *params["conv_out"], 0)
    return jnp.transpose(out, (0, 3, 1, 2))


if __name__ == "__main__":
    key = jax.random.PRNGKey(0)
    k1, k2, k3, k4 = jax.random.split(key, 4)
    # Small feature-pyramid shapes consistent with the module's channel counts.
    out1 = jax.random.normal(k1, (2, 64, 16, 16), jnp.float32)
    out2 = jax.random.normal(k2, (2, 80, 8, 8), jnp.float32)
    out3 = jax.random.normal(k3, (2, 96, 8, 8), jnp.float32)
    out4 = jax.random.normal(k4, (2, 144, 4, 4), jnp.float32)

    params = init_params(width_factor=1)

    fwd = jax.jit(make_aux_forward(params, ((16, 16), (8, 8), (8, 8), (4, 4))))
    result = jax.block_until_ready(fwd(out1, out2, out3, out4))
    assert result.shape == (2, 1, 16, 16), result.shape

    ref = jax.block_until_ready(reference_forward(params, out1, out2, out3, out4))
    # Tolerance loosened vs. pure-f32 because the kernel now uses bf16 MXU
    # operands (f32 accumulation) per the performance review.
    if not jnp.allclose(result, ref, atol=5e-2, rtol=5e-2):
        max_err = float(jnp.max(jnp.abs(result - ref)))
        raise AssertionError(
            f"Pallas output does not match JAX reference (max abs err {max_err})")

    print("KERNEL_OK")
</pallas_src>

<mosaic_0001>
module attributes {stable_mosaic.version = 11 : i64} {
  func.func @kernel(%arg0: i32, %arg1: memref<1x256x64xbf16, #tpu.memory_space<vmem>>, %arg2: memref<1x64x80xbf16, #tpu.memory_space<vmem>>, %arg3: memref<1x64x96xbf16, #tpu.memory_space<vmem>>, %arg4: memref<1x16x144xbf16, #tpu.memory_space<vmem>>, %arg5: memref<2432x64xbf16, #tpu.memory_space<vmem>>, %arg6: memref<16x64xf32, #tpu.memory_space<vmem>>, %arg7: memref<1x256x1xf32, #tpu.memory_space<vmem>>, %arg8: memref<10x10x64xf32, #tpu.memory_space<vmem>>, %arg9: memref<10x10x64xf32, #tpu.memory_space<vmem>>, %arg10: memref<18x18x64xf32, #tpu.memory_space<vmem>>) attributes {dimension_semantics = [#tpu.dimension_semantics<parallel>], iteration_bounds = array<i64: 2>, scalar_prefetch = 0 : i64, scratch_operands = 3 : i64, tpu.core_type = #tpu.core_type<tc>, window_params = [{transform_indices = @transform_0, window_bounds = array<i64: 1, 256, 64>}, {transform_indices = @transform_1, window_bounds = array<i64: 1, 64, 80>}, {transform_indices = @transform_2, window_bounds = array<i64: 1, 64, 96>}, {transform_indices = @transform_3, window_bounds = array<i64: 1, 16, 144>}, {pipeline_mode = #tpu.pipeline_mode<synchronous>, transform_indices = @transform_4, window_bounds = array<i64: 2432, 64>}, {pipeline_mode = #tpu.pipeline_mode<synchronous>, transform_indices = @transform_5, window_bounds = array<i64: 16, 64>}, {transform_indices = @transform_6, window_bounds = array<i64: 1, 256, 1>}]} {
    %c0 = arith.constant 0 : index
    %c0_0 = arith.constant 0 : index
    %c0_1 = arith.constant 0 : index
    %0 = vector.load %arg1[%c0, %c0_0, %c0_1] : memref<1x256x64xbf16, #tpu.memory_space<vmem>>, vector<1x256x64xbf16>
    %1 = vector.shape_cast %0 : vector<1x256x64xbf16> to vector<256x64xbf16>
    %c0_2 = arith.constant 0 : index
    %c0_3 = arith.constant 0 : index
    %2 = vector.load %arg5[%c0_2, %c0_3] : memref<2432x64xbf16, #tpu.memory_space<vmem>>, vector<64x64xbf16>
    %cst = arith.constant dense<0.000000e+00> : vector<256x64xf32>
    %3 = tpu.matmul %1, %2, %cst {dimension_numbers = #tpu.dot_dimension_numbers<[1], [0], [0], [1], [0, 0, 1, 1], [], []>} : vector<256x64xbf16>, vector<64x64xbf16>, vector<256x64xf32> -> vector<256x64xf32>
    %c0_4 = arith.constant 0 : index
    %c0_5 = arith.constant 0 : index
    %4 = vector.load %arg6[%c0_4, %c0_5] : memref<16x64xf32, #tpu.memory_space<vmem>>, vector<1x64xf32>
    %5 = vector.broadcast %4 : vector<1x64xf32> to vector<256x64xf32>
    %6 = arith.addf %3, %5 : vector<256x64xf32>
    %cst_6 = arith.constant 0.000000e+00 : f32
    %7 = vector.broadcast %cst_6 : f32 to vector<256x64xf32>
    %8 = arith.maximumf %6, %7 : vector<256x64xf32>
    %c0_7 = arith.constant 0 : index
    %c0_8 = arith.constant 0 : index
    %c0_9 = arith.constant 0 : index
    %9 = vector.load %arg2[%c0_7, %c0_8, %c0_9] : memref<1x64x80xbf16, #tpu.memory_space<vmem>>, vector<1x64x80xbf16>
    %10 = vector.shape_cast %9 : vector<1x64x80xbf16> to vector<64x80xbf16>
    %c64 = arith.constant 64 : index
    %c0_10 = arith.constant 0 : index
    %11 = vector.load %arg5[%c64, %c0_10] : memref<2432x64xbf16, #tpu.memory_space<vmem>>, vector<80x64xbf16>
    %cst_11 = arith.constant dense<0.000000e+00> : vector<64x64xf32>
    %12 = tpu.matmul %10, %11, %cst_11 {dimension_numbers = #tpu.dot_dimension_numbers<[1], [0], [0], [1], [0, 0, 1, 1], [], []>} : vector<64x80xbf16>, vector<80x64xbf16>, vector<64x64xf32> -> vector<64x64xf32>
    %c1 = arith.constant 1 : index
    %c0_12 = arith.constant 0 : index
    %13 = vector.load %arg6[%c1, %c0_12] : memref<16x64xf32, #tpu.memory_space<vmem>>, vector<1x64xf32>
    %14 = vector.broadcast %13 : vector<1x64xf32> to vector<64x64xf32>
    %15 = arith.addf %12, %14 : vector<64x64xf32>
    %cst_13 = arith.constant 0.000000e+00 : f32
    %16 = vector.broadcast %cst_13 : f32 to vector<64x64xf32>
    %17 = arith.maximumf %15, %16 : vector<64x64xf32>
    %c0_14 = arith.constant 0 : index
    %c0_15 = arith.constant 0 : index
    %c0_16 = arith.constant 0 : index
    %18 = vector.load %arg3[%c0_14, %c0_15, %c0_16] : memref<1x64x96xbf16, #tpu.memory_space<vmem>>, vector<1x64x96xbf16>
    %19 = vector.shape_cast %18 : vector<1x64x96xbf16> to vector<64x96xbf16>
    %c144 = arith.constant 144 : index
    %c0_17 = arith.constant 0 : index
    %20 = vector.load %arg5[%c144, %c0_17] : memref<2432x64xbf16, #tpu.memory_space<vmem>>, vector<96x64xbf16>
    %cst_18 = arith.constant dense<0.000000e+00> : vector<64x64xf32>
    %21 = tpu.matmul %19, %20, %cst_18 {dimension_numbers = #tpu.dot_dimension_numbers<[1], [0], [0], [1], [0, 0, 1, 1], [], []>} : vector<64x96xbf16>, vector<96x64xbf16>, vector<64x64xf32> -> vector<64x64xf32>
    %c2 = arith.constant 2 : index
    %c0_19 = arith.constant 0 : index
    %22 = vector.load %arg6[%c2, %c0_19] : memref<16x64xf32, #tpu.memory_space<vmem>>, vector<1x64xf32>
    %23 = vector.broadcast %22 : vector<1x64xf32> to vector<64x64xf32>
    %24 = arith.addf %21, %23 : vector<64x64xf32>
    %cst_20 = arith.constant 0.000000e+00 : f32
    %25 = vector.broadcast %cst_20 : f32 to vector<64x64xf32>
    %26 = arith.maximumf %24, %25 : vector<64x64xf32>
    %c0_21 = arith.constant 0 : index
    %c0_22 = arith.constant 0 : index
    %c0_23 = arith.constant 0 : index
    %27 = vector.load %arg4[%c0_21, %c0_22, %c0_23] : memref<1x16x144xbf16, #tpu.memory_space<vmem>>, vector<1x16x144xbf16>
    %28 = vector.shape_cast %27 : vector<1x16x144xbf16> to vector<16x144xbf16>
    %c240 = arith.constant 240 : index
    %c0_24 = arith.constant 0 : index
    %29 = vector.load %arg5[%c240, %c0_24] : memref<2432x64xbf16, #tpu.memory_space<vmem>>, vector<144x64xbf16>
    %cst_25 = arith.constant dense<0.000000e+00> : vector<16x64xf32>
    %30 = tpu.matmul %28, %29, %cst_25 {dimension_numbers = #tpu.dot_dimension_numbers<[1], [0], [0], [1], [0, 0, 1, 1], [], []>} : vector<16x144xbf16>, vector<144x64xbf16>, vector<16x64xf32> -> vector<16x64xf32>
    %c3 = arith.constant 3 : index
    %c0_26 = arith.constant 0 : index
    %31 = vector.load %arg6[%c3, %c0_26] : memref<16x64xf32, #tpu.memory_space<vmem>>, vector<1x64xf32>
    %32 = vector.broadcast %31 : vector<1x64xf32> to vector<16x64xf32>
    %33 = arith.addf %30, %32 : vector<16x64xf32>
    %cst_27 = arith.constant 0.000000e+00 : f32
    %34 = vector.broadcast %cst_27 : f32 to vector<16x64xf32>
    %35 = arith.maximumf %33, %34 : vector<16x64xf32>
    %c2112 = arith.constant 2112 : index
    %c0_28 = arith.constant 0 : index
    %36 = vector.load %arg5[%c2112, %c0_28] : memref<2432x64xbf16, #tpu.memory_space<vmem>>, vector<64x16xbf16>
    %37 = arith.truncf %35 : vector<16x64xf32> to vector<16x64xbf16>
    %cst_29 = arith.constant dense<0.000000e+00> : vector<64x64xf32>
    %38 = tpu.matmul %36, %37, %cst_29 {dimension_numbers = #tpu.dot_dimension_numbers<[1], [0], [0], [1], [0, 0, 1, 1], [], []>} : vector<64x16xbf16>, vector<16x64xbf16>, vector<64x64xf32> -> vector<64x64xf32>
    %39 = arith.addf %26, %38 : vector<64x64xf32>
    %cst_30 = arith.constant 0.000000e+00 : f32
    %40 = vector.broadcast %cst_30 : f32 to vector<1x10x64xf32>
    %c0_31 = arith.constant 0 : index
    %c0_32 = arith.constant 0 : index
    %c0_33 = arith.constant 0 : index
    %41 = vector.load %arg8[%c0_31, %c0_32, %c0_33] : memref<10x10x64xf32, #tpu.memory_space<vmem>>, vector<1x10x64xf32>
    tpu.vector_store %arg8[%c0_31, %c0_32, %c0_33], %40 {strides = array<i32>} : memref<10x10x64xf32, #tpu.memory_space<vmem>>, vector<1x10x64xf32>,
    %cst_34 = arith.constant 0.000000e+00 : f32
    %42 = vector.broadcast %cst_34 : f32 to vector<1x10x64xf32>
    %c9 = arith.constant 9 : index
    %c0_35 = arith.constant 0 : index
    %c0_36 = arith.constant 0 : index
    %43 = vector.load %arg8[%c9, %c0_35, %c0_36] : memref<10x10x64xf32, #tpu.memory_space<vmem>>, vector<1x10x64xf32>
    tpu.vector_store %arg8[%c9, %c0_35, %c0_36], %42 {strides = array<i32>} : memref<10x10x64xf32, #tpu.memory_space<vmem>>, vector<1x10x64xf32>,
    %cst_37 = arith.constant 0.000000e+00 : f32
    %44 = vector.broadcast %cst_37 : f32 to vector<8x1x64xf32>
    %c1_38 = arith.constant 1 : index
    %c0_39 = arith.constant 0 : index
    %c0_40 = arith.constant 0 : index
    %45 = vector.load %arg8[%c1_38, %c0_39, %c0_40] : memref<10x10x64xf32, #tpu.memory_space<vmem>>, vector<8x1x64xf32>
    tpu.vector_store %arg8[%c1_38, %c0_39, %c0_40], %44 {strides = array<i32>} : memref<10x10x64xf32, #tpu.memory_space<vmem>>, vector<8x1x64xf32>,
    %cst_41 = arith.constant 0.000000e+00 : f32
    %46 = vector.broadcast %cst_41 : f32 to vector<8x1x64xf32>
    %c1_42 = arith.constant 1 : index
    %c9_43 = arith.constant 9 : index
    %c0_44 = arith.constant 0 : index
    %47 = vector.load %arg8[%c1_42, %c9_43, %c0_44] : memref<10x10x64xf32, #tpu.memory_space<vmem>>, vector<8x1x64xf32>
    tpu.vector_store %arg8[%c1_42, %c9_43, %c0_44], %46 {strides = array<i32>} : memref<10x10x64xf32, #tpu.memory_space<vmem>>, vector<8x1x64xf32>,
    %48 = vector.shape_cast %39 : vector<64x64xf32> to vector<8x8x64xf32>
    %c1_45 = arith.constant 1 : index
    %c1_46 = arith.constant 1 : index
    %c0_47 = arith.constant 0 : index
    %49 = vector.load %arg8[%c1_45, %c1_46, %c0_47] : memref<10x10x64xf32, #tpu.memory_space<vmem>>, vector<8x8x64xf32>
    tpu.vector_store %arg8[%c1_45, %c1_46, %c0_47], %48 {strides = array<i32>} : memref<10x10x64xf32, #tpu.memory_space<vmem>>, vector<8x8x64xf32>,
    %c0_48 = arith.constant 0 : index
    %c0_49 = arith.constant 0 : index
    %c0_50 = arith.constant 0 : index
    %50 = vector.load %arg8[%c0_48, %c0_49, %c0_50] : memref<10x10x64xf32, #tpu.memory_space<vmem>>, vector<10x10x64xf32>
    %51 = vector.extract_strided_slice %50 {offsets = [0, 0, 0], sizes = [8, 8, 64], strides = [1, 1, 1]} : vector<10x10x64xf32> to vector<8x8x64xf32>
    %52 = vector.shape_cast %51 : vector<8x8x64xf32> to vector<64x64xf32>
    %53 = arith.truncf %52 : vector<64x64xf32> to vector<64x64xbf16>
    %54 = vector.extract_strided_slice %50 {offsets = [0, 1, 0], sizes = [8, 8, 64], strides = [1, 1, 1]} : vector<10x10x64xf32> to vector<8x8x64xf32>
    %55 = vector.shape_cast %54 : vector<8x8x64xf32> to vector<64x64xf32>
    %56 = arith.truncf %55 : vector<64x64xf32> to vector<64x64xbf16>
    %57 = vector.extract_strided_slice %50 {offsets = [0, 2, 0], sizes = [8, 8, 64], strides = [1, 1, 1]} : vector<10x10x64xf32> to vector<8x8x64xf32>
    %58 = vector.shape_cast %57 : vector<8x8x64xf32> to vector<64x64xf32>
    %59 = arith.truncf %58 : vector<64x64xf32> to vector<64x64xbf16>
    %60 = vector.extract_strided_slice %50 {offsets = [1, 0, 0], sizes = [8, 8, 64], strides = [1, 1, 1]} : vector<10x10x64xf32> to vector<8x8x64xf32>
    %61 = vector.shape_cast %60 : vector<8x8x64xf32> to vector<64x64xf32>
    %62 = arith.truncf %61 : vector<64x64xf32> to vector<64x64xbf16>
    %63 = vector.extract_strided_slice %50 {offsets = [1, 1, 0], sizes = [8, 8, 64], strides = [1, 1, 1]} : vector<10x10x64xf32> to vector<8x8x64xf32>
    %64 = vector.shape_cast %63 : vector<8x8x64xf32> to vector<64x64xf32>
    %65 = arith.truncf %64 : vector<64x64xf32> to vector<64x64xbf16>
    %66 = vector.extract_strided_slice %50 {offsets = [1, 2, 0], sizes = [8, 8, 64], strides = [1, 1, 1]} : vector<10x10x64xf32> to vector<8x8x64xf32>
    %67 = vector.shape_cast %66 : vector<8x8x64xf32> to vector<64x64xf32>
    %68 = arith.truncf %67 : vector<64x64xf32> to vector<64x64xbf16>
    %69 = vector.extract_strided_slice %50 {offsets = [2, 0, 0], sizes = [8, 8, 64], strides = [1, 1, 1]} : vector<10x10x64xf32> to vector<8x8x64xf32>
    %70 = vector.shape_cast %69 : vector<8x8x64xf32> to vector<64x64xf32>
    %71 = arith.truncf %70 : vector<64x64xf32> to vector<64x64xbf16>
    %72 = vector.extract_strided_slice %50 {offsets = [2, 1, 0], sizes = [8, 8, 64], strides = [1, 1, 1]} : vector<10x10x64xf32> to vector<8x8x64xf32>
    %73 = vector.shape_cast %72 : vector<8x8x64xf32> to vector<64x64xf32>
    %74 = arith.truncf %73 : vector<64x64xf32> to vector<64x64xbf16>
    %75 = vector.extract_strided_slice %50 {offsets = [2, 2, 0], sizes = [8, 8, 64], strides = [1, 1, 1]} : vector<10x10x64xf32> to vector<8x8x64xf32>
    %76 = vector.shape_cast %75 : vector<8x8x64xf32> to vector<64x64xf32>
    %77 = arith.truncf %76 : vector<64x64xf32> to vector<64x64xbf16>
    %78 = tpu.concatenate %53, %56, %59, %62, %65, %68, %71, %74, %77 in 1 : vector<64x64xbf16>, vector<64x64xbf16>, vector<64x64xbf16>, vector<64x64xbf16>, vector<64x64xbf16>, vector<64x64xbf16>, vector<64x64xbf16>, vector<64x64xbf16>, vector<64x64xbf16> -> vector<64x576xbf16>
    %c384 = arith.constant 384 : index
    %c0_51 = arith.constant 0 : index
    %79 = vector.load %arg5[%c384, %c0_51] : memref<2432x64xbf16, #tpu.memory_space<vmem>>, vector<576x64xbf16>
    %cst_52 = arith.constant dense<0.000000e+00> : vector<64x64xf32>
    %80 = tpu.matmul %78, %79, %cst_52 {dimension_numbers = #tpu.dot_dimension_numbers<[1], [0], [0], [1], [0, 0, 1, 1], [], []>} : vector<64x576xbf16>, vector<576x64xbf16>, vector<64x64xf32> -> vector<64x64xf32>
    %c4 = arith.constant 4 : index
    %c0_53 = arith.constant 0 : index
    %81 = vector.load %arg6[%c4, %c0_53] : memref<16x64xf32, #tpu.memory_space<vmem>>, vector<1x64xf32>
    %82 = vector.broadcast %81 : vector<1x64xf32> to vector<64x64xf32>
    %83 = arith.addf %80, %82 : vector<64x64xf32>
    %cst_54 = arith.constant 0.000000e+00 : f32
    %84 = vector.broadcast %cst_54 : f32 to vector<64x64xf32>
    %85 = arith.maximumf %83, %84 : vector<64x64xf32>
    %86 = arith.addf %17, %85 : vector<64x64xf32>
    %cst_55 = arith.constant 0.000000e+00 : f32
    %87 = vector.broadcast %cst_55 : f32 to vector<1x10x64xf32>
    %c0_56 = arith.constant 0 : index
    %c0_57 = arith.constant 0 : index
    %c0_58 = arith.constant 0 : index
    %88 = vector.load %arg9[%c0_56, %c0_57, %c0_58] : memref<10x10x64xf32, #tpu.memory_space<vmem>>, vector<1x10x64xf32>
    tpu.vector_store %arg9[%c0_56, %c0_57, %c0_58], %87 {strides = array<i32>} : memref<10x10x64xf32, #tpu.memory_space<vmem>>, vector<1x10x64xf32>,
    %cst_59 = arith.constant 0.000000e+00 : f32
    %89 = vector.broadcast %cst_59 : f32 to vector<1x10x64xf32>
    %c9_60 = arith.constant 9 : index
    %c0_61 = arith.constant 0 : index
    %c0_62 = arith.constant 0 : index
    %90 = vector.load %arg9[%c9_60, %c0_61, %c0_62] : memref<10x10x64xf32, #tpu.memory_space<vmem>>, vector<1x10x64xf32>
    tpu.vector_store %arg9[%c9_60, %c0_61, %c0_62], %89 {strides = array<i32>} : memref<10x10x64xf32, #tpu.memory_space<vmem>>, vector<1x10x64xf32>,
    %cst_63 = arith.constant 0.000000e+00 : f32
    %91 = vector.broadcast %cst_63 : f32 to vector<8x1x64xf32>
    %c1_64 = arith.constant 1 : index
    %c0_65 = arith.constant 0 : index
    %c0_66 = arith.constant 0 : index
    %92 = vector.load %arg9[%c1_64, %c0_65, %c0_66] : memref<10x10x64xf32, #tpu.memory_space<vmem>>, vector<8x1x64xf32>
    tpu.vector_store %arg9[%c1_64, %c0_65, %c0_66], %91 {strides = array<i32>} : memref<10x10x64xf32, #tpu.memory_space<vmem>>, vector<8x1x64xf32>,
    %cst_67 = arith.constant 0.000000e+00 : f32
    %93 = vector.broadcast %cst_67 : f32 to vector<8x1x64xf32>
    %c1_68 = arith.constant 1 : index
    %c9_69 = arith.constant 9 : index
    %c0_70 = arith.constant 0 : index
    %94 = vector.load %arg9[%c1_68, %c9_69, %c0_70] : memref<10x10x64xf32, #tpu.memory_space<vmem>>, vector<8x1x64xf32>
    tpu.vector_store %arg9[%c1_68, %c9_69, %c0_70], %93 {strides = array<i32>} : memref<10x10x64xf32, #tpu.memory_space<vmem>>, vector<8x1x64xf32>,
    %95 = vector.shape_cast %86 : vector<64x64xf32> to vector<8x8x64xf32>
    %c1_71 = arith.constant 1 : index
    %c1_72 = arith.constant 1 : index
    %c0_73 = arith.constant 0 : index
    %96 = vector.load %arg9[%c1_71, %c1_72, %c0_73] : memref<10x10x64xf32, #tpu.memory_space<vmem>>, vector<8x8x64xf32>
    tpu.vector_store %arg9[%c1_71, %c1_72, %c0_73], %95 {strides = array<i32>} : memref<10x10x64xf32, #tpu.memory_space<vmem>>, vector<8x8x64xf32>,
    %c0_74 = arith.constant 0 : index
    %c0_75 = arith.constant 0 : index
    %c0_76 = arith.constant 0 : index
    %97 = vector.load %arg9[%c0_74, %c0_75, %c0_76] : memref<10x10x64xf32, #tpu.memory_space<vmem>>, vector<10x10x64xf32>
    %98 = vector.extract_strided_slice %97 {offsets = [0, 0, 0], sizes = [8, 8, 64], strides = [1, 1, 1]} : vector<10x10x64xf32> to vector<8x8x64xf32>
    %99 = vector.shape_cast %98 : vector<8x8x64xf32> to vector<64x64xf32>
    %100 = arith.truncf %99 : vector<64x64xf32> to vector<64x64xbf16>
    %101 = vector.extract_strided_slice %97 {offsets = [0, 1, 0], sizes = [8, 8, 64], strides = [1, 1, 1]} : vector<10x10x64xf32> to vector<8x8x64xf32>
    %102 = vector.shape_cast %101 : vector<8x8x64xf32> to vector<64x64xf32>
    %103 = arith.truncf %102 : vector<64x64xf32> to vector<64x64xbf16>
    %104 = vector.extract_strided_slice %97 {offsets = [0, 2, 0], sizes = [8, 8, 64], strides = [1, 1, 1]} : vector<10x10x64xf32> to vector<8x8x64xf32>
    %105 = vector.shape_cast %104 : vector<8x8x64xf32> to vector<64x64xf32>
    %106 = arith.truncf %105 : vector<64x64xf32> to vector<64x64xbf16>
    %107 = vector.extract_strided_slice %97 {offsets = [1, 0, 0], sizes = [8, 8, 64], strides = [1, 1, 1]} : vector<10x10x64xf32> to vector<8x8x64xf32>
    %108 = vector.shape_cast %107 : vector<8x8x64xf32> to vector<64x64xf32>
    %109 = arith.truncf %108 : vector<64x64xf32> to vector<64x64xbf16>
    %110 = vector.extract_strided_slice %97 {offsets = [1, 1, 0], sizes = [8, 8, 64], strides = [1, 1, 1]} : vector<10x10x64xf32> to vector<8x8x64xf32>
    %111 = vector.shape_cast %110 : vector<8x8x64xf32> to vector<64x64xf32>
    %112 = arith.truncf %111 : vector<64x64xf32> to vector<64x64xbf16>
    %113 = vector.extract_strided_slice %97 {offsets = [1, 2, 0], sizes = [8, 8, 64], strides = [1, 1, 1]} : vector<10x10x64xf32> to vector<8x8x64xf32>
    %114 = vector.shape_cast %113 : vector<8x8x64xf32> to vector<64x64xf32>
    %115 = arith.truncf %114 : vector<64x64xf32> to vector<64x64xbf16>
    %116 = vector.extract_strided_slice %97 {offsets = [2, 0, 0], sizes = [8, 8, 64], strides = [1, 1, 1]} : vector<10x10x64xf32> to vector<8x8x64xf32>
    %117 = vector.shape_cast %116 : vector<8x8x64xf32> to vector<64x64xf32>
    %118 = arith.truncf %117 : vector<64x64xf32> to vector<64x64xbf16>
    %119 = vector.extract_strided_slice %97 {offsets = [2, 1, 0], sizes = [8, 8, 64], strides = [1, 1, 1]} : vector<10x10x64xf32> to vector<8x8x64xf32>
    %120 = vector.shape_cast %119 : vector<8x8x64xf32> to vector<64x64xf32>
    %121 = arith.truncf %120 : vector<64x64xf32> to vector<64x64xbf16>
    %122 = vector.extract_strided_slice %97 {offsets = [2, 2, 0], sizes = [8, 8, 64], strides = [1, 1, 1]} : vector<10x10x64xf32> to vector<8x8x64xf32>
    %123 = vector.shape_cast %122 : vector<8x8x64xf32> to vector<64x64xf32>
    %124 = arith.truncf %123 : vector<64x64xf32> to vector<64x64xbf16>
    %125 = tpu.concatenate %100, %103, %106, %109, %112, %115, %118, %121, %124 in 1 : vector<64x64xbf16>, vector<64x64xbf16>, vector<64x64xbf16>, vector<64x64xbf16>, vector<64x64xbf16>, vector<64x64xbf16>, vector<64x64xbf16>, vector<64x64xbf16>, vector<64x64xbf16> -> vector<64x576xbf16>
    %c960 = arith.constant 960 : index
    %c0_77 = arith.constant 0 : index
    %126 = vector.load %arg5[%c960, %c0_77] : memref<2432x64xbf16, #tpu.memory_space<vmem>>, vector<576x64xbf16>
    %cst_78 = arith.constant dense<0.000000e+00> : vector<64x64xf32>
    %127 = tpu.matmul %125, %126, %cst_78 {dimension_numbers = #tpu.dot_dimension_numbers<[1], [0], [0], [1], [0, 0, 1, 1], [], []>} : vector<64x576xbf16>, vector<576x64xbf16>, vector<64x64xf32> -> vector<64x64xf32>
    %c5 = arith.constant 5 : index
    %c0_79 = arith.constant 0 : index
    %128 = vector.load %arg6[%c5, %c0_79] : memref<16x64xf32, #tpu.memory_space<vmem>>, vector<1x64xf32>
    %129 = vector.broadcast %128 : vector<1x64xf32> to vector<64x64xf32>
    %130 = arith.addf %127, %129 : vector<64x64xf32>
    %cst_80 = arith.constant 0.000000e+00 : f32
    %131 = vector.broadcast %cst_80 : f32 to vector<64x64xf32>
    %132 = arith.maximumf %130, %131 : vector<64x64xf32>
    %c2176 = arith.constant 2176 : index
    %c0_81 = arith.constant 0 : index
    %133 = vector.load %arg5[%c2176, %c0_81] : memref<2432x64xbf16, #tpu.memory_space<vmem>>, vector<256x64xbf16>
    %134 = arith.truncf %132 : vector<64x64xf32> to vector<64x64xbf16>
    %cst_82 = arith.constant dense<0.000000e+00> : vector<256x64xf32>
    %135 = tpu.matmul %133, %134, %cst_82 {dimension_numbers = #tpu.dot_dimension_numbers<[1], [0], [0], [1], [0, 0, 1, 1], [], []>} : vector<256x64xbf16>, vector<64x64xbf16>, vector<256x64xf32> -> vector<256x64xf32>
    %136 = arith.addf %8, %135 : vector<256x64xf32>
    %cst_83 = arith.constant 0.000000e+00 : f32
    %137 = vector.broadcast %cst_83 : f32 to vector<1x18x64xf32>
    %c0_84 = arith.constant 0 : index
    %c0_85 = arith.constant 0 : index
    %c0_86 = arith.constant 0 : index
    %138 = vector.load %arg10[%c0_84, %c0_85, %c0_86] : memref<18x18x64xf32, #tpu.memory_space<vmem>>, vector<1x18x64xf32>
    tpu.vector_store %arg10[%c0_84, %c0_85, %c0_86], %137 {strides = array<i32>} : memref<18x18x64xf32, #tpu.memory_space<vmem>>, vector<1x18x64xf32>,
    %cst_87 = arith.constant 0.000000e+00 : f32
    %139 = vector.broadcast %cst_87 : f32 to vector<1x18x64xf32>
    %c17 = arith.constant 17 : index
    %c0_88 = arith.constant 0 : index
    %c0_89 = arith.constant 0 : index
    %140 = vector.load %arg10[%c17, %c0_88, %c0_89] : memref<18x18x64xf32, #tpu.memory_space<vmem>>, vector<1x18x64xf32>
    tpu.vector_store %arg10[%c17, %c0_88, %c0_89], %139 {strides = array<i32>} : memref<18x18x64xf32, #tpu.memory_space<vmem>>, vector<1x18x64xf32>,
    %cst_90 = arith.constant 0.000000e+00 : f32
    %141 = vector.broadcast %cst_90 : f32 to vector<16x1x64xf32>
    %c1_91 = arith.constant 1 : index
    %c0_92 = arith.constant 0 : index
    %c0_93 = arith.constant 0 : index
    %142 = vector.load %arg10[%c1_91, %c0_92, %c0_93] : memref<18x18x64xf32, #tpu.memory_space<vmem>>, vector<16x1x64xf32>
    tpu.vector_store %arg10[%c1_91, %c0_92, %c0_93], %141 {strides = array<i32>} : memref<18x18x64xf32, #tpu.memory_space<vmem>>, vector<16x1x64xf32>,
    %cst_94 = arith.constant 0.000000e+00 : f32
    %143 = vector.broadcast %cst_94 : f32 to vector<16x1x64xf32>
    %c1_95 = arith.constant 1 : index
    %c17_96 = arith.constant 17 : index
    %c0_97 = arith.constant 0 : index
    %144 = vector.load %arg10[%c1_95, %c17_96, %c0_97] : memref<18x18x64xf32, #tpu.memory_space<vmem>>, vector<16x1x64xf32>
    tpu.vector_store %arg10[%c1_95, %c17_96, %c0_97], %143 {strides = array<i32>} : memref<18x18x64xf32, #tpu.memory_space<vmem>>, vector<16x1x64xf32>,
    %145 = vector.shape_cast %136 : vector<256x64xf32> to vector<16x16x64xf32>
    %c1_98 = arith.constant 1 : index
    %c1_99 = arith.constant 1 : index
    %c0_100 = arith.constant 0 : index
    %146 = vector.load %arg10[%c1_98, %c1_99, %c0_100] : memref<18x18x64xf32, #tpu.memory_space<vmem>>, vector<16x16x64xf32>
    tpu.vector_store %arg10[%c1_98, %c1_99, %c0_100], %145 {strides = array<i32>} : memref<18x18x64xf32, #tpu.memory_space<vmem>>, vector<16x16x64xf32>,
    %c0_101 = arith.constant 0 : index
    %c0_102 = arith.constant 0 : index
    %c0_103 = arith.constant 0 : index
    %147 = vector.load %arg10[%c0_101, %c0_102, %c0_103] : memref<18x18x64xf32, #tpu.memory_space<vmem>>, vector<18x18x64xf32>
    %148 = vector.extract_strided_slice %147 {offsets = [0, 0, 0], sizes = [16, 16, 64], strides = [1, 1, 1]} : vector<18x18x64xf32> to vector<16x16x64xf32>
    %149 = vector.shape_cast %148 : vector<16x16x64xf32> to vector<256x64xf32>
    %150 = arith.truncf %149 : vector<256x64xf32> to vector<256x64xbf16>
    %151 = vector.extract_strided_slice %147 {offsets = [0, 1, 0], sizes = [16, 16, 64], strides = [1, 1, 1]} : vector<18x18x64xf32> to vector<16x16x64xf32>
    %152 = vector.shape_cast %151 : vector<16x16x64xf32> to vector<256x64xf32>
    %153 = arith.truncf %152 : vector<256x64xf32> to vector<256x64xbf16>
    %154 = vector.extract_strided_slice %147 {offsets = [0, 2, 0], sizes = [16, 16, 64], strides = [1, 1, 1]} : vector<18x18x64xf32> to vector<16x16x64xf32>
    %155 = vector.shape_cast %154 : vector<16x16x64xf32> to vector<256x64xf32>
    %156 = arith.truncf %155 : vector<256x64xf32> to vector<256x64xbf16>
    %157 = vector.extract_strided_slice %147 {offsets = [1, 0, 0], sizes = [16, 16, 64], strides = [1, 1, 1]} : vector<18x18x64xf32> to vector<16x16x64xf32>
    %158 = vector.shape_cast %157 : vector<16x16x64xf32> to vector<256x64xf32>
    %159 = arith.truncf %158 : vector<256x64xf32> to vector<256x64xbf16>
    %160 = vector.extract_strided_slice %147 {offsets = [1, 1, 0], sizes = [16, 16, 64], strides = [1, 1, 1]} : vector<18x18x64xf32> to vector<16x16x64xf32>
    %161 = vector.shape_cast %160 : vector<16x16x64xf32> to vector<256x64xf32>
    %162 = arith.truncf %161 : vector<256x64xf32> to vector<256x64xbf16>
    %163 = vector.extract_strided_slice %147 {offsets = [1, 2, 0], sizes = [16, 16, 64], strides = [1, 1, 1]} : vector<18x18x64xf32> to vector<16x16x64xf32>
    %164 = vector.shape_cast %163 : vector<16x16x64xf32> to vector<256x64xf32>
    %165 = arith.truncf %164 : vector<256x64xf32> to vector<256x64xbf16>
    %166 = vector.extract_strided_slice %147 {offsets = [2, 0, 0], sizes = [16, 16, 64], strides = [1, 1, 1]} : vector<18x18x64xf32> to vector<16x16x64xf32>
    %167 = vector.shape_cast %166 : vector<16x16x64xf32> to vector<256x64xf32>
    %168 = arith.truncf %167 : vector<256x64xf32> to vector<256x64xbf16>
    %169 = vector.extract_strided_slice %147 {offsets = [2, 1, 0], sizes = [16, 16, 64], strides = [1, 1, 1]} : vector<18x18x64xf32> to vector<16x16x64xf32>
    %170 = vector.shape_cast %169 : vector<16x16x64xf32> to vector<256x64xf32>
    %171 = arith.truncf %170 : vector<256x64xf32> to vector<256x64xbf16>
    %172 = vector.extract_strided_slice %147 {offsets = [2, 2, 0], sizes = [16, 16, 64], strides = [1, 1, 1]} : vector<18x18x64xf32> to vector<16x16x64xf32>
    %173 = vector.shape_cast %172 : vector<16x16x64xf32> to vector<256x64xf32>
    %174 = arith.truncf %173 : vector<256x64xf32> to vector<256x64xbf16>
    %175 = tpu.concatenate %150, %153, %156, %159, %162, %165, %168, %171, %174 in 1 : vector<256x64xbf16>, vector<256x64xbf16>, vector<256x64xbf16>, vector<256x64xbf16>, vector<256x64xbf16>, vector<256x64xbf16>, vector<256x64xbf16>, vector<256x64xbf16>, vector<256x64xbf16> -> vector<256x576xbf16>
    %c1536 = arith.constant 1536 : index
    %c0_104 = arith.constant 0 : index
    %176 = vector.load %arg5[%c1536, %c0_104] : memref<2432x64xbf16, #tpu.memory_space<vmem>>, vector<576x64xbf16>
    %cst_105 = arith.constant dense<0.000000e+00> : vector<256x64xf32>
    %177 = tpu.matmul %175, %176, %cst_105 {dimension_numbers = #tpu.dot_dimension_numbers<[1], [0], [0], [1], [0, 0, 1, 1], [], []>} : vector<256x576xbf16>, vector<576x64xbf16>, vector<256x64xf32> -> vector<256x64xf32>
    %c6 = arith.constant 6 : index
    %c0_106 = arith.constant 0 : index
    %178 = vector.load %arg6[%c6, %c0_106] : memref<16x64xf32, #tpu.memory_space<vmem>>, vector<1x64xf32>
    %179 = vector.broadcast %178 : vector<1x64xf32> to vector<256x64xf32>
    %180 = arith.addf %177, %179 : vector<256x64xf32>
    %cst_107 = arith.constant 0.000000e+00 : f32
    %181 = vector.broadcast %cst_107 : f32 to vector<256x64xf32>
    %182 = arith.maximumf %180, %181 : vector<256x64xf32>
    %c7 = arith.constant 7 : index
    %c0_108 = arith.constant 0 : index
    %183 = vector.load %arg6[%c7, %c0_108] : memref<16x64xf32, #tpu.memory_space<vmem>>, vector<1x64xf32>
    %184 = vector.broadcast %183 : vector<1x64xf32> to vector<256x64xf32>
    %185 = arith.mulf %182, %184 : vector<256x64xf32>
    %cst_109 = arith.constant dense<0.000000e+00> : vector<256xf32>
    %186 = vector.multi_reduction <add>, %185, %cst_109 [1] : vector<256x64xf32> to vector<256xf32>
    %187 = vector.shape_cast %186 : vector<256xf32> to vector<256x1xf32>
    %c8 = arith.constant 8 : index
    %c0_110 = arith.constant 0 : index
    %188 = vector.load %arg6[%c8, %c0_110] : memref<16x64xf32, #tpu.memory_space<vmem>>, vector<1x1xf32>
    %189 = vector.broadcast %188 : vector<1x1xf32> to vector<256x1xf32>
    %190 = arith.addf %187, %189 : vector<256x1xf32>
    %cst_111 = arith.constant 0.000000e+00 : f32
    %191 = vector.broadcast %cst_111 : f32 to vector<256x1xf32>
    %192 = arith.maximumf %190, %191 : vector<256x1xf32>
    %c0_112 = arith.constant 0 : index
    %c0_113 = arith.constant 0 : index
    %c0_114 = arith.constant 0 : index
    %193 = vector.load %arg7[%c0_112, %c0_113, %c0_114] : memref<1x256x1xf32, #tpu.memory_space<vmem>>, vector<1x256x1xf32>
    %194 = vector.shape_cast %193 : vector<1x256x1xf32> to vector<256x1xf32>
    %195 = vector.shape_cast %192 : vector<256x1xf32> to vector<1x256x1xf32>
    tpu.vector_store %arg7[%c0_112, %c0_113, %c0_114], %195 {strides = array<i32>} : memref<1x256x1xf32, #tpu.memory_space<vmem>>, vector<1x256x1xf32>,
    return
  }
  func.func @transform_0(%arg0: i32) -> (i32, i32, i32) {
    %c0_i32 = arith.constant 0 : i32
    %c0_i32_0 = arith.constant 0 : i32
    %c0_i32_1 = arith.constant 0 : i32
    return %arg0, %c0_i32, %c0_i32_0 : i32, i32, i32
  }
  func.func @transform_1(%arg0: i32) -> (i32, i32, i32) {
    %c0_i32 = arith.constant 0 : i32
    %c0_i32_0 = arith.constant 0 : i32
    %c0_i32_1 = arith.constant 0 : i32
    return %arg0, %c0_i32, %c0_i32_0 : i32, i32, i32
  }
  func.func @transform_2(%arg0: i32) -> (i32, i32, i32) {
    %c0_i32 = arith.constant 0 : i32
    %c0_i32_0 = arith.constant 0 : i32
    %c0_i32_1 = arith.constant 0 : i32
    return %arg0, %c0_i32, %c0_i32_0 : i32, i32, i32
  }
  func.func @transform_3(%arg0: i32) -> (i32, i32, i32) {
    %c0_i32 = arith.constant 0 : i32
    %c0_i32_0 = arith.constant 0 : i32
    %c0_i32_1 = arith.constant 0 : i32
    return %arg0, %c0_i32, %c0_i32_0 : i32, i32, i32
  }
  func.func @transform_4(%arg0: i32) -> (i32, i32) {
    %c0_i32 = arith.constant 0 : i32
    %c0_i32_0 = arith.constant 0 : i32
    %c0_i32_1 = arith.constant 0 : i32
    return %c0_i32, %c0_i32_0 : i32, i32
  }
  func.func @transform_5(%arg0: i32) -> (i32, i32) {
    %c0_i32 = arith.constant 0 : i32
    %c0_i32_0 = arith.constant 0 : i32
    %c0_i32_1 = arith.constant 0 : i32
    return %c0_i32, %c0_i32_0 : i32, i32
  }
  func.func @transform_6(%arg0: i32) -> (i32, i32, i32) {
    %c0_i32 = arith.constant 0 : i32
    %c0_i32_0 = arith.constant 0 : i32
    %c0_i32_1 = arith.constant 0 : i32
    return %arg0, %c0_i32, %c0_i32_0 : i32, i32, i32
  }
}

</mosaic_0001>

<bundles_post_ra>
// kernel: forward.1
= control target key start
LH: loop header
LB: loop body
LE: loop exit
PB: predicated region body
PF: predicated region fallthrough
CT: control target
= control target key end

     0   :  { %s6407_s21 = smov 0   ;;  %s8771_s0 = inlined_call_operand.vmem [shape: bf16[2,256,64], index: 0, kind: input, shape index: {}]   ;;  %s8772_s1 = inlined_call_operand.vmem [shape: bf16[2,64,80], index: 1, kind: input, shape index: {}]   ;;  %s8773_s2 = inlined_call_operand.vmem [shape: bf16[2,64,96], index: 2, kind: input, shape index: {}]   ;;  %s8774_s3 = inlined_call_operand.vmem [shape: bf16[2,16,144], index: 3, kind: input, shape index: {}]   ;;  %s8775_s4 = inlined_call_operand.vmem [shape: bf16[2432,64], index: 4, kind: input, shape index: {}]   ;;  %s8776_s5 = inlined_call_operand.vmem [shape: f32[16,64], index: 5, kind: input, shape index: {}]   ;;  %s8777_s6 = inlined_call_operand.vmem [shape: f32[2,256,1], index: 6, kind: output, shape index: {}]  }
   0x1 LB: > { %s5198_s22 = sadd.s32 4294967295, %s6367_s21   ;;  %p5202_p0 = scmp.ge.s32.totalorder %s6367_s21, 1  ;;  %s6367_s21 = sphi %s6407_s21, %s16_s21  }
   0x2   : > { %p242_p1 = scmp.lt.s32.totalorder %s6367_s21, 3 }
   0x4   : > { %p243_p2 = pnand %p5202_p0, %p242_p1 }
   0x6   : > { %246 = sbr.rel (%p243_p2) target bundleno = 2234 (0x8ba), region = 44 }
   0xd   : > { %v6179_v0 = vld [vmem:[%s8775_s4] sm:$0xff]   ;;  %p287_p3 = scmp.lt.s32.totalorder %s5198_s22, 1  ;;  %v6180_v1 = vld [vmem:[%s8775_s4 + $0x8] sm:$0xff]   ;;  %v6181_v2 = vld [vmem:[%s8775_s4 + $0x10] sm:$0xff]   ;;  %vm462_vm0 = vcmask 523264   ;;  %v6369_v8 = vmov 0  }
   0xe   : > { %5960 = vmatprep.subr.bf16.mxu0 %v6179_v0  ;;  %v6182_v4 = vld [vmem:[%s8775_s4 + $0x18] sm:$0xff]   ;;  %v6192_v9 = vld [vmem:[%s8775_s4 + $0x80] sm:$0xff]   ;;  %v6195_v12 = vld [vmem:[%s8775_s4 + $0x88] sm:$0xff]   ;;  %vm1118_vm1 = vcmask 130048   ;;  %vm777_vm2 = vcmask 654336   ;;  %vm944_vm3 = vcmask 785408  }
   0xf   : > { %s8850_s22 = smov (!%p287_p3, %s5198_s22), 1  ;;  %5961 = vmatpush3.bf16.msra.mxu0 %v6179_v0  ;;  %v6189_v5 = vld [vmem:[%s8775_s4 + $0x78] sm:$0xff]   ;;  %v6197_v13 = vld [vmem:[%s8775_s4 + $0x90] sm:$0xff]   ;;  %v6202_v17 = vld [vmem:[%s8775_s4 + $0xa0] sm:$0xff]   ;;  %vm1286_vm4 = vcmask 516096   ;;  %vm1280_vm5 = vcmask 517120  }
  0x10   : > { %5962 = vmatprep.subr.bf16.mxu0 %v6180_v1  ;;  %s5471_s29 = sshll.u32 %s8850_s22, 7  ;;  %s5474_s17 = sshll.u32 %s8850_s22, 4  ;;  %v6199_v16 = vld [vmem:[%s8775_s4 + $0x98] sm:$0xff]   ;;  %v6203_v20 = vld [vmem:[%s8775_s4 + $0xa8] sm:$0xff]   ;;  %v6206_v21 = vld [vmem:[%s8775_s4 + $0xb0] sm:$0xff]   ;;  %vm1351_vm6 = vcmask 1046528  }
  0x11   : > { %s6430_s8 = scalar_lea.vmem %s8771_s0, %s5471_s29  ;;  %s6462_s24 = scalar_lea.vmem %s8774_s3, %s5474_s17  ;;  %v6207_v24 = vld [vmem:[%s8775_s4 + $0xb8] sm:$0xff]   ;;  %v6211_v32 = vld [vmem:[%s8775_s4 + $0x20] sm:$0xff]   ;;  %v6212_v33 = vld [vmem:[%s8775_s4 + $0x28] sm:$0xff]   ;;  %vm1388_vm7 = vcmask 1045504   ;;  %vm5074_vm8 = vcmask 7168  }
  0x12   : > { %v6183_v3 = vld [vmem:[%s6430_s8] sm:$0xff]   ;;  %v6184_v6 = vld [vmem:[%s6430_s8 + $0x8] sm:$0xff]   ;;  %v6185_v7 = vld [vmem:[%s6430_s8 + $0x10] sm:$0xff]   ;;  %6000 = vmatprep.subr.bf16.mxu1 %v6211_v32  ;;  %s5472_s23 = sshll.u32 %s8850_s22, 5 }
  0x13   : > { %5963 = vmatpush3.bf16.msra.mxu0 %v6180_v1  ;;  %5968 = vmatprep.mubr.msk.bf16.mxu0 %vm462_vm0, %v6183_v3  ;;  %v6186_v10 = vld [vmem:[%s6430_s8 + $0x18] sm:$0xff]   ;;  %v6187_v11 = vld [vmem:[%s6430_s8 + $0x20] sm:$0xff]   ;;  %v6188_v14 = vld [vmem:[%s6430_s8 + $0x28] sm:$0xff]   ;;  %s296_s26 = scalar_lea.vmem %s8772_s1, %s5472_s23  ;;  %s301_s10 = scalar_lea.vmem %s8773_s2, %s5472_s23 }
  0x14   : > { %5964 = vmatprep.subr.bf16.mxu0 %v6181_v2  ;;  %v6190_v15 = vld [vmem:[%s6430_s8 + $0x30] sm:$0xff]   ;;  %v6191_v18 = vld [vmem:[%s6430_s8 + $0x38] sm:$0xff]   ;;  %v6193_v19 = vld [vmem:[%s6430_s8 + $0x40] sm:$0xff]   ;;  %6001 = vmatpush3.bf16.msra.mxu1 %v6211_v32 }
  0x15   : > { %v6194_v22 = vld [vmem:[%s6430_s8 + $0x48] sm:$0xff]   ;;  %v6196_v23 = vld [vmem:[%s6430_s8 + $0x50] sm:$0xff]   ;;  %v6198_v25 = vld [vmem:[%s6430_s8 + $0x58] sm:$0xff]   ;;  %6002 = vmatprep.subr.bf16.mxu1 %v6212_v33 }
  0x16   : > { %v6200_v26 = vld [vmem:[%s6430_s8 + $0x60] sm:$0xff]   ;;  %v6201_v27 = vld [vmem:[%s6430_s8 + $0x68] sm:$0xff]   ;;  %v6204_v28 = vld [vmem:[%s6430_s8 + $0x70] sm:$0xff]  }
  0x17   : > { %5965 = vmatpush3.bf16.msra.mxu0 %v6181_v2  ;;  %v6205_v29 = vld [vmem:[%s6430_s8 + $0x78] sm:$0xff]   ;;  %v6210_v30 = vld [vmem:[%s6462_s24 + $0x4] ss:$8 sps:$4 sm:$0xff]   ;;  %v6208_v31 = vld [vmem:[%s6462_s24] ss:$8 sps:$4 sm:$0xff]   ;;  %s5475_s8 = sshll.u32 %s8850_s22, 8 }
  0x18   : > { %5966 = vmatprep.subr.bf16.mxu0 %v6182_v4  ;;  %6003 = vmatpush3.bf16.msra.mxu1 %v6212_v33  ;;  %v6213_v34 = vld [vmem:[%s8775_s4 + $0x30] sm:$0xff]   ;;  %v6214_v35 = vld [vmem:[%s8775_s4 + $0x38] sm:$0xff]   ;;  %v6215_v36 = vld [vmem:[%s8775_s4 + $0x40] sm:$0xff]   ;;  %s8671_s18 = scalar_lea.vmem %s8777_s6, %s5475_s8 }
  0x19   : > { %6004 = vmatprep.subr.bf16.mxu1 %v6213_v34  ;;  %v6216_v37 = vld [vmem:[%s296_s26] sm:$0xff]   ;;  %v6217_v38 = vld [vmem:[%s8775_s4 + $0x48] sm:$0xff]   ;;  %v6219_v40 = vld [vmem:[%s8775_s4 + $0x50] sm:$0xff]  }
  0x1a   : > { %6010 = vmatprep.mubr.msk.bf16.mxu1 %vm777_vm2, %v6216_v37  ;;  %v6218_v39 = vld [vmem:[%s296_s26 + $0x8] sm:$0xff]   ;;  %v6220_v41 = vld [vmem:[%s8775_s4 + $0x58] sm:$0xff]   ;;  %v6221_v42 = vld [vmem:[%s8775_s4 + $0x60] sm:$0xff]  }
  0x1b   : > { %5967 = vmatpush3.bf16.msra.mxu0 %v6182_v4  ;;  %v6222_v43 = vld [vmem:[%s296_s26 + $0x10] sm:$0xff]   ;;  %v6223_v44 = vld [vmem:[%s296_s26 + $0x18] sm:$0xff]   ;;  %v6224_v45 = vld [vmem:[%s8775_s4 + $0x68] sm:$0xff]   ;;  %s6371_s26 = smov 64  }
  0x1c   : > { %1122 = vmatprep.subr.bf16.mxu0 %v6369_v8  ;;  %6005 = vmatpush3.bf16.msra.mxu1 %v6213_v34  ;;  %v6225_v46 = vld [vmem:[%s8775_s4 + $0x70] sm:$0xff]   ;;  %v6226_v47 = vld [vmem:[%s301_s10] sm:$0xff]   ;;  %v6227_v48 = vld [vmem:[%s301_s10 + $0x8] sm:$0xff]  }
  0x1d   : > { %6006 = vmatprep.subr.bf16.mxu1 %v6214_v35  ;;  %v6228_v49 = vld [vmem:[%s301_s10 + $0x10] sm:$0xff]   ;;  %v6229_v50 = vld [vmem:[%s301_s10 + $0x18] sm:$0xff]   ;;  %v6230_v51 = vld [vmem:[%s8775_s4 + $0x420] sm:$0xff]  }
  0x1e   : > { %5969 = vmatmul.mubr.msk.bf16.vlgmr.msra.gmra.mrb[0].mxu0 %vm462_vm0, %v6184_v6  ;;  %v6233_v32 = vld [vmem:[%s8775_s4 + $0x438] sm:$0xff]  }
  0x1f   : > { %5972 = vmatprep.mubr.msk.bf16.mxu0 %vm462_vm0, %v6185_v7  ;;  %1123 = vmatpush1.bf16.msra.mxu0 %v6189_v5 }
  0x20   : > { %1124 = vmatprep.subr.bf16.mxu0 %v6369_v8  ;;  %6007 = vmatpush3.bf16.msra.mxu1 %v6214_v35 }
  0x21   : > { %6008 = vmatprep.subr.bf16.mxu1 %v6215_v36 }
  0x23   : > { %1125 = vmatpush1.bf16.msra.mxu0 %v6192_v9 }
  0x24   : > { %1126 = vmatprep.subr.bf16.mxu0 %v6369_v8  ;;  %6009 = vmatpush3.bf16.msra.mxu1 %v6215_v36 }
  0x25   : > { %6018 = vmatprep.subr.bf16.mxu1 %v6217_v38 }
  0x26   : > { %5973 = vmatmul.mubr.msk.bf16.gmra.mrb[4].mxu0 %vm462_vm0, %v6186_v10 }
  0x27   : > { %5976 = vmatprep.mubr.msk.bf16.mxu0 %vm462_vm0, %v6187_v11  ;;  %1127 = vmatpush1.bf16.msra.mxu0 %v6195_v12 }
  0x28   : > { %1128 = vmatprep.subr.bf16.mxu0 %v6369_v8  ;;  %6011 = vmatmul.mubr.msk.bf16.vlgmr.msra.gmra.mrb[0].mxu1 %vm777_vm2, %v6218_v39 }
  0x29   : > { %6019 = vmatpush3.bf16.msra.mxu1 %v6217_v38  ;;  %6014 = vmatprep.mubr.msk.bf16.mxu1 %vm777_vm2, %v6222_v43 }
  0x2a   : > { %6020 = vmatprep.subr.bf16.mxu1 %v6219_v40 }
  0x2b   : > { %1129 = vmatpush1.bf16.msra.mxu0 %v6197_v13 }
  0x2c   : > { %1130 = vmatprep.subr.bf16.mxu0 %v6369_v8 }
  0x2d   : > { %6021 = vmatpush3.bf16.msra.mxu1 %v6219_v40 }
  0x2e   : > { %5977 = vmatmul.mubr.msk.bf16.gmra.mrb[8].mxu0 %vm462_vm0, %v6188_v14  ;;  %6022 = vmatprep.subr.bf16.mxu1 %v6220_v41 }
  0x2f   : > { %5980 = vmatprep.mubr.msk.bf16.mxu0 %vm462_vm0, %v6190_v15  ;;  %1131 = vmatpush1.bf16.msra.mxu0 %v6199_v16 }
  0x30   : > { %1132 = vmatprep.subr.bf16.mxu0 %v6369_v8  ;;  %6015 = vmatmul.mubr.msk.bf16.gmra.mrb[4].mxu1 %vm777_vm2, %v6223_v44 }
  0x31   : > { %6023 = vmatpush3.bf16.msra.mxu1 %v6220_v41  ;;  %6030 = vmatprep.mubr.msk.bf16.mxu1 %vm944_vm3, %v6226_v47 }
  0x32   : > { %6024 = vmatprep.subr.bf16.mxu1 %v6221_v42 }
  0x33   : > { %1133 = vmatpush1.bf16.msra.mxu0 %v6202_v17 }
  0x34   : > { %1134 = vmatprep.subr.bf16.mxu0 %v6369_v8 }
  0x35   : > { %6025 = vmatpush3.bf16.msra.mxu1 %v6221_v42 }
  0x36   : > { %5981 = vmatmul.mubr.msk.bf16.gmra.mrb[12].mxu0 %vm462_vm0, %v6191_v18  ;;  %6026 = vmatprep.subr.bf16.mxu1 %v6224_v45 }
  0x37   : > { %5984 = vmatprep.mubr.msk.bf16.mxu0 %vm462_vm0, %v6193_v19  ;;  %1135 = vmatpush1.bf16.msra.mxu0 %v6203_v20  ;;  %v5279_v20 = vld [vmem:[%s8776_s5 + $0x3] ss:$0 sm:$0xff] }
  0x38   : > { %1136 = vmatprep.subr.bf16.mxu0 %v6369_v8 }
  0x39   : > { %6027 = vmatpush3.bf16.msra.mxu1 %v6224_v45 }
  0x3a   : > { %6028 = vmatprep.subr.bf16.mxu1 %v6225_v46 }
  0x3b   : > { %1137 = vmatpush1.bf16.msra.mxu0 %v6206_v21 }
  0x3c   : > { %1138 = vmatprep.subr.bf16.mxu0 %v6369_v8 }
  0x3d   : > { %6029 = vmatpush3.bf16.msra.mxu1 %v6225_v46 }
  0x3e   : > { %5985 = vmatmul.mubr.msk.bf16.gmra.mrb[16].mxu0 %vm462_vm0, %v6194_v22 }
  0x3f   : > { %5988 = vmatprep.mubr.msk.bf16.mxu0 %vm462_vm0, %v6196_v23  ;;  %1139 = vmatpush1.bf16.msra.mxu0 %v6207_v24 }
  0x40   : > { %6031 = vmatmul.mubr.msk.bf16.vlgmr.msra.gmra.mrb[8].mxu1 %vm944_vm3, %v6227_v48 }
  0x41   : > { %6034 = vmatprep.mubr.msk.bf16.mxu1 %vm944_vm3, %v6228_v49  ;;  %v6370_v49 = vmov 0.0  }
  0x42   : > { %1289 = vst.msk [vmem:[#allocation2 + $0x30] sm:$0x1] %vm1286_vm4, %v6370_v49  ;;  %1290 = vst.msk [vmem:[#allocation2 + $0x40] sm:$0x1] %vm1286_vm4, %v6370_v49 }
  0x43   : > { %1279 = vst.msk [vmem:[#allocation2] sm:$0xff] %vm462_vm0, %v6370_v49  ;;  %1283 = vst.msk [vmem:[#allocation2 + $0x90] sm:$0xff] %vm462_vm0, %v6370_v49 }
  0x44   : > { %1287 = vst.msk [vmem:[#allocation2 + $0x10] sm:$0x1] %vm1286_vm4, %v6370_v49  ;;  %1288 = vst.msk [vmem:[#allocation2 + $0x20] sm:$0x1] %vm1286_vm4, %v6370_v49 }
  0x45   : > { %1291 = vst.msk [vmem:[#allocation2 + $0x50] sm:$0x1] %vm1286_vm4, %v6370_v49  ;;  %1292 = vst.msk [vmem:[#allocation2 + $0x60] sm:$0x1] %vm1286_vm4, %v6370_v49 }
  0x46   : > { %5989 = vmatmul.mubr.msk.bf16.gmra.mrb[20].mxu0 %vm462_vm0, %v6198_v25  ;;  %1293 = vst.msk [vmem:[#allocation2 + $0x70] sm:$0x1] %vm1286_vm4, %v6370_v49  ;;  %1294 = vst.msk [vmem:[#allocation2 + $0x80] sm:$0x1] %vm1286_vm4, %v6370_v49 }
  0x47   : > { %5992 = vmatprep.mubr.msk.bf16.mxu0 %vm462_vm0, %v6200_v26  ;;  %1295 = vst.msk [vmem:[#allocation2 + $0x19] sm:$0x1] %vm1286_vm4, %v6370_v49  ;;  %1296 = vst.msk [vmem:[#allocation2 + $0x29] sm:$0x1] %vm1286_vm4, %v6370_v49 }
  0x48   : > { %6035 = vmatmul.mubr.msk.bf16.gmra.mrb[12].mxu1 %vm944_vm3, %v6229_v50  ;;  %1297 = vst.msk [vmem:[#allocation2 + $0x39] sm:$0x1] %vm1286_vm4, %v6370_v49  ;;  %1298 = vst.msk [vmem:[#allocation2 + $0x49] sm:$0x1] %vm1286_vm4, %v6370_v49  ;;  %v6234_v50 = vld [vmem:[%s8775_s4 + $0x100] sm:$0xff]  }
  0x49   : > { %6040 = vmatprep.mubr.msk.bf16.mxu1 %vm1118_vm1, %v6230_v51  ;;  %1299 = vst.msk [vmem:[#allocation2 + $0x59] sm:$0x1] %vm1286_vm4, %v6370_v49  ;;  %1300 = vst.msk [vmem:[#allocation2 + $0x69] sm:$0x1] %vm1286_vm4, %v6370_v49  ;;  %v6235_v51 = vld [vmem:[%s8775_s4 + $0xc0] sm:$0xff]  }
  0x4a   : > { %1301 = vst.msk [vmem:[#allocation2 + $0x79] sm:$0x1] %vm1286_vm4, %v6370_v49  ;;  %1302 = vst.msk [vmem:[#allocation2 + $0x89] sm:$0x1] %vm1286_vm4, %v6370_v49 }
  0x4b   : > { %2064 = vst.msk [vmem:[#allocation3] sm:$0xff] %vm462_vm0, %v6370_v49  ;;  %2067 = vst.msk [vmem:[#allocation3 + $0x90] sm:$0xff] %vm462_vm0, %v6370_v49 }
  0x4c   : > { %2070 = vst.msk [vmem:[#allocation3 + $0x10] sm:$0x1] %vm1286_vm4, %v6370_v49  ;;  %2071 = vst.msk [vmem:[#allocation3 + $0x20] sm:$0x1] %vm1286_vm4, %v6370_v49 }
  0x4d   : > { %2072 = vst.msk [vmem:[#allocation3 + $0x30] sm:$0x1] %vm1286_vm4, %v6370_v49  ;;  %2073 = vst.msk [vmem:[#allocation3 + $0x40] sm:$0x1] %vm1286_vm4, %v6370_v49 }
  0x4e   : > { %5993 = vmatmul.mubr.msk.bf16.gmra.mrb[24].mxu0 %vm462_vm0, %v6201_v27  ;;  %2074 = vst.msk [vmem:[#allocation3 + $0x50] sm:$0x1] %vm1286_vm4, %v6370_v49  ;;  %2075 = vst.msk [vmem:[#allocation3 + $0x60] sm:$0x1] %vm1286_vm4, %v6370_v49 }
  0x4f   : > { %5996 = vmatprep.mubr.msk.bf16.mxu0 %vm462_vm0, %v6204_v28  ;;  %2076 = vst.msk [vmem:[#allocation3 + $0x70] sm:$0x1] %vm1286_vm4, %v6370_v49  ;;  %2077 = vst.msk [vmem:[#allocation3 + $0x80] sm:$0x1] %vm1286_vm4, %v6370_v49 }
  0x50   : > { %2078 = vst.msk [vmem:[#allocation3 + $0x19] sm:$0x1] %vm1286_vm4, %v6370_v49  ;;  %2079 = vst.msk [vmem:[#allocation3 + $0x29] sm:$0x1] %vm1286_vm4, %v6370_v49 }
  0x51   : > { %2080 = vst.msk [vmem:[#allocation3 + $0x39] sm:$0x1] %vm1286_vm4, %v6370_v49  ;;  %2081 = vst.msk [vmem:[#allocation3 + $0x49] sm:$0x1] %vm1286_vm4, %v6370_v49 }
  0x52   : > { %2082 = vst.msk [vmem:[#allocation3 + $0x59] sm:$0x1] %vm1286_vm4, %v6370_v49  ;;  %2083 = vst.msk [vmem:[#allocation3 + $0x69] sm:$0x1] %vm1286_vm4, %v6370_v49 }
  0x53   : > { %2084 = vst.msk [vmem:[#allocation3 + $0x79] sm:$0x1] %vm1286_vm4, %v6370_v49  ;;  %2085 = vst.msk [vmem:[#allocation3 + $0x89] sm:$0x1] %vm1286_vm4, %v6370_v49 }
  0x54   : > { %3194 = vst.msk [vmem:[#allocation4] sm:$0xff] %vm462_vm0, %v6370_v49  ;;  %3195 = vst.msk [vmem:[#allocation4 + $0x8] sm:$0xff] %vm462_vm0, %v6370_v49 }
  0x55   : > { %3198 = vst.msk [vmem:[#allocation4 + $0x198] sm:$0xff] %vm462_vm0, %v6370_v49  ;;  %3199 = vst.msk [vmem:[#allocation4 + $0x1a0] sm:$0xff] %vm462_vm0, %v6370_v49 }
  0x56   : > { %5997 = vmatmul.mubr.msk.bf16.gmra.mrb[28].mxu0 %vm462_vm0, %v6205_v29  ;;  %3202 = vst.msk [vmem:[#allocation4 + $0x18] sm:$0x1] %vm1286_vm4, %v6370_v49  ;;  %3203 = vst.msk [vmem:[#allocation4 + $0x30] sm:$0x1] %vm1286_vm4, %v6370_v49 }
  0x57   : > { %5291 = vmatprep.mubr.msk.bf16.mxu0 %vm1118_vm1, %v6210_v30  ;;  %v6231_v30 = vld [vmem:[%s8775_s4 + $0x428] sm:$0xff]   ;;  %3204 = vst.msk [vmem:[#allocation4 + $0x48] sm:$0x1] %vm1286_vm4, %v6370_v49  ;;  %3205 = vst.msk [vmem:[#allocation4 + $0x60] sm:$0x1] %vm1286_vm4, %v6370_v49 }
  0x58   : > { %3206 = vst.msk [vmem:[#allocation4 + $0x78] sm:$0x1] %vm1286_vm4, %v6370_v49  ;;  %3207 = vst.msk [vmem:[#allocation4 + $0x90] sm:$0x1] %vm1286_vm4, %v6370_v49 }
  0x59   : > { %3208 = vst.msk [vmem:[#allocation4 + $0xa8] sm:$0x1] %vm1286_vm4, %v6370_v49  ;;  %3209 = vst.msk [vmem:[#allocation4 + $0xc0] sm:$0x1] %vm1286_vm4, %v6370_v49 }
  0x5a   : > { %3210 = vst.msk [vmem:[#allocation4 + $0xd8] sm:$0x1] %vm1286_vm4, %v6370_v49  ;;  %3211 = vst.msk [vmem:[#allocation4 + $0xf0] sm:$0x1] %vm1286_vm4, %v6370_v49 }
  0x5b   : > { %3212 = vst.msk [vmem:[#allocation4 + $0x108] sm:$0x1] %vm1286_vm4, %v6370_v49  ;;  %3213 = vst.msk [vmem:[#allocation4 + $0x120] sm:$0x1] %vm1286_vm4, %v6370_v49 }
  0x5c   : > { %3214 = vst.msk [vmem:[#allocation4 + $0x138] sm:$0x1] %vm1286_vm4, %v6370_v49  ;;  %3215 = vst.msk [vmem:[#allocation4 + $0x150] sm:$0x1] %vm1286_vm4, %v6370_v49 }
  0x5d   : > { %3216 = vst.msk [vmem:[#allocation4 + $0x168] sm:$0x1] %vm1286_vm4, %v6370_v49  ;;  %3217 = vst.msk [vmem:[#allocation4 + $0x180] sm:$0x1] %vm1286_vm4, %v6370_v49 }
  0x5e   : > { %1155 = vmatmul.mubr.bf16.vlgmr.msra.gmra.mrb[32].mxu0 %v6208_v31  ;;  %v6232_v31 = vld [vmem:[%s8775_s4 + $0x430] sm:$0xff]   ;;  %3218 = vst.msk [vmem:[#allocation4 + $0x29] sm:$0x1] %vm1286_vm4, %v6370_v49  ;;  %3219 = vst.msk [vmem:[#allocation4 + $0x41] sm:$0x1] %vm1286_vm4, %v6370_v49 }
  0x5f   : > { %3220 = vst.msk [vmem:[#allocation4 + $0x59] sm:$0x1] %vm1286_vm4, %v6370_v49  ;;  %3221 = vst.msk [vmem:[#allocation4 + $0x71] sm:$0x1] %vm1286_vm4, %v6370_v49 }
  0x60   : > { %3222 = vst.msk [vmem:[#allocation4 + $0x89] sm:$0x1] %vm1286_vm4, %v6370_v49  ;;  %3223 = vst.msk [vmem:[#allocation4 + $0xa1] sm:$0x1] %vm1286_vm4, %v6370_v49 }
  0x61   : > { %3224 = vst.msk [vmem:[#allocation4 + $0xb9] sm:$0x1] %vm1286_vm4, %v6370_v49  ;;  %3225 = vst.msk [vmem:[#allocation4 + $0xd1] sm:$0x1] %vm1286_vm4, %v6370_v49 }
  0x62   : > { %3226 = vst.msk [vmem:[#allocation4 + $0xe9] sm:$0x1] %vm1286_vm4, %v6370_v49  ;;  %3227 = vst.msk [vmem:[#allocation4 + $0x101] sm:$0x1] %vm1286_vm4, %v6370_v49 }
  0x63   : > { %3228 = vst.msk [vmem:[#allocation4 + $0x119] sm:$0x1] %vm1286_vm4, %v6370_v49  ;;  %3229 = vst.msk [vmem:[#allocation4 + $0x131] sm:$0x1] %vm1286_vm4, %v6370_v49 }
  0x64   : > { %3230 = vst.msk [vmem:[#allocation4 + $0x149] sm:$0x1] %vm1286_vm4, %v6370_v49  ;;  %3231 = vst.msk [vmem:[#allocation4 + $0x161] sm:$0x1] %vm1286_vm4, %v6370_v49 }
  0x65   : > { %3232 = vst.msk [vmem:[#allocation4 + $0x179] sm:$0x1] %vm1286_vm4, %v6370_v49  ;;  %3233 = vst.msk [vmem:[#allocation4 + $0x191] sm:$0x1] %vm1286_vm4, %v6370_v49 }
  0x66   : > { %1281 = vst.msk [vmem:[#allocation2 + $0x8] sm:$0x3] %vm1280_vm5, %v6370_v49  ;;  %1284 = vst.msk [vmem:[#allocation2 + $0x98] sm:$0x3] %vm1280_vm5, %v6370_v49 }
  0x67   : > { %2065 = vst.msk [vmem:[#allocation3 + $0x8] sm:$0x3] %vm1280_vm5, %v6370_v49  ;;  %2068 = vst.msk [vmem:[#allocation3 + $0x98] sm:$0x3] %vm1280_vm5, %v6370_v49 }
  0x68   : > { %3196 = vst.msk [vmem:[#allocation4 + $0x10] sm:$0x3] %vm1280_vm5, %v6370_v49  ;;  %3200 = vst.msk [vmem:[#allocation4 + $0x1a8] sm:$0x3] %vm1280_vm5, %v6370_v49  ;;  %v6244_v49 = vld [vmem:[%s8775_s4 + $0x120] sm:$0xff]  }
  0xf1   : > { %v6551_v52 = vpop.f32.mrb[0].mxu0 }
  0xf2   : > { %v6553_v53 = vpop.f32.mrb[1].mxu0 }
  0xf3   : > { %v6555_v54 = vpop.f32.mrb[2].mxu0 }
  0xf4   : > { %v6557_v55 = vpop.f32.mrb[3].mxu0 }
  0xf9   : > { %v6559_v56 = vpop.f32.mrb[4].mxu0 }
  0xfa   : > { %v6561_v57 = vpop.f32.mrb[5].mxu0 }
  0xfb   : > { %v6563_v58 = vpop.f32.mrb[6].mxu0  ;;  %v6630_v33 = vpop.f32.mrb[0].mxu1 }
  0xfc   : > { %v6565_v59 = vpop.f32.mrb[7].mxu0  ;;  %v6632_v34 = vpop.f32.mrb[1].mxu1 }
  0xfd   : > { %v6634_v35 = vpop.f32.mrb[2].mxu1 }
  0xfe   : > { %v6636_v36 = vpop.f32.mrb[3].mxu1 }
 0x101   : > { %v6567_v60 = vpop.f32.mrb[8].mxu0 }
 0x102   : > { %v6569_v61 = vpop.f32.mrb[9].mxu0 }
 0x103   : > { %v6571_v62 = vpop.f32.mrb[10].mxu0  ;;  %v6638_v37 = vpop.f32.mrb[4].mxu1 }
 0x104   : > { %8785 = vst [vmem:[#allocation5_spill] sm:$0xff] %v6571_v62  ;;  %v6573_v63 = vpop.f32.mrb[11].mxu0  ;;  %v6640_v38 = vpop.f32.mrb[5].mxu1 }
 0x105   : > { %8786 = vst [vmem:[#allocation6_spill] sm:$0xff] %v6573_v63  ;;  %v6642_v39 = vpop.f32.mrb[6].mxu1 }
 0x106   : > { %v6644_v40 = vpop.f32.mrb[7].mxu1 }
 0x109   : > { %v6575_v0 = vpop.f32.mrb[12].mxu0 }
 0x10a   : > { %8787 = vst [vmem:[#allocation7_spill] sm:$0xff] %v6575_v0  ;;  %v6577_v1 = vpop.f32.mrb[13].mxu0 }
 0x10b   : > { %8788 = vst [vmem:[#allocation8_spill] sm:$0xff] %v6577_v1  ;;  %v6579_v2 = vpop.f32.mrb[14].mxu0 }
 0x10c   : > { %8789 = vst [vmem:[#allocation9_spill] sm:$0xff] %v6579_v2  ;;  %v6581_v3 = vpop.f32.mrb[15].mxu0 }
 0x10d   : > { %8790 = vst [vmem:[#allocation10_spill] sm:$0xff] %v6581_v3 }
 0x111   : > { %v6583_v4 = vpop.f32.mrb[16].mxu0 }
 0x112   : > { %8791 = vst [vmem:[#allocation11_spill] sm:$0xff] %v6583_v4  ;;  %v6585_v5 = vpop.f32.mrb[17].mxu0 }
 0x113   : > { %8792 = vst [vmem:[#allocation12_spill] sm:$0xff] %v6585_v5  ;;  %v6587_v6 = vpop.f32.mrb[18].mxu0  ;;  %v6646_v41 = vpop.f32.mrb[8].mxu1 }
 0x114   : > { %8793 = vst [vmem:[#allocation13_spill] sm:$0xff] %v6587_v6  ;;  %v6589_v7 = vpop.f32.mrb[19].mxu0  ;;  %v6648_v42 = vpop.f32.mrb[9].mxu1 }
 0x115   : > { %8794 = vst [vmem:[#allocation14_spill] sm:$0xff] %v6589_v7  ;;  %v6650_v43 = vpop.f32.mrb[10].mxu1 }
 0x116   : > { %v6652_v44 = vpop.f32.mrb[11].mxu1 }
 0x119   : > { %v6591_v8 = vpop.f32.mrb[20].mxu0 }
 0x11a   : > { %8795 = vst [vmem:[#allocation15_spill] sm:$0xff] %v6591_v8  ;;  %v6593_v9 = vpop.f32.mrb[21].mxu0 }
 0x11b   : > { %8796 = vst [vmem:[#allocation16_spill] sm:$0xff] %v6593_v9  ;;  %v6595_v10 = vpop.f32.mrb[22].mxu0  ;;  %v6654_v45 = vpop.f32.mrb[12].mxu1 }
 0x11c   : > { %8797 = vst [vmem:[#allocation17_spill] sm:$0xff] %v6595_v10  ;;  %v6597_v11 = vpop.f32.mrb[23].mxu0  ;;  %v6656_v46 = vpop.f32.mrb[13].mxu1 }
 0x11d   : > { %8798 = vst [vmem:[#allocation18_spill] sm:$0xff] %v6597_v11  ;;  %v6658_v47 = vpop.f32.mrb[14].mxu1 }
 0x11e   : > { %v6660_v48 = vpop.f32.mrb[15].mxu1 }
 0x121   : > { %v6599_v12 = vpop.f32.mrb[24].mxu0 }
 0x122   : > { %8799 = vst [vmem:[#allocation19_spill] sm:$0xff] %v6599_v12  ;;  %v6601_v13 = vpop.f32.mrb[25].mxu0 }
 0x123   : > { %8800 = vst [vmem:[#allocation20_spill] sm:$0xff] %v6601_v13  ;;  %v6603_v14 = vpop.f32.mrb[26].mxu0 }
 0x124   : > { %8801 = vst [vmem:[#allocation21_spill] sm:$0xff] %v6603_v14  ;;  %v6605_v15 = vpop.f32.mrb[27].mxu0 }
 0x125   : > { %8802 = vst [vmem:[#allocation22_spill] sm:$0xff] %v6605_v15 }
 0x129   : > { %v6607_v16 = vpop.f32.mrb[28].mxu0 }
 0x12a   : > { %8803 = vst [vmem:[#allocation23_spill] sm:$0xff] %v6607_v16  ;;  %v6609_v17 = vpop.f32.mrb[29].mxu0 }
 0x12b   : > { %8804 = vst [vmem:[#allocation24_spill] sm:$0xff] %v6609_v17  ;;  %v6611_v18 = vpop.f32.mrb[30].mxu0 }
 0x12c   : > { %8805 = vst [vmem:[#allocation25_spill] sm:$0xff] %v6611_v18  ;;  %v6613_v19 = vpop.f32.mrb[31].mxu0 }
 0x12d   : > { %8806 = vst [vmem:[#allocation26_spill] sm:$0xff] %v6613_v19 }
 0x131   : > { %v1156_v21 = vpop.f32.mrb[32].mxu0 }
 0x132   : > { %v1157_v22 = vadd.f32 %v5279_v20, %v1156_v21  ;;  %v1158_v23 = vpop.f32.mrb[33].mxu0  ;;  %v6241_v21 = vld [vmem:[%s8775_s4 + $0x180] sm:$0xff]  }
 0x133   : > { %v1159_v24 = vpop.f32.mrb[34].mxu0  ;;  %v6243_v23 = vld [vmem:[%s8775_s4 + $0x140] sm:$0xff]   ;;  %5560 = vmatprep.subr.bf16.mxu0 %v6241_v21  ;;  %v6250_v21 = vld [vmem:[%s8775_s4 + $0xe8] sm:$0xff]  }
 0x134   : > { %v1160_v25 = vadd.f32 %v5279_v20, %v1159_v24  ;;  %v1161_v26 = vpop.f32.mrb[35].mxu0  ;;  %v1163_v27 = vmax.f32 %v1157_v22, 0.0  ;;  %v6236_v20 = vld [vmem:[%s8775_s4 + $0x108] sm:$0xff]   ;;  %5561 = vmatpush3.bf16.msra.mxu0 %v6243_v23  ;;  %v6254_v23 = vld [vmem:[%s8775_s4 + $0xf0] sm:$0xff]  }
 0x135   : > { %v6237_v22 = vld [vmem:[%s8775_s4 + $0xc8] sm:$0xff]  }
 0x136   : > { %v1164_v28 = vmax.f32 %v1160_v25, 0.0  ;;  %v6245_v24 = vld [vmem:[%s8775_s4 + $0x188] sm:$0xff]   ;;  %v6238_v25 = vld [vmem:[%s8775_s4 + $0x110] sm:$0xff]  }
 0x137   : > { %v6247_v26 = vld [vmem:[%s8775_s4 + $0x148] sm:$0xff]   ;;  %5562 = vmatprep.subr.bf16.mxu0 %v6245_v24  ;;  %v5264_v24 = vld [vmem:[%s8776_s5 + $0x2] ss:$0 sm:$0xff] }
 0x138   : > { %v1173_v29 = vpack.c.bf16 %v1164_v28, %v1163_v27  ;;  %v6249_v27 = vld [vmem:[%s8775_s4 + $0x190] sm:$0xff]   ;;  %5563 = vmatpush3.bf16.msra.mxu0 %v6247_v26  ;;  %v992_v26 = vadd.f32 %v5264_v24, %v6648_v42 }
 0x139   : > { %v6239_v28 = vld [vmem:[%s8775_s4 + $0xd0] sm:$0xff]   ;;  %5564 = vmatprep.subr.bf16.mxu0 %v6249_v27  ;;  %v1003_v27 = vadd.f32 %v6650_v43, %v5264_v24 }
 0x13a   : > { %6038 = vmatprep.subr.bf16.mxu1 %v1173_v29 }
 0x13b   : > { %6039 = vmatpush3.bf16.msra.mxu1 %v1173_v29  ;;  %v6240_v29 = vld [vmem:[%s8775_s4 + $0x118] sm:$0xff]  }
 0x13c   : > { %5520 = vmatprep.subr.bf16.mxu1 %v6234_v50  ;;  %v6255_v50 = vld [vmem:[%s8775_s4 + $0x158] sm:$0xff]  }
 0x13e   : > { %6041 = vmatmul.mubr.msk.bf16.vlgmr.msra.gmra.mrb[16].mxu1 %vm1118_vm1, %v6231_v30  ;;  %v6251_v30 = vld [vmem:[%s8775_s4 + $0x150] sm:$0xff]  }
 0x13f   : > { %6044 = vmatprep.mubr.msk.bf16.mxu1 %vm1118_vm1, %v6232_v31  ;;  %5521 = vmatpush3.bf16.msra.mxu1 %v6235_v51  ;;  %v6253_v31 = vld [vmem:[%s8775_s4 + $0x198] sm:$0xff]   ;;  %v6246_v51 = vld [vmem:[%s8775_s4 + $0xe0] sm:$0xff]  }
 0x140   : > { %5522 = vmatprep.subr.bf16.mxu1 %v6236_v20  ;;  %5565 = vmatpush3.bf16.msra.mxu0 %v6251_v30  ;;  %v6248_v20 = vld [vmem:[%s8775_s4 + $0x128] sm:$0xff]   ;;  %v1022_v30 = vmax.f32 %v992_v26, 0.0 }
 0x141   : > { %5566 = vmatprep.subr.bf16.mxu0 %v6253_v31 }
 0x143   : > { %5523 = vmatpush3.bf16.msra.mxu1 %v6237_v22  ;;  %v6252_v22 = vld [vmem:[%s8775_s4 + $0x130] sm:$0xff]  }
 0x144   : > { %5524 = vmatprep.subr.bf16.mxu1 %v6238_v25  ;;  %5567 = vmatpush3.bf16.msra.mxu0 %v6255_v50  ;;  %v1000_v25 = vadd.f32 %v6646_v41, %v5264_v24  ;;  %v6256_v41 = vld [vmem:[%s8775_s4 + $0x138] sm:$0xff]  }
 0x146   : > { %6045 = vmatmul.mubr.msk.bf16.gmra.mrb[20].mxu1 %vm1118_vm1, %v6233_v32  ;;  %v6242_v32 = vld [vmem:[%s8775_s4 + $0xd8] sm:$0xff]  }
 0x147   : > { %5525 = vmatpush3.bf16.msra.mxu1 %v6239_v28  ;;  %v995_v28 = vadd.f32 %v5264_v24, %v6652_v44  ;;  %v6890_v44 = vld [vmem:[#allocation2] sm:$0xff] }
 0x148   : > { %5526 = vmatprep.subr.bf16.mxu1 %v6240_v29  ;;  %v1024_v29 = vmax.f32 %v1000_v25, 0.0  ;;  %v1008_v25 = vadd.f32 %v5264_v24, %v6656_v46  ;;  %v1011_v46 = vadd.f32 %v5264_v24, %v6660_v48 }
 0x14b   : > { %5527 = vmatpush3.bf16.msra.mxu1 %v6242_v32  ;;  %v1025_v32 = vmax.f32 %v1003_v27, 0.0  ;;  %v6258_v27 = vld [vmem:[%s8775_s4 + $0xf8] sm:$0xff]  }
 0x14c   : > { %5528 = vmatprep.subr.bf16.mxu1 %v6244_v49 }
 0x14f   : > { %5529 = vmatpush3.bf16.msra.mxu1 %v6246_v51  ;;  %v1023_v51 = vmax.f32 %v995_v28, 0.0  ;;  %v6259_v28 = vld [vmem:[%s8775_s4 + $0x160] sm:$0xff]  }
 0x150   : > { %5530 = vmatprep.subr.bf16.mxu1 %v6248_v20  ;;  %v1016_v20 = vadd.f32 %v6654_v45, %v5264_v24  ;;  %v6257_v45 = vld [vmem:[%s8775_s4 + $0x1a0] sm:$0xff]  }
 0x151   : > { %5568 = vmatprep.subr.bf16.mxu0 %v6257_v45 }
 0x152   : > { %5569 = vmatpush3.bf16.msra.mxu0 %v6259_v28 }
 0x153   : > { %5531 = vmatpush3.bf16.msra.mxu1 %v6250_v21 }
 0x154   : > { %5532 = vmatprep.subr.bf16.mxu1 %v6252_v22 }
 0x157   : > { %5533 = vmatpush3.bf16.msra.mxu1 %v6254_v23  ;;  %v1312_v23 = vld [vmem:[#allocation2 + $0x8] sm:$0x3] }
 0x158   : > { %5534 = vmatprep.subr.bf16.mxu1 %v6256_v41 }
 0x15b   : > { %5535 = vmatpush3.bf16.msra.mxu1 %v6258_v27 }
 0x211   : > { %v6042_v31 = vpop.f32.mrb[16].mxu1 }
 0x212   : > { %v1273_v49 = vadd.f32 %v6042_v31, %v1024_v29  ;;  %v1240_v50 = vpop.f32.mrb[17].mxu1  ;;  %v1019_v29 = vadd.f32 %v6658_v47, %v5264_v24  ;;  %v1352_v31 = vrot.slane %v6890_v44, 1  ;;  %v1026_v47 = vmax.f32 %v1008_v25, 0.0  ;;  %v6260_v24 = vld [vmem:[%s8775_s4 + $0x1a8] sm:$0xff]  }
 0x213   : > { %v1271_v21 = vadd.f32 %v1240_v50, %v1022_v30  ;;  %v6043_v22 = vpop.f32.mrb[18].mxu1  ;;  %v1028_v30 = vmax.f32 %v1016_v20, 0.0  ;;  %v1390_v50 = vrot.slane %v1312_v23, 2  ;;  %5570 = vmatprep.subr.bf16.mxu0 %v6260_v24 }
 0x214   : > { %1305 = vst.msk [vmem:[#allocation2 + $0x31] sm:$0xff] %vm462_vm0, %v1273_v49  ;;  %v1274_v42 = vadd.f32 %v6043_v22, %v1025_v32  ;;  %v1243_v43 = vpop.f32.mrb[19].mxu1  ;;  %v1353_v32 = vrot.slane %v1312_v23, 1  ;;  %v1389_v49 = vrot.slane %v6890_v44, 2  ;;  %v1029_v20 = vmax.f32 %v1019_v29, 0.0 }
 0x215   : > { %1303 = vst.msk [vmem:[#allocation2 + $0x11] sm:$0xff] %vm462_vm0, %v1271_v21  ;;  %v1272_v26 = vadd.f32 %v1243_v43, %v1023_v51  ;;  %v6909_v51 = vld [vmem:[#allocation2 + $0x90] sm:$0xff]  ;;  %v6911_v21 = vld [vmem:[#allocation2 + $0x98] sm:$0x3]  ;;  %v1027_v22 = vmax.f32 %v1011_v46, 0.0  ;;  %v6261_v43 = vld [vmem:[%s8775_s4 + $0x168] sm:$0xff]  }
 0x216   : > { %1306 = vst.msk [vmem:[#allocation2 + $0x41] sm:$0xff] %vm462_vm0, %v1274_v42  ;;  %v6924_v25 = vsel %vm1351_vm6, %v1352_v31, %v1353_v32  ;;  %v6934_v18 = vsel %vm1388_vm7, %v1389_v49, %v1390_v50  ;;  %5571 = vmatpush3.bf16.msra.mxu0 %v6261_v43  ;;  %v1450_v11 = vrot.slane %v6909_v51, 1  ;;  %v8808_v8 = vrot.slane %v6909_v51, 2 }
 0x217   : > { %1304 = vst.msk [vmem:[#allocation2 + $0x21] sm:$0xff] %vm462_vm0, %v1272_v26 }
 0x219   : > { %v6046_v48 = vpop.f32.mrb[20].mxu1 }
 0x21a   : > { %v1277_v41 = vadd.f32 %v6046_v48, %v1028_v30  ;;  %v1256_v42 = vpop.f32.mrb[21].mxu1 }
 0x21b   : > { %v1275_v23 = vadd.f32 %v1256_v42, %v1026_v47  ;;  %v6047_v26 = vpop.f32.mrb[22].mxu1  ;;  %v6919_v45 = vld [vmem:[#allocation2 + $0x30] sm:$0xff]  ;;  %v6921_v27 = vld [vmem:[#allocation2 + $0x38] sm:$0x3] }
 0x21c   : > { %1309 = vst.msk [vmem:[#allocation2 + $0x71] sm:$0xff] %vm462_vm0, %v1277_v41  ;;  %v1278_v46 = vadd.f32 %v6047_v26, %v1029_v20  ;;  %v1259_v30 = vpop.f32.mrb[23].mxu1  ;;  %v6929_v48 = vld [vmem:[#allocation2 + $0x10] sm:$0xff]  ;;  %v1361_v47 = vrot.slane %v6919_v45, 1  ;;  %v1362_v42 = vrot.slane %v6921_v27, 1 }
 0x21d   : > { %v1314_v19 = vld [vmem:[#allocation2 + $0x18] sm:$0x3]  ;;  %1307 = vst.msk [vmem:[#allocation2 + $0x51] sm:$0xff] %vm462_vm0, %v1275_v23  ;;  %v1276_v31 = vadd.f32 %v1259_v30, %v1027_v22  ;;  %v6937_v32 = vld [vmem:[#allocation2 + $0x40] sm:$0xff]  ;;  %v1355_v24 = vrot.slane %v6929_v48, 1  ;;  %v1392_v26 = vrot.slane %v6929_v48, 2 }
 0x21e   : > { %v1356_v20 = vrot.slane %v1314_v19, 1  ;;  %v1320_v41 = vld [vmem:[#allocation2 + $0x48] sm:$0x3]  ;;  %1310 = vst.msk [vmem:[#allocation2 + $0x81] sm:$0xff] %vm462_vm0, %v1278_v46  ;;  %v1426_v28 = vpack.c.bf16 %v6937_v32, %v6919_v45  ;;  %v6944_v29 = vld [vmem:[#allocation2 + $0x20] sm:$0xff]  ;;  %v6947_v50 = vsel %vm1351_vm6, %v1361_v47, %v1362_v42  ;;  %v1364_v22 = vrot.slane %v6937_v32, 1 }
 0x21f   : > { %v1316_v49 = vld [vmem:[#allocation2 + $0x28] sm:$0x3]  ;;  %v1365_v43 = vrot.slane %v1320_v41, 1  ;;  %v6262_v23 = vld [vmem:[%s8775_s4 + $0x1b0] sm:$0xff]   ;;  %1308 = vst.msk [vmem:[#allocation2 + $0x61] sm:$0xff] %vm462_vm0, %v1276_v31  ;;  %v1425_v46 = vpack.c.bf16 %v6944_v29, %v6929_v48  ;;  %v1358_v30 = vrot.slane %v6944_v29, 1 }
 0x220   : > { %v1359_v17 = vrot.slane %v1316_v49, 1  ;;  %v6958_v16 = vsel %vm1351_vm6, %v1355_v24, %v1356_v20  ;;  %v6263_v47 = vld [vmem:[%s8775_s4 + $0x170] sm:$0xff]   ;;  %1478 = vrot.lane.b32.xlu1 %v1426_v28, %s6371_s26  ;;  %v1393_v15 = vrot.slane %v1314_v19, 2  ;;  %v1395_v14 = vrot.slane %v6944_v29, 2  ;;  %5572 = vmatprep.subr.bf16.mxu0 %v6262_v23 }
 0x221   : > { %v1384_v42 = vpack.c.bf16 %v6958_v16, %v6924_v25  ;;  %v6967_v31 = vsel %vm1351_vm6, %v1364_v22, %v1365_v43  ;;  %1476 = vrot.lane.b32.xlu0 %v1425_v46, %s6371_s26  ;;  %v1396_v13 = vrot.slane %v1316_v49, 2  ;;  %v1398_v28 = vrot.slane %v6919_v45, 2  ;;  %5573 = vmatpush3.bf16.msra.mxu0 %v6263_v47  ;;  %v6264_v25 = vld [vmem:[%s8775_s4 + $0x1b8] sm:$0xff]  }
 0x222   : > { %v6972_v24 = vsel %vm1351_vm6, %v1358_v30, %v1359_v17  ;;  %v6985_v17 = vsel %vm1388_vm7, %v1392_v26, %v1393_v15  ;;  %v1399_v43 = vrot.slane %v6921_v27, 2  ;;  %v6265_v49 = vld [vmem:[%s8775_s4 + $0x178] sm:$0xff]   ;;  %v1401_v20 = vrot.slane %v6937_v32, 2  ;;  %5574 = vmatprep.subr.bf16.mxu0 %v6264_v25 }
 0x223   : > { %v1385_v19 = vpack.c.bf16 %v6947_v50, %v6972_v24  ;;  %v6991_v23 = vld [vmem:[#allocation2 + $0x70] sm:$0xff]  ;;  %v1326_v46 = vld [vmem:[#allocation2 + $0x78] sm:$0x3]  ;;  %v6994_v30 = vsel %vm1388_vm7, %v1395_v14, %v1396_v13  ;;  %v1402_v22 = vrot.slane %v1320_v41, 2 }
 0x224   : > { %v7000_v15 = vld [vmem:[#allocation2 + $0x50] sm:$0xff]  ;;  %v1322_v27 = vld [vmem:[#allocation2 + $0x58] sm:$0x3]  ;;  %v1373_v26 = vrot.slane %v6991_v23, 1  ;;  %v1400_v12 = vsel %vm1388_vm7, %v1398_v28, %v1399_v43  ;;  %v1374_v41 = vrot.slane %v1326_v46, 1  ;;  %v1411_v62 = vrot.slane %v1326_v46, 2 }
 0x225   : > { %1466 = vrot.lane.b32.xlu1 %v1385_v19, %s6371_s26  ;;  %1464 = vrot.lane.b32.xlu0 %v1384_v42, %s6371_s26  ;;  %v1367_v13 = vrot.slane %v7000_v15, 1  ;;  %v1368_v14 = vrot.slane %v1322_v27, 1  ;;  %v7007_v47 = vld [vmem:[#allocation2 + $0x80] sm:$0xff]  ;;  %v7010_v25 = vpack.c.bf16 %v1400_v12, %v6994_v30  ;;  %v1403_v9 = vsel %vm1388_vm7, %v1401_v20, %v1402_v22  ;;  %v1328_v43 = vld [vmem:[#allocation2 + $0x88] sm:$0x3] }
 0x226   : > { %5575 = vmatpush3.bf16.msra.mxu0 %v6265_v49  ;;  %v7012_v19 = vld [vmem:[#allocation2 + $0x60] sm:$0xff]  ;;  %v1324_v10 = vld [vmem:[#allocation2 + $0x68] sm:$0x3]  ;;  %v1404_v28 = vrot.slane %v7000_v15, 2  ;;  %v8807_v42 = vrot.slane %v6911_v21, 2  ;;  %v1405_v22 = vrot.slane %v1322_v27, 2  ;;  %v1428_v27 = vpack.c.bf16 %v7007_v47, %v6991_v23 }
 0x227   : > { %v1427_v6 = vpack.c.bf16 %v7012_v19, %v7000_v15  ;;  %v7026_v49 = vsel %vm1351_vm6, %v1367_v13, %v1368_v14  ;;  %v1370_v5 = vrot.slane %v7012_v19, 1  ;;  %v1371_v4 = vrot.slane %v1324_v10, 1  ;;  %v6266_v14 = vld [vmem:[%s8775_s4 + $0x1c0] sm:$0xff]  }
 0x228   : > { %v7021_v7 = vsel %vm1388_vm7, %v8808_v8, %v8807_v42  ;;  %v1386_v20 = vpack.c.bf16 %v7026_v49, %v6967_v31  ;;  %v1407_v3 = vrot.slane %v7012_v19, 2  ;;  %v1408_v2 = vrot.slane %v1324_v10, 2  ;;  %6048 = vmatprep.subr.bf16.mxu1 %v6266_v14 }
 0x229   : > { %1480 = vrot.lane.b32.xlu0 %v1427_v6, %s6371_s26  ;;  %v7034_v8 = vsel %vm1351_vm6, %v1370_v5, %v1371_v4  ;;  %v1431_v42 = vrot.slane %v7007_v47, 1  ;;  %v1432_v1 = vrot.slane %v1328_v43, 1  ;;  %v1410_v13 = vrot.slane %v6991_v23, 2 }
 0x22a   : > { %1468 = vrot.lane.b32.xlu1 %v1386_v20, %s6371_s26  ;;  %v7045_v10 = vsel %vm1351_vm6, %v1373_v26, %v1374_v41  ;;  %v1406_v5 = vsel %vm1388_vm7, %v1404_v28, %v1405_v22  ;;  %v1409_v6 = vsel %vm1388_vm7, %v1407_v3, %v1408_v2  ;;  %v1439_v41 = vrot.slane %v7007_v47, 2 }
 0x22b   : > { %v7051_v0 = vpack.c.bf16 %v1406_v5, %v1403_v9  ;;  %v7054_v63 = vsel %vm1351_vm6, %v1431_v42, %v1432_v1  ;;  %v1387_v20 = vpack.c.bf16 %v7045_v10, %v7034_v8  ;;  %v1440_v4 = vrot.slane %v1328_v43, 2 }
 0x22c   : > { %v1438_v26 = vpack.c.bf16 %v7054_v63, %v7045_v10  ;;  %v1451_v2 = vrot.slane %v6911_v21, 1  ;;  %v1412_v3 = vsel %vm1388_vm7, %v1410_v13, %v1411_v62  ;;  %v1332_v1 = vpack.c.bf16 %v6919_v45, %v6944_v29  ;;  %v6274_v10 = vld [vmem:[%s8775_s4 + $0x230] sm:$0xff]  }
 0x22d   : > { %1482 = vrot.lane.b32.xlu0 %v1428_v27, %s6371_s26  ;;  %v1333_v46 = vpack.c.bf16 %v7000_v15, %v6937_v32  ;;  %v7070_v28 = vsel %vm1388_vm7, %v1439_v41, %v1440_v4  ;;  %v7072_v22 = vpack.c.bf16 %v1412_v3, %v1409_v6  ;;  %v1334_v43 = vpack.c.bf16 %v6991_v23, %v7012_v19  ;;  %v6267_v4 = vld [vmem:[%s8775_s4 + $0x1c8] sm:$0xff]  }
 0x22e   : > { %1470 = vrot.lane.b32.xlu1 %v1387_v20, %s6371_s26  ;;  %v1443_v21 = vpack.c.bf16 %v6994_v30, %v6985_v17  ;;  %v1459_v62 = vpack.c.bf16 %v7021_v7, %v7070_v28  ;;  %v1444_v45 = vpack.c.bf16 %v1403_v9, %v1400_v12  ;;  %v1452_v29 = vsel %vm1351_vm6, %v1450_v11, %v1451_v2  ;;  %v6269_v20 = vld [vmem:[%s8775_s4 + $0x1d8] sm:$0xff]   ;;  %v6278_v7 = vld [vmem:[%s8775_s4 + $0x260] sm:$0xff]  }
 0x22f   : > { %v1445_v32 = vpack.c.bf16 %v1409_v6, %v1406_v5  ;;  %v1454_v15 = vpack.c.bf16 %v1452_v29, %v7054_v63  ;;  %v1446_v23 = vpack.c.bf16 %v7070_v28, %v1412_v3  ;;  %v8809_v9 = vpack.c.bf16 %v6985_v17, %v6934_v18  ;;  %v6272_v63 = vld [vmem:[%s8775_s4 + $0x228] sm:$0xff]   ;;  %v6284_v28 = vld [vmem:[%s8775_s4 + $0x2b0] sm:$0xff]  }
 0x230   : > { %v1331_v42 = vpack.c.bf16 %v6929_v48, %v6890_v44  ;;  %v6268_v44 = vld [vmem:[%s8775_s4 + $0x1d0] sm:$0xff]   ;;  %v8810_v3 = vpack.c.bf16 %v6972_v24, %v6958_v16 }
 0x231   : > { %1488 = vrot.lane.b32.xlu0 %v1443_v21, %s6371_s26 }
 0x232   : > { %1490 = vrot.lane.b32.xlu1 %v1444_v45, %s6371_s26 }
 0x235   : > { %1492 = vrot.lane.b32.xlu0 %v1445_v32, %s6371_s26  ;;  %v8811_v32 = vpack.c.bf16 %v6967_v31, %v6947_v50 }
 0x236   : > { %1497 = vrot.lane.b32.xlu1 %v1454_v15, %s6371_s26 }
 0x239   : > { %1494 = vrot.lane.b32.xlu0 %v1446_v23, %s6371_s26  ;;  %v1447_v23 = vpack.c.bf16 %v6909_v51, %v7007_v47  ;;  %v6270_v47 = vld [vmem:[%s8775_s4 + $0x220] sm:$0xff]  }
 0x23a   : > { %5608 = vmatprep.subr.bf16.mxu0 %v6270_v47 }
 0x292   : > { %v1479_v30 = vpop.permute.xlu1 %1478 }
 0x293   : > { %v1477_v19 = vpop.permute.xlu0 %1476  ;;  %v1521_v18 = vsel %vm462_vm0, %v7010_v25, %v1479_v30  ;;  %v8812_v30 = vpack.c.bf16 %v7034_v8, %v7026_v49  ;;  %v6273_v49 = vld [vmem:[%s8775_s4 + $0x1e8] sm:$0xff]  }
 0x294   : > { %v1517_v11 = vsel %vm462_vm0, %v8809_v9, %v1477_v19  ;;  %v6280_v8 = vld [vmem:[%s8775_s4 + $0x2a8] sm:$0xff]   ;;  %v6286_v19 = vld [vmem:[%s8775_s4 + $0x270] sm:$0xff]   ;;  %v6288_v9 = vld [vmem:[%s8775_s4 + $0x2b8] sm:$0xff]  }
 0x295   : > { %1885 = vmatprep.mubr.bf16.mxu1 %v1517_v11  ;;  %v6279_v11 = vld [vmem:[%s8775_s4 + $0x1f8] sm:$0xff]  }
 0x297   : > { %v1467_v12 = vpop.permute.xlu1 %1466  ;;  %v1465_v13 = vpop.permute.xlu0 %1464 }
 0x298   : > { %v1505_v27 = vsel %vm462_vm0, %v1332_v1, %v1467_v12  ;;  %v1501_v5 = vsel %vm462_vm0, %v1331_v42, %v1465_v13  ;;  %v6281_v12 = vld [vmem:[%s8775_s4 + $0x240] sm:$0xff]   ;;  %v6290_v42 = vld [vmem:[%s8775_s4 + $0x278] sm:$0xff]  }
 0x299   : > { %1950 = vmatprep.mubr.bf16.mxu0 %v1505_v27  ;;  %1886 = vmatmul.mubr.bf16.vlgmr.msra.gmra.mrb[24].mxu1 %v1501_v5  ;;  %v6292_v13 = vld [vmem:[%s8775_s4 + $0x2c0] sm:$0xff]  }
 0x29a   : > { %1893 = vmatprep.mubr.bf16.mxu1 %v1521_v18  ;;  %6049 = vmatpush3.bf16.msra.mxu1 %v6266_v14  ;;  %v6294_v5 = vld [vmem:[%s8775_s4 + $0x280] sm:$0xff]   ;;  %v6287_v18 = vld [vmem:[%s8775_s4 + $0x208] sm:$0xff]  }
 0x29b   : > { %v1481_v17 = vpop.permute.xlu0 %1480  ;;  %6050 = vmatprep.subr.bf16.mxu1 %v6267_v4 }
 0x29c   : > { %v1469_v48 = vpop.permute.xlu1 %1468  ;;  %v1525_v41 = vsel %vm462_vm0, %v7051_v0, %v1481_v17  ;;  %v6289_v17 = vld [vmem:[%s8775_s4 + $0x250] sm:$0xff]  }
 0x29d   : > { %v1509_v21 = vsel %vm462_vm0, %v1333_v46, %v1469_v48  ;;  %v6293_v48 = vld [vmem:[%s8775_s4 + $0x258] sm:$0xff]  }
 0x29e   : > { %6051 = vmatpush3.bf16.msra.mxu1 %v6267_v4  ;;  %v6285_v4 = vld [vmem:[%s8775_s4 + $0x248] sm:$0xff]  }
 0x29f   : > { %v1483_v6 = vpop.permute.xlu0 %1482  ;;  %6052 = vmatprep.subr.bf16.mxu1 %v6268_v44 }
 0x2a0   : > { %v1471_v14 = vpop.permute.xlu1 %1470  ;;  %v1529_v29 = vsel %vm462_vm0, %v7072_v22, %v1483_v6  ;;  %v6295_v6 = vld [vmem:[%s8775_s4 + $0x218] sm:$0xff]  }
 0x2a1   : > { %1894 = vmatmul.mubr.bf16.gmra.mrb[28].mxu1 %v1505_v27  ;;  %v1513_v16 = vsel %vm462_vm0, %v1334_v43, %v1471_v14  ;;  %v6283_v27 = vld [vmem:[%s8775_s4 + $0x200] sm:$0xff]  }
 0x2a2   : > { %1901 = vmatprep.mubr.bf16.mxu1 %v1525_v41  ;;  %6053 = vmatpush3.bf16.msra.mxu1 %v6268_v44  ;;  %v6291_v44 = vld [vmem:[%s8775_s4 + $0x210] sm:$0xff]  }
 0x2a3   : > { %v1489_v2 = vpop.permute.xlu0 %1488  ;;  %6054 = vmatprep.subr.bf16.mxu1 %v6269_v20 }
 0x2a4   : > { %v1533_v1 = vsel %vm462_vm0, %v8810_v3, %v1489_v2  ;;  %v1491_v45 = vpop.permute.xlu1 %1490 }
 0x2a5   : > { %1951 = vmatmul.mubr.bf16.vlgmr.msra.gmra.mrb[36].mxu0 %v1533_v1  ;;  %v1537_v15 = vsel %vm462_vm0, %v8811_v32, %v1491_v45 }
 0x2a6   : > { %1958 = vmatprep.mubr.bf16.mxu0 %v1509_v21  ;;  %6055 = vmatpush3.bf16.msra.mxu1 %v6269_v20 }
 0x2a7   : > { %v1493_v24 = vpop.permute.xlu0 %1492 }
 0x2a8   : > { %v1498_v46 = vpop.permute.xlu1 %1497  ;;  %v1541_v50 = vsel %vm462_vm0, %v8812_v30, %v1493_v24 }
 0x2a9   : > { %1902 = vmatmul.mubr.bf16.gmra.mrb[32].mxu1 %v1509_v21  ;;  %v1549_v31 = vsel %vm462_vm0, %v1447_v23, %v1498_v46 }
 0x2aa   : > { %1909 = vmatprep.mubr.bf16.mxu1 %v1529_v29 }
 0x2ab   : > { %v1495_v43 = vpop.permute.xlu0 %1494 }
 0x2ac   : > { %v1545_v51 = vsel %vm462_vm0, %v1438_v26, %v1495_v43  ;;  %v6282_v26 = vld [vmem:[%s8775_s4 + $0x268] sm:$0xff]  }
 0x2ad   : > { %1959 = vmatmul.mubr.bf16.gmra.mrb[40].mxu0 %v1537_v15  ;;  %v7223_v15 = vld [vmem:[%s8776_s5 + $0x4] ss:$0 sm:$0xff] }
 0x2ae   : > { %1966 = vmatprep.mubr.bf16.mxu0 %v1513_v16 }
 0x2b1   : > { %1910 = vmatmul.mubr.bf16.gmra.mrb[36].mxu1 %v1513_v16 }
 0x2b2   : > { %6056 = vmatprep.mubr.msk.bf16.mxu1 %vm462_vm0, %v7010_v25  ;;  %v6276_v25 = vld [vmem:[%s8775_s4 + $0x2a0] sm:$0xff]  }
 0x2b3   : > { %5648 = vmatprep.subr.bf16.mxu1 %v6276_v25 }
 0x2b5   : > { %1967 = vmatmul.mubr.bf16.gmra.mrb[44].mxu0 %v1541_v50 }
 0x2b6   : > { %1974 = vmatprep.mubr.bf16.mxu0 %v1549_v31 }
 0x2b9   : > { %6057 = vmatmul.mubr.msk.bf16.vlgmr.msra.gmra.mrb[40].mxu1 %vm462_vm0, %v7051_v0  ;;  %v6271_v0 = vld [vmem:[%s8775_s4 + $0x1e0] sm:$0xff]  }
 0x2ba   : > { %6060 = vmatprep.mubr.msk.bf16.mxu1 %vm462_vm0, %v7072_v22  ;;  %5609 = vmatpush3.bf16.msra.mxu0 %v6271_v0  ;;  %v6275_v22 = vld [vmem:[%s8775_s4 + $0x1f0] sm:$0xff]  }
 0x2bb   : > { %5610 = vmatprep.subr.bf16.mxu0 %v6272_v63  ;;  %5649 = vmatpush3.bf16.msra.mxu1 %v6278_v7 }
 0x2bc   : > { %5650 = vmatprep.subr.bf16.mxu1 %v6280_v8 }
 0x2bd   : > { %1975 = vmatmul.mubr.bf16.gmra.mrb[48].mxu0 %v1545_v51 }
 0x2be   : > { %5611 = vmatpush3.bf16.msra.mxu0 %v6273_v49 }
 0x2bf   : > { %5612 = vmatprep.subr.bf16.mxu0 %v6274_v10  ;;  %5651 = vmatpush3.bf16.msra.mxu1 %v6282_v26 }
 0x2c0   : > { %5652 = vmatprep.subr.bf16.mxu1 %v6284_v28 }
 0x2c1   : > { %6061 = vmatmul.mubr.msk.bf16.gmra.mrb[44].mxu1 %vm462_vm0, %v1459_v62  ;;  %v6277_v62 = vld [vmem:[%s8775_s4 + $0x238] sm:$0xff]  }
 0x2c2   : > { %5613 = vmatpush3.bf16.msra.mxu0 %v6275_v22 }
 0x2c3   : > { %5614 = vmatprep.subr.bf16.mxu0 %v6277_v62  ;;  %5653 = vmatpush3.bf16.msra.mxu1 %v6286_v19 }
 0x2c4   : > { %5654 = vmatprep.subr.bf16.mxu1 %v6288_v9 }
 0x2c6   : > { %5615 = vmatpush3.bf16.msra.mxu0 %v6279_v11 }
 0x2c7   : > { %5616 = vmatprep.subr.bf16.mxu0 %v6281_v12  ;;  %5655 = vmatpush3.bf16.msra.mxu1 %v6290_v42 }
 0x2c8   : > { %5656 = vmatprep.subr.bf16.mxu1 %v6292_v13 }
 0x2ca   : > { %5617 = vmatpush3.bf16.msra.mxu0 %v6283_v27 }
 0x2cb   : > { %5618 = vmatprep.subr.bf16.mxu0 %v6285_v4  ;;  %5657 = vmatpush3.bf16.msra.mxu1 %v6294_v5 }
 0x2ce   : > { %5619 = vmatpush3.bf16.msra.mxu0 %v6287_v18 }
 0x2cf   : > { %5620 = vmatprep.subr.bf16.mxu0 %v6289_v17 }
 0x2d2   : > { %5621 = vmatpush3.bf16.msra.mxu0 %v6291_v44 }
 0x2d3   : > { %5622 = vmatprep.subr.bf16.mxu0 %v6293_v48  ;;  %v5250_v48 = vld [vmem:[%s8776_s5 + $0x1] ss:$0 sm:$0xff] }
 0x2d6   : > { %5623 = vmatpush3.bf16.msra.mxu0 %v6295_v6 }
 0x36c   : > { %v5536_v20 = vpop.f32.mrb[24].mxu1 }
 0x36d   : > { %v5537_v41 = vpop.f32.mrb[25].mxu1 }
 0x36e   : > { %v5538_v14 = vadd.f32 %v5537_v41, %v5536_v20  ;;  %v5539_v2 = vpop.f32.mrb[26].mxu1 }
 0x36f   : > { %v5540_v3 = vpop.f32.mrb[27].mxu1 }
 0x370   : > { %v5541_v1 = vadd.f32 %v5540_v3, %v5539_v2  ;;  %v1888_v30 = vadd.f32 %v5538_v14, %v7223_v15 }
 0x372   : > { %v1891_v51 = vadd.f32 %v5541_v1, %v7223_v15  ;;  %v833_v1 = vadd.f32 %v6630_v33, %v5250_v48 }
 0x374   : > { %v5542_v21 = vpop.f32.mrb[28].mxu1 }
 0x375   : > { %v5543_v45 = vpop.f32.mrb[29].mxu1 }
 0x376   : > { %v5544_v29 = vadd.f32 %v5543_v45, %v5542_v21  ;;  %v5545_v32 = vpop.f32.mrb[30].mxu1  ;;  %v825_v21 = vadd.f32 %v5250_v48, %v6632_v34 }
 0x377   : > { %v5546_v16 = vpop.f32.mrb[31].mxu1 }
 0x378   : > { %v5547_v24 = vadd.f32 %v5546_v16, %v5545_v32  ;;  %v5576_v46 = vpop.f32.mrb[36].mxu0  ;;  %v1896_v62 = vadd.f32 %v5544_v29, %v7223_v15  ;;  %v836_v29 = vadd.f32 %v6634_v35, %v5250_v48  ;;  %v855_v34 = vmax.f32 %v825_v21, 0.0  ;;  %v7256_v21 = vld [vmem:[#allocation3 + $0x90] sm:$0xff] }
 0x379   : > { %v5577_v23 = vpop.f32.mrb[37].mxu0 }
 0x37a   : > { %v5578_v50 = vadd.f32 %v5577_v23, %v5576_v46  ;;  %v5579_v31 = vpop.f32.mrb[38].mxu0  ;;  %v1899_v12 = vadd.f32 %v5547_v24, %v7223_v15  ;;  %v828_v23 = vadd.f32 %v5250_v48, %v6636_v36 }
 0x37b   : > { %v5580_v43 = vpop.f32.mrb[39].mxu0 }
 0x37c   : > { %v5581_v47 = vadd.f32 %v5580_v43, %v5579_v31  ;;  %v5548_v0 = vpop.f32.mrb[32].mxu1  ;;  %v1953_v63 = vadd.f32 %v5578_v50, %v1888_v30 }
 0x37d   : > { %v5549_v25 = vpop.f32.mrb[33].mxu1 }
 0x37e   : > { %v5550_v7 = vadd.f32 %v5549_v25, %v5548_v0  ;;  %v5551_v49 = vpop.f32.mrb[34].mxu1  ;;  %v1956_v8 = vadd.f32 %v5581_v47, %v1891_v51  ;;  %v857_v47 = vmax.f32 %v833_v1, 0.0 }
 0x37f   : > { %v5552_v10 = vpop.f32.mrb[35].mxu1 }
 0x380   : > { %v5553_v26 = vadd.f32 %v5552_v10, %v5551_v49  ;;  %v5582_v28 = vpop.f32.mrb[40].mxu0  ;;  %v1904_v14 = vadd.f32 %v5550_v7, %v7223_v15  ;;  %v858_v7 = vmax.f32 %v836_v29, 0.0 }
 0x381   : > { %v5583_v22 = vpop.f32.mrb[41].mxu0 }
 0x382   : > { %v5584_v19 = vadd.f32 %v5583_v22, %v5582_v28  ;;  %v5585_v9 = vpop.f32.mrb[42].mxu0  ;;  %v1907_v32 = vadd.f32 %v5553_v26, %v7223_v15  ;;  %v856_v26 = vmax.f32 %v828_v23, 0.0  ;;  %v849_v28 = vadd.f32 %v6638_v37, %v5250_v48 }
 0x383   : > { %v5586_v11 = vpop.f32.mrb[43].mxu0 }
 0x384   : > { %v5587_v42 = vadd.f32 %v5586_v11, %v5585_v9  ;;  %v5554_v13 = vpop.f32.mrb[36].mxu1  ;;  %v1961_v27 = vadd.f32 %v5584_v19, %v1896_v62 }
 0x385   : > { %v5555_v4 = vpop.f32.mrb[37].mxu1 }
 0x386   : > { %v5556_v5 = vadd.f32 %v5555_v4, %v5554_v13  ;;  %v5557_v18 = vpop.f32.mrb[38].mxu1  ;;  %v1964_v17 = vadd.f32 %v5587_v42, %v1899_v12  ;;  %v841_v42 = vadd.f32 %v5250_v48, %v6640_v38  ;;  %v852_v13 = vadd.f32 %v6642_v39, %v5250_v48  ;;  %v6296_v38 = vld [vmem:[%s8775_s4 + $0x2c8] sm:$0xff]  }
 0x387   : > { %v5558_v44 = vpop.f32.mrb[39].mxu1  ;;  %v844_v39 = vadd.f32 %v5250_v48, %v6644_v40  ;;  %5658 = vmatprep.subr.bf16.mxu1 %v6296_v38 }
 0x388   : > { %v5559_v6 = vadd.f32 %v5558_v44, %v5557_v18  ;;  %v5588_v20 = vpop.f32.mrb[44].mxu0  ;;  %v1912_v19 = vadd.f32 %v5556_v5, %v7223_v15  ;;  %v7245_v44 = vld [vmem:[#allocation3] sm:$0xff]  ;;  %v862_v29 = vmax.f32 %v852_v13, 0.0 }
 0x389   : > { %v5589_v41 = vpop.f32.mrb[45].mxu0  ;;  %v2134_v48 = vrot.slane %v7245_v44, 1 }
 0x38a   : > { %v5590_v2 = vadd.f32 %v5589_v41, %v5588_v20  ;;  %v5591_v3 = vpop.f32.mrb[46].mxu0  ;;  %v1915_v4 = vadd.f32 %v5559_v6, %v7223_v15  ;;  %v2095_v20 = vld [vmem:[#allocation3 + $0x8] sm:$0x3]  ;;  %v861_v6 = vmax.f32 %v849_v28, 0.0 }
 0x38b   : > { %v5592_v45 = vpop.f32.mrb[47].mxu0  ;;  %v6297_v15 = vld [vmem:[%s8775_s4 + $0x288] sm:$0xff]  }
 0x38c   : > { %v5593_v16 = vadd.f32 %v5592_v45, %v5591_v3  ;;  %v6058_v24 = vpop.f32.mrb[40].mxu1  ;;  %v1969_v46 = vadd.f32 %v5590_v2, %v1904_v14  ;;  %v859_v45 = vmax.f32 %v841_v42, 0.0  ;;  %5659 = vmatpush3.bf16.msra.mxu1 %v6297_v15  ;;  %v6300_v42 = vld [vmem:[%s8775_s4 + $0x2d8] sm:$0xff]  }
 0x38d   : > { %v2026_v30 = vadd.f32 %v6058_v24, %v1961_v27  ;;  %v2017_v50 = vpop.f32.mrb[41].mxu1 }
 0x38e   : > { %v2018_v31 = vadd.f32 %v2017_v50, %v1953_v63  ;;  %v6059_v43 = vpop.f32.mrb[42].mxu1  ;;  %v1972_v51 = vadd.f32 %v5593_v16, %v1907_v32  ;;  %v2135_v32 = vrot.slane %v2095_v20, 1  ;;  %v6299_v50 = vld [vmem:[%s8775_s4 + $0x290] sm:$0xff]  }
 0x38f   : > { %v2050_v0 = vmax.f32 %v2026_v30, 0.0  ;;  %v2029_v33 = vadd.f32 %v6059_v43, %v1964_v17  ;;  %v2020_v25 = vpop.f32.mrb[43].mxu1  ;;  %v2170_v43 = vrot.slane %v7245_v44, 2 }
 0x390   : > { %v2048_v49 = vmax.f32 %v2018_v31, 0.0  ;;  %v2021_v35 = vadd.f32 %v2020_v25, %v1956_v8  ;;  %v5594_v10 = vpop.f32.mrb[48].mxu0  ;;  %v860_v31 = vmax.f32 %v844_v39, 0.0 }
 0x391   : > { %v2058_v22 = vadd.f32 %v2050_v0, %v857_v47  ;;  %v2051_v62 = vmax.f32 %v2029_v33, 0.0  ;;  %v5595_v36 = vpop.f32.mrb[49].mxu0  ;;  %v2171_v47 = vrot.slane %v2095_v20, 2  ;;  %v2231_v0 = vrot.slane %v7256_v21, 1 }
 0x392   : > { %v2056_v63 = vadd.f32 %v2048_v49, %v855_v34  ;;  %v2049_v9 = vmax.f32 %v2021_v35, 0.0  ;;  %v5596_v11 = vadd.f32 %v5595_v36, %v5594_v10  ;;  %v5597_v12 = vpop.f32.mrb[50].mxu0 }
 0x393   : > { %2088 = vst.msk [vmem:[#allocation3 + $0x31] sm:$0xff] %vm462_vm0, %v2058_v22  ;;  %v2059_v8 = vadd.f32 %v2051_v62, %v858_v7  ;;  %v5598_v27 = vpop.f32.mrb[51].mxu0 }
 0x394   : > { %2086 = vst.msk [vmem:[#allocation3 + $0x11] sm:$0xff] %vm462_vm0, %v2056_v63  ;;  %v2057_v37 = vadd.f32 %v2049_v9, %v856_v26  ;;  %v5599_v18 = vadd.f32 %v5598_v27, %v5597_v12  ;;  %v1977_v17 = vadd.f32 %v5596_v11, %v1912_v19  ;;  %v6062_v5 = vpop.f32.mrb[44].mxu1  ;;  %v2136_v26 = vsel %vm1351_vm6, %v2134_v48, %v2135_v32 }
 0x395   : > { %2089 = vst.msk [vmem:[#allocation3 + $0x41] sm:$0xff] %vm462_vm0, %v2059_v8  ;;  %v2033_v41 = vpop.f32.mrb[45].mxu1 }
 0x396   : > { %2087 = vst.msk [vmem:[#allocation3 + $0x21] sm:$0xff] %vm462_vm0, %v2057_v37  ;;  %v2042_v14 = vadd.f32 %v6062_v5, %v1977_v17  ;;  %v2034_v2 = vadd.f32 %v2033_v41, %v1969_v46  ;;  %v1980_v3 = vadd.f32 %v5599_v18, %v1915_v4  ;;  %v6063_v1 = vpop.f32.mrb[46].mxu1  ;;  %v6298_v46 = vld [vmem:[%s8775_s4 + $0x2d0] sm:$0xff]   ;;  %v7292_v18 = vsel %vm1388_vm7, %v2170_v43, %v2171_v47  ;;  %v6301_v17 = vld [vmem:[%s8775_s4 + $0x298] sm:$0xff]  }
 0x397   : > { %v2036_v40 = vpop.f32.mrb[47].mxu1  ;;  %5660 = vmatprep.subr.bf16.mxu1 %v6298_v46 }
 0x398   : > { %v2054_v16 = vmax.f32 %v2042_v14, 0.0  ;;  %v2052_v24 = vmax.f32 %v2034_v2, 0.0  ;;  %v2045_v23 = vadd.f32 %v6063_v1, %v1980_v3  ;;  %v2037_v30 = vadd.f32 %v2036_v40, %v1972_v51  ;;  %5661 = vmatpush3.bf16.msra.mxu1 %v6299_v50 }
 0x399   : > { %5662 = vmatprep.subr.bf16.mxu1 %v6300_v42 }
 0x39a   : > { %v2062_v33 = vadd.f32 %v2054_v16, %v861_v6  ;;  %v2060_v25 = vadd.f32 %v2052_v24, %v859_v45  ;;  %v2055_v34 = vmax.f32 %v2045_v23, 0.0  ;;  %v2053_v7 = vmax.f32 %v2037_v30, 0.0  ;;  %v7267_v49 = vld [vmem:[#allocation3 + $0x30] sm:$0xff]  ;;  %v7269_v51 = vld [vmem:[#allocation3 + $0x38] sm:$0x3] }
 0x39b   : > { %v7271_v35 = vld [vmem:[#allocation3 + $0x10] sm:$0xff]  ;;  %v2097_v10 = vld [vmem:[#allocation3 + $0x18] sm:$0x3]  ;;  %v2143_v28 = vrot.slane %v7267_v49, 1  ;;  %v2144_v22 = vrot.slane %v7269_v51, 1  ;;  %v2179_v62 = vrot.slane %v7267_v49, 2 }
 0x39c   : > { %2092 = vst.msk [vmem:[#allocation3 + $0x71] sm:$0xff] %vm462_vm0, %v2062_v33  ;;  %2090 = vst.msk [vmem:[#allocation3 + $0x51] sm:$0xff] %vm462_vm0, %v2060_v25  ;;  %v2063_v36 = vadd.f32 %v2055_v34, %v862_v29  ;;  %v2061_v19 = vadd.f32 %v2053_v7, %v860_v31  ;;  %v2137_v63 = vrot.slane %v7271_v35, 1  ;;  %v2138_v9 = vrot.slane %v2097_v10, 1  ;;  %v7280_v11 = vld [vmem:[#allocation3 + $0x40] sm:$0xff]  ;;  %5663 = vmatpush3.bf16.msra.mxu1 %v6301_v17 }
 0x39d   : > { %v2103_v12 = vld [vmem:[#allocation3 + $0x48] sm:$0x3]  ;;  %v7285_v13 = vld [vmem:[#allocation3 + $0x20] sm:$0xff]  ;;  %v7288_v27 = vsel %vm1351_vm6, %v2143_v28, %v2144_v22  ;;  %v2146_v4 = vrot.slane %v7280_v11, 1  ;;  %v2173_v6 = vrot.slane %v7271_v35, 2  ;;  %v2174_v14 = vrot.slane %v2097_v10, 2 }
 0x39e   : > { %v2099_v8 = vld [vmem:[#allocation3 + $0x28] sm:$0x3]  ;;  %v2147_v37 = vrot.slane %v2103_v12, 1  ;;  %2093 = vst.msk [vmem:[#allocation3 + $0x81] sm:$0xff] %vm462_vm0, %v2063_v36  ;;  %2091 = vst.msk [vmem:[#allocation3 + $0x61] sm:$0xff] %vm462_vm0, %v2061_v19  ;;  %v2206_v5 = vpack.c.bf16 %v7285_v13, %v7271_v35  ;;  %v7302_v20 = vsel %vm1351_vm6, %v2137_v63, %v2138_v9  ;;  %v2140_v38 = vrot.slane %v7285_v13, 1 }
 0x39f   : > { %v2141_v39 = vrot.slane %v2099_v8, 1  ;;  %v2166_v41 = vpack.c.bf16 %v7302_v20, %v2136_v26  ;;  %v2176_v1 = vrot.slane %v7285_v13, 2  ;;  %v2177_v45 = vrot.slane %v2099_v8, 2  ;;  %v7317_v29 = vld [vmem:[#allocation3 + $0x98] sm:$0x3] }
 0x3a0   : > { %v7307_v15 = vsel %vm1351_vm6, %v2146_v4, %v2147_v37  ;;  %2257 = vrot.lane.b32.xlu1 %v2206_v5, %s6371_s26  ;;  %v2207_v40 = vpack.c.bf16 %v7280_v11, %v7267_v49  ;;  %v7325_v32 = vsel %vm1388_vm7, %v2173_v6, %v2174_v14  ;;  %v2180_v16 = vrot.slane %v7269_v51, 2  ;;  %v6302_v5 = vld [vmem:[%s8775_s4 + $0x2e0] sm:$0xff]  }
 0x3a1   : > { %v7312_v2 = vsel %vm1351_vm6, %v2140_v38, %v2141_v39  ;;  %v2217_v3 = vpack.c.bf16 %v7307_v15, %v7288_v27  ;;  %2245 = vrot.lane.b32.xlu0 %v2166_v41, %s6371_s26  ;;  %v2178_v24 = vsel %vm1388_vm7, %v2176_v1, %v2177_v45  ;;  %v2202_v23 = vpack.c.bf16 %v7325_v32, %v7292_v18 }
 0x3a2   : > { %v2216_v48 = vpack.c.bf16 %v7312_v2, %v7302_v20  ;;  %v2182_v30 = vrot.slane %v7280_v11, 2  ;;  %v2183_v46 = vrot.slane %v2103_v12, 2  ;;  %v2167_v50 = vpack.c.bf16 %v7288_v27, %v7312_v2  ;;  %6064 = vmatprep.subr.bf16.mxu0 %v6302_v5 }
 0x3a3   : > { %v7334_v31 = vld [vmem:[#allocation3 + $0x50] sm:$0xff]  ;;  %v2105_v43 = vld [vmem:[#allocation3 + $0x58] sm:$0x3]  ;;  %v2232_v33 = vrot.slane %v7317_v29, 1  ;;  %v2236_v25 = vrot.slane %v7256_v21, 2  ;;  %v2115_v34 = vpack.c.bf16 %v7267_v49, %v7285_v13  ;;  %v2181_v26 = vsel %vm1388_vm7, %v2179_v62, %v2180_v16 }
 0x3a4   : > { %v7336_v47 = vld [vmem:[#allocation3 + $0x70] sm:$0xff]  ;;  %2259 = vrot.lane.b32.xlu1 %v2207_v40, %s6371_s26  ;;  %v2149_v7 = vrot.slane %v7334_v31, 1  ;;  %v2150_v51 = vrot.slane %v2105_v43, 1  ;;  %v2109_v10 = vld [vmem:[#allocation3 + $0x78] sm:$0x3]  ;;  %v2237_v28 = vrot.slane %v7317_v29, 2  ;;  %v2224_v36 = vpack.c.bf16 %v2178_v24, %v7325_v32 }
 0x3a5   : > { %2247 = vrot.lane.b32.xlu0 %v2167_v50, %s6371_s26  ;;  %v7347_v22 = vld [vmem:[#allocation3 + $0x60] sm:$0xff]  ;;  %v2107_v63 = vld [vmem:[#allocation3 + $0x68] sm:$0x3]  ;;  %v2155_v9 = vrot.slane %v7336_v47, 1  ;;  %v7353_v12 = vpack.c.bf16 %v2181_v26, %v2178_v24  ;;  %v2185_v42 = vrot.slane %v7334_v31, 2  ;;  %v2184_v37 = vsel %vm1388_vm7, %v2182_v30, %v2183_v46 }
 0x3a6   : > { %v7350_v19 = vld [vmem:[#allocation3 + $0x80] sm:$0xff]  ;;  %v2208_v62 = vpack.c.bf16 %v7347_v22, %v7334_v31  ;;  %v7359_v8 = vsel %vm1351_vm6, %v2149_v7, %v2150_v51  ;;  %v2152_v4 = vrot.slane %v7347_v22, 1  ;;  %v2111_v17 = vld [vmem:[#allocation3 + $0x88] sm:$0x3]  ;;  %v2153_v39 = vrot.slane %v2107_v63, 1 }
 0x3a7   : > { %v2168_v38 = vpack.c.bf16 %v7359_v8, %v7307_v15  ;;  %v2156_v41 = vrot.slane %v2109_v10, 1  ;;  %v2186_v6 = vrot.slane %v2105_v43, 2  ;;  %v2188_v14 = vrot.slane %v7347_v22, 2 }
 0x3a8   : > { %2261 = vrot.lane.b32.xlu1 %v2208_v62, %s6371_s26  ;;  %v2189_v1 = vrot.slane %v2107_v63, 2  ;;  %v2212_v45 = vrot.slane %v7350_v19, 1  ;;  %v2213_v29 = vrot.slane %v2111_v17, 1  ;;  %v7373_v40 = vsel %vm1351_vm6, %v2152_v4, %v2153_v39 }
 0x3a9   : > { %2249 = vrot.lane.b32.xlu0 %v2168_v38, %s6371_s26  ;;  %v2187_v16 = vsel %vm1388_vm7, %v2185_v42, %v2186_v6  ;;  %v2191_v24 = vrot.slane %v7336_v47, 2  ;;  %v2192_v30 = vrot.slane %v2109_v10, 2  ;;  %v2209_v46 = vpack.c.bf16 %v7350_v19, %v7336_v47 }
 0x3aa   : > { %v2218_v50 = vpack.c.bf16 %v7373_v40, %v7359_v8  ;;  %v2190_v43 = vsel %vm1388_vm7, %v2188_v14, %v2189_v1  ;;  %v7382_v7 = vpack.c.bf16 %v2187_v16, %v2184_v37  ;;  %v7385_v51 = vsel %vm1351_vm6, %v2155_v9, %v2156_v41 }
 0x3ab   : > { %v7388_v63 = vsel %vm1351_vm6, %v2212_v45, %v2213_v29  ;;  %v2193_v42 = vsel %vm1388_vm7, %v2191_v24, %v2192_v30  ;;  %v2220_v10 = vrot.slane %v7350_v19, 2  ;;  %v2221_v38 = vrot.slane %v2111_v17, 2 }
 0x3ac   : > { %2269 = vrot.lane.b32.xlu1 %v2224_v36, %s6371_s26  ;;  %v2219_v62 = vpack.c.bf16 %v7388_v63, %v7385_v51  ;;  %v7395_v4 = vpack.c.bf16 %v2193_v42, %v2190_v43  ;;  %v7398_v39 = vsel %vm1388_vm7, %v2236_v25, %v2237_v28  ;;  %v2116_v9 = vpack.c.bf16 %v7334_v31, %v7280_v11 }
 0x3ad   : > { %2263 = vrot.lane.b32.xlu0 %v2209_v46, %s6371_s26  ;;  %v2117_v41 = vpack.c.bf16 %v7336_v47, %v7347_v22  ;;  %v2169_v36 = vpack.c.bf16 %v7385_v51, %v7373_v40  ;;  %v7408_v6 = vsel %vm1388_vm7, %v2220_v10, %v2221_v38  ;;  %v2225_v14 = vpack.c.bf16 %v2184_v37, %v2181_v26 }
 0x3ae   : > { %v2240_v17 = vpack.c.bf16 %v7398_v39, %v7408_v6  ;;  %v2233_v25 = vsel %vm1351_vm6, %v2231_v0, %v2232_v33  ;;  %v2226_v11 = vpack.c.bf16 %v2190_v43, %v2187_v16  ;;  %v2227_v47 = vpack.c.bf16 %v7408_v6, %v2193_v42  ;;  %v6303_v33 = vld [vmem:[%s8775_s4 + $0x2e8] sm:$0xff]  }
 0x3af   : > { %v2235_v31 = vpack.c.bf16 %v2233_v25, %v7388_v63  ;;  %v2114_v28 = vpack.c.bf16 %v7271_v35, %v7245_v44  ;;  %v6304_v35 = vld [vmem:[%s8775_s4 + $0x2f0] sm:$0xff]   ;;  %v2228_v42 = vpack.c.bf16 %v7256_v21, %v7350_v19  ;;  %v6306_v19 = vld [vmem:[%s8775_s4 + $0x440] sm:$0xff]  }
 0x3b0   : > { %2251 = vrot.lane.b32.xlu1 %v2169_v36, %s6371_s26 }
 0x3b1   : > { %2271 = vrot.lane.b32.xlu0 %v2225_v14, %s6371_s26 }
 0x3b4   : > { %2273 = vrot.lane.b32.xlu1 %v2226_v11, %s6371_s26 }
 0x3b5   : > { %2278 = vrot.lane.b32.xlu0 %v2235_v31, %s6371_s26 }
 0x3b8   : > { %2275 = vrot.lane.b32.xlu1 %v2227_v47, %s6371_s26 }
 0x412   : > { %v2258_v26 = vpop.permute.xlu1 %2257 }
 0x413   : > { %v2246_v22 = vpop.permute.xlu0 %2245  ;;  %v2298_v0 = vsel %vm462_vm0, %v2202_v23, %v2258_v26 }
 0x414   : > { %v2282_v37 = vsel %vm462_vm0, %v2114_v28, %v2246_v22  ;;  %2666 = vmatprep.mubr.bf16.mxu0 %v2298_v0 }
 0x415   : > { %2667 = vmatmul.mubr.bf16.vlgmr.msra.gmra.mrb[52].mxu0 %v2282_v37 }
 0x416   : > { %v2260_v1 = vpop.permute.xlu1 %2259  ;;  %6065 = vmatpush3.bf16.msra.mxu0 %v6302_v5  ;;  %v6305_v5 = vld [vmem:[%s8775_s4 + $0x2f8] sm:$0xff]  }
 0x417   : > { %v2248_v45 = vpop.permute.xlu0 %2247  ;;  %v2302_v44 = vsel %vm462_vm0, %v7353_v12, %v2260_v1  ;;  %6066 = vmatprep.subr.bf16.mxu0 %v6303_v33 }
 0x418   : > { %2674 = vmatprep.mubr.bf16.mxu0 %v2302_v44  ;;  %v2286_v18 = vsel %vm462_vm0, %v2115_v34, %v2248_v45 }
 0x419   : > { %2731 = vmatprep.mubr.bf16.mxu1 %v2286_v18 }
 0x41a   : > { %v2262_v32 = vpop.permute.xlu1 %2261  ;;  %6067 = vmatpush3.bf16.msra.mxu0 %v6303_v33 }
 0x41b   : > { %v2250_v23 = vpop.permute.xlu0 %2249  ;;  %6068 = vmatprep.subr.bf16.mxu0 %v6304_v35  ;;  %v2306_v29 = vsel %vm462_vm0, %v7382_v7, %v2262_v32 }
 0x41c   : > { %v2290_v34 = vsel %vm462_vm0, %v2116_v9, %v2250_v23 }
 0x41d   : > { %2675 = vmatmul.mubr.bf16.gmra.mrb[56].mxu0 %v2286_v18 }
 0x41e   : > { %v2270_v16 = vpop.permute.xlu1 %2269  ;;  %2682 = vmatprep.mubr.bf16.mxu0 %v2306_v29  ;;  %6069 = vmatpush3.bf16.msra.mxu0 %v6304_v35 }
 0x41f   : > { %v2314_v49 = vsel %vm462_vm0, %v2216_v48, %v2270_v16  ;;  %v2264_v13 = vpop.permute.xlu0 %2263  ;;  %6070 = vmatprep.subr.bf16.mxu0 %v6305_v5 }
 0x420   : > { %2732 = vmatmul.mubr.bf16.vlgmr.msra.gmra.mrb[48].mxu1 %v2314_v49  ;;  %v2310_v46 = vsel %vm462_vm0, %v7395_v4, %v2264_v13 }
 0x421   : > { %2739 = vmatprep.mubr.bf16.mxu1 %v2290_v34 }
 0x422   : > { %6071 = vmatpush3.bf16.msra.mxu0 %v6305_v5  ;;  %v2252_v30 = vpop.permute.xlu1 %2251 }
 0x423   : > { %v2272_v24 = vpop.permute.xlu0 %2271  ;;  %v2294_v2 = vsel %vm462_vm0, %v2117_v41, %v2252_v30 }
 0x424   : > { %v2318_v20 = vsel %vm462_vm0, %v2217_v3, %v2272_v24 }
 0x425   : > { %2683 = vmatmul.mubr.bf16.gmra.mrb[60].mxu0 %v2290_v34 }
 0x426   : > { %2690 = vmatprep.mubr.bf16.mxu0 %v2310_v46  ;;  %v2274_v48 = vpop.permute.xlu1 %2273 }
 0x427   : > { %v2279_v43 = vpop.permute.xlu0 %2278  ;;  %v2322_v27 = vsel %vm462_vm0, %v2218_v50, %v2274_v48 }
 0x428   : > { %2740 = vmatmul.mubr.bf16.gmra.mrb[52].mxu1 %v2318_v20  ;;  %v2330_v15 = vsel %vm462_vm0, %v2228_v42, %v2279_v43 }
 0x429   : > { %2747 = vmatprep.mubr.bf16.mxu1 %v2294_v2 }
 0x42a   : > { %v2276_v3 = vpop.permute.xlu1 %2275 }
 0x42b   : > { %v2326_v21 = vsel %vm462_vm0, %v2219_v62, %v2276_v3  ;;  %v7486_v62 = vld [vmem:[%s8776_s5 + $0x5] ss:$0 sm:$0xff] }
 0x42d   : > { %2691 = vmatmul.mubr.bf16.gmra.mrb[64].mxu0 %v2294_v2 }
 0x42e   : > { %6072 = vmatprep.mubr.msk.bf16.mxu0 %vm462_vm0, %v7353_v12 }
 0x430   : > { %2748 = vmatmul.mubr.bf16.gmra.mrb[56].mxu1 %v2322_v27 }
 0x431   : > { %2755 = vmatprep.mubr.bf16.mxu1 %v2330_v15 }
 0x435   : > { %6073 = vmatmul.mubr.msk.bf16.vlgmr.msra.gmra.mrb[68].mxu0 %vm462_vm0, %v7382_v7 }
 0x436   : > { %6076 = vmatprep.mubr.msk.bf16.mxu0 %vm462_vm0, %v7395_v4 }
 0x438   : > { %2756 = vmatmul.mubr.bf16.gmra.mrb[60].mxu1 %v2326_v21 }
 0x439   : > { %6088 = vmatprep.mubr.msk.bf16.mxu1 %vm462_vm0, %v6306_v19 }
 0x43d   : > { %6077 = vmatmul.mubr.msk.bf16.gmra.mrb[72].mxu0 %vm462_vm0, %v2240_v17 }
 0x4e8   : > { %v5624_v12 = vpop.f32.mrb[52].mxu0 }
 0x4e9   : > { %v5625_v8 = vpop.f32.mrb[53].mxu0 }
 0x4ea   : > { %v5626_v40 = vadd.f32 %v5625_v8, %v5624_v12  ;;  %v5627_v50 = vpop.f32.mrb[54].mxu0 }
 0x4eb   : > { %v5628_v7 = vpop.f32.mrb[55].mxu0 }
 0x4ec   : > { %v5629_v51 = vadd.f32 %v5628_v7, %v5627_v50  ;;  %v2669_v6 = vadd.f32 %v5626_v40, %v7486_v62 }
 0x4ee   : > { %v2672_v11 = vadd.f32 %v5629_v51, %v7486_v62 }
 0x4f0   : > { %v5630_v63 = vpop.f32.mrb[56].mxu0 }
 0x4f1   : > { %v5631_v10 = vpop.f32.mrb[57].mxu0 }
 0x4f2   : > { %v5632_v4 = vadd.f32 %v5631_v10, %v5630_v63  ;;  %v5633_v38 = vpop.f32.mrb[58].mxu0 }
 0x4f3   : > { %v5634_v39 = vpop.f32.mrb[59].mxu0  ;;  %v5664_v9 = vpop.f32.mrb[48].mxu1 }
 0x4f4   : > { %v5635_v41 = vadd.f32 %v5634_v39, %v5633_v38  ;;  %v5665_v36 = vpop.f32.mrb[49].mxu1  ;;  %v2677_v35 = vadd.f32 %v5632_v4, %v7486_v62 }
 0x4f5   : > { %v5666_v14 = vadd.f32 %v5665_v36, %v5664_v9  ;;  %v5667_v17 = vpop.f32.mrb[50].mxu1 }
 0x4f6   : > { %v5668_v25 = vpop.f32.mrb[51].mxu1  ;;  %v2680_v5 = vadd.f32 %v5635_v41, %v7486_v62 }
 0x4f7   : > { %v5669_v31 = vadd.f32 %v5668_v25, %v5667_v17  ;;  %v2734_v47 = vadd.f32 %v5666_v14, %v2669_v6 }
 0x4f8   : > { %v5636_v26 = vpop.f32.mrb[60].mxu0 }
 0x4f9   : > { %v5637_v28 = vpop.f32.mrb[61].mxu0  ;;  %v2737_v22 = vadd.f32 %v5669_v31, %v2672_v11 }
 0x4fa   : > { %v5638_v0 = vadd.f32 %v5637_v28, %v5636_v26  ;;  %v5639_v33 = vpop.f32.mrb[62].mxu0 }
 0x4fb   : > { %v5640_v37 = vpop.f32.mrb[63].mxu0  ;;  %v5670_v1 = vpop.f32.mrb[52].mxu1 }
 0x4fc   : > { %v5641_v45 = vadd.f32 %v5640_v37, %v5639_v33  ;;  %v5671_v44 = vpop.f32.mrb[53].mxu1  ;;  %v2685_v43 = vadd.f32 %v5638_v0, %v7486_v62 }
 0x4fd   : > { %v5672_v18 = vadd.f32 %v5671_v44, %v5670_v1  ;;  %v5673_v32 = vpop.f32.mrb[54].mxu1 }
 0x4fe   : > { %v5674_v23 = vpop.f32.mrb[55].mxu1  ;;  %v2688_v3 = vadd.f32 %v5641_v45, %v7486_v62 }
 0x4ff   : > { %v5675_v29 = vadd.f32 %v5674_v23, %v5673_v32  ;;  %v2742_v16 = vadd.f32 %v5672_v18, %v2677_v35 }
 0x500   : > { %v5642_v49 = vpop.f32.mrb[64].mxu0 }
 0x501   : > { %v5643_v13 = vpop.f32.mrb[65].mxu0  ;;  %v2745_v34 = vadd.f32 %v5675_v29, %v2680_v5 }
 0x502   : > { %v5644_v24 = vadd.f32 %v5643_v13, %v5642_v49  ;;  %v5645_v30 = vpop.f32.mrb[66].mxu0  ;;  %v6307_v13 = vld [vmem:[%s8775_s4 + $0x448] sm:$0xff]  }
 0x503   : > { %v5646_v46 = vpop.f32.mrb[67].mxu0  ;;  %v5676_v20 = vpop.f32.mrb[56].mxu1 }
 0x504   : > { %v5647_v2 = vadd.f32 %v5646_v46, %v5645_v30  ;;  %v5677_v48 = vpop.f32.mrb[57].mxu1  ;;  %v2693_v9 = vadd.f32 %v5644_v24, %v7486_v62  ;;  %v6309_v24 = vld [vmem:[%s8775_s4 + $0x458] sm:$0xff]   ;;  %v6310_v30 = vld [vmem:[%s8775_s4 + $0x460] sm:$0xff]   ;;  %v6311_v46 = vld [vmem:[%s8775_s4 + $0x468] sm:$0xff]  }
 0x505   : > { %v5678_v42 = vadd.f32 %v5677_v48, %v5676_v20  ;;  %v5679_v27 = vpop.f32.mrb[58].mxu1  ;;  %v6312_v20 = vld [vmem:[%s8775_s4 + $0x470] sm:$0xff]   ;;  %v6314_v48 = vld [vmem:[%s8775_s4 + $0x480] sm:$0xff]  }
 0x506   : > { %v5680_v15 = vpop.f32.mrb[59].mxu1  ;;  %v2696_v31 = vadd.f32 %v5647_v2, %v7486_v62  ;;  %v6313_v2 = vld [vmem:[%s8775_s4 + $0x478] sm:$0xff]  }
 0x507   : > { %v5681_v21 = vadd.f32 %v5680_v15, %v5679_v27  ;;  %v2750_v19 = vadd.f32 %v5678_v42, %v2685_v43  ;;  %v6315_v43 = vld [vmem:[%s8775_s4 + $0x488] sm:$0xff]   ;;  %v6316_v42 = vld [vmem:[%s8775_s4 + $0x490] sm:$0xff]   ;;  %v6317_v27 = vld [vmem:[%s8775_s4 + $0x498] sm:$0xff]  }
 0x508   : > { %v6074_v12 = vpop.f32.mrb[68].mxu0  ;;  %v6318_v15 = vld [vmem:[%s8775_s4 + $0x4a0] sm:$0xff]  }
 0x509   : > { %v2807_v8 = vadd.f32 %v6074_v12, %v2742_v16  ;;  %v2798_v40 = vpop.f32.mrb[69].mxu0  ;;  %v2753_v50 = vadd.f32 %v5681_v21, %v2688_v3  ;;  %v6319_v3 = vld [vmem:[%s8775_s4 + $0x4a8] sm:$0xff]   ;;  %v6320_v21 = vld [vmem:[%s8775_s4 + $0x4b0] sm:$0xff]   ;;  %v3266_v12 = vld [vmem:[#allocation4] sm:$0xff] }
 0x50a   : > { %v2799_v7 = vadd.f32 %v2798_v40, %v2734_v47  ;;  %v6075_v51 = vpop.f32.mrb[70].mxu0  ;;  %v3268_v40 = vld [vmem:[#allocation4 + $0x10] sm:$0x3] }
 0x50b   : > { %v2810_v63 = vadd.f32 %v6075_v51, %v2745_v34  ;;  %v5682_v10 = vpop.f32.mrb[60].mxu1  ;;  %v2801_v4 = vpop.f32.mrb[71].mxu0  ;;  %v2831_v41 = vmax.f32 %v2807_v8, 0.0  ;;  %v6308_v34 = vld [vmem:[%s8775_s4 + $0x450] sm:$0xff]   ;;  %v3267_v8 = vld [vmem:[#allocation4 + $0x8] sm:$0xff]  ;;  %v3387_v51 = vrot.slane %v3268_v40, 1 }
 0x50c   : > { %v2802_v38 = vadd.f32 %v2801_v4, %v2737_v22  ;;  %v5683_v39 = vpop.f32.mrb[61].mxu1  ;;  %v2829_v17 = vmax.f32 %v2799_v7, 0.0  ;;  %v3385_v7 = vrot.slane %v3267_v8, 1 }
 0x50d   : > { %v2832_v36 = vmax.f32 %v2810_v63, 0.0  ;;  %v5684_v6 = vadd.f32 %v5683_v39, %v5682_v10  ;;  %v5685_v14 = vpop.f32.mrb[62].mxu1  ;;  %v6323_v39 = vld [vmem:[%s8775_s4 + $0x300] sm:$0xff]  }
 0x50e   : > { %v2830_v25 = vmax.f32 %v2802_v38, 0.0  ;;  %v5686_v11 = vpop.f32.mrb[63].mxu1  ;;  %v3388_v10 = vsel %vm1351_vm6, %v3385_v7, %v3387_v51  ;;  %v6322_v38 = vld [vmem:[%s8775_s4 + $0x340] sm:$0xff]  }
 0x50f   : > { %v2870_v26 = vpack.c.bf16 %v2832_v36, %v2831_v41  ;;  %v5687_v28 = vadd.f32 %v5686_v11, %v5685_v14  ;;  %v2758_v47 = vadd.f32 %v5684_v6, %v2693_v9  ;;  %5716 = vmatprep.subr.bf16.mxu0 %v6322_v38  ;;  %v6324_v9 = vld [vmem:[%s8775_s4 + $0x348] sm:$0xff]   ;;  %v6326_v36 = vld [vmem:[%s8775_s4 + $0x350] sm:$0xff]   ;;  %v6328_v14 = vld [vmem:[%s8775_s4 + $0x3c0] sm:$0xff]  }
 0x510   : > { %v2869_v0 = vpack.c.bf16 %v2830_v25, %v2829_v17  ;;  %v6078_v33 = vpop.f32.mrb[72].mxu0  ;;  %5717 = vmatpush3.bf16.msra.mxu0 %v6323_v39  ;;  %v6325_v41 = vld [vmem:[%s8775_s4 + $0x308] sm:$0xff]   ;;  %v6327_v6 = vld [vmem:[%s8775_s4 + $0x310] sm:$0xff]   ;;  %v6329_v17 = vld [vmem:[%s8775_s4 + $0x358] sm:$0xff]  }
 0x511   : > { %v2823_v37 = vadd.f32 %v6078_v33, %v2758_v47  ;;  %v2814_v1 = vpop.f32.mrb[73].mxu0  ;;  %v2761_v22 = vadd.f32 %v5687_v28, %v2696_v31  ;;  %5718 = vmatprep.subr.bf16.mxu0 %v6324_v9  ;;  %v6330_v25 = vld [vmem:[%s8775_s4 + $0x380] sm:$0xff]   ;;  %v6331_v11 = vld [vmem:[%s8775_s4 + $0x318] sm:$0xff]   ;;  %v6336_v28 = vld [vmem:[%s8775_s4 + $0x388] sm:$0xff]  }
 0x512   : > { %v2815_v45 = vadd.f32 %v2814_v1, %v2750_v19  ;;  %v6079_v44 = vpop.f32.mrb[74].mxu0  ;;  %6080 = vmatprep.subr.bf16.mxu1 %v2869_v0  ;;  %v6321_v19 = vld [vmem:[%s8775_s4 + $0x4b8] sm:$0xff]   ;;  %v6332_v31 = vld [vmem:[%s8775_s4 + $0x360] sm:$0xff]   ;;  %v6335_v33 = vld [vmem:[%s8775_s4 + $0x368] sm:$0xff]  }
 0x513   : > { %v2826_v35 = vadd.f32 %v6079_v44, %v2761_v22  ;;  %v2817_v18 = vpop.f32.mrb[75].mxu0  ;;  %6081 = vmatpush3.bf16.msra.mxu1 %v2869_v0  ;;  %v2835_v23 = vmax.f32 %v2823_v37, 0.0  ;;  %v6333_v47 = vld [vmem:[%s8775_s4 + $0x320] sm:$0xff]   ;;  %v6340_v0 = vld [vmem:[%s8775_s4 + $0x3d0] sm:$0xff]   ;;  %v6337_v1 = vld [vmem:[%s8775_s4 + $0x328] sm:$0xff]  }
 0x514   : > { %v2818_v32 = vadd.f32 %v2817_v18, %v2753_v50  ;;  %6082 = vmatprep.subr.bf16.mxu1 %v2870_v26  ;;  %v2833_v29 = vmax.f32 %v2815_v45, 0.0  ;;  %v3384_v50 = vrot.slane %v3266_v12, 1  ;;  %5719 = vmatpush3.bf16.msra.mxu0 %v6325_v41  ;;  %v6342_v37 = vld [vmem:[%s8775_s4 + $0x390] sm:$0xff]   ;;  %v7616_v22 = vld [vmem:[%s8776_s5] ss:$0 sm:$0xff]  ;;  %v8814_v39 = vld [vmem:[#allocation6_spill] sm:$0xff] }
 0x515   : > { %v2836_v5 = vmax.f32 %v2826_v35, 0.0  ;;  %5720 = vmatprep.subr.bf16.mxu0 %v6326_v36  ;;  %v6338_v45 = vld [vmem:[%s8775_s4 + $0x370] sm:$0xff]   ;;  %v554_v44 = vadd.f32 %v6551_v52, %v7616_v22  ;;  %v546_v18 = vadd.f32 %v7616_v22, %v6553_v53  ;;  %v578_v51 = vadd.f32 %v7616_v22, %v6569_v61 }
 0x516   : > { %v2834_v62 = vmax.f32 %v2818_v32, 0.0  ;;  %v3386_v63 = vsel %vm1351_vm6, %v3384_v50, %v3385_v7  ;;  %v6339_v35 = vld [vmem:[%s8775_s4 + $0x330] sm:$0xff]   ;;  %v6341_v32 = vld [vmem:[%s8775_s4 + $0x378] sm:$0xff]   ;;  %v581_v9 = vadd.f32 %v7616_v22, %v8814_v39 }
 0x517   : > { %v2872_v16 = vpack.c.bf16 %v2836_v5, %v2835_v23  ;;  %6083 = vmatpush3.bf16.msra.mxu1 %v2870_v26  ;;  %v3496_v4 = vpack.c.bf16 %v3388_v10, %v3386_v63  ;;  %v6334_v26 = vld [vmem:[%s8775_s4 + $0x3c8] sm:$0xff]   ;;  %v557_v23 = vadd.f32 %v6555_v54, %v7616_v22  ;;  %v549_v5 = vadd.f32 %v7616_v22, %v6557_v55  ;;  %v8813_v38 = vld [vmem:[#allocation5_spill] sm:$0xff] }
 0x518   : > { %v2871_v49 = vpack.c.bf16 %v2834_v62, %v2833_v29  ;;  %5721 = vmatpush3.bf16.msra.mxu0 %v6327_v6  ;;  %v674_v52 = vmax.f32 %v554_v44, 0.0  ;;  %v6343_v29 = vld [vmem:[%s8775_s4 + $0x338] sm:$0xff]   ;;  %v672_v62 = vmax.f32 %v546_v18, 0.0  ;;  %v570_v54 = vadd.f32 %v6559_v56, %v7616_v22 }
 0x519   : > { %3696 = vrot.lane.b32.xlu1 %v3496_v4, %s6371_s26  ;;  %5722 = vmatprep.subr.bf16.mxu0 %v6329_v17  ;;  %v675_v53 = vmax.f32 %v557_v23, 0.0 }
 0x51a   : > { %6084 = vmatprep.subr.bf16.mxu1 %v2871_v49  ;;  %v678_v56 = vmax.f32 %v570_v54, 0.0 }
 0x51b   : > { %6085 = vmatpush3.bf16.msra.mxu1 %v2871_v49 }
 0x51c   : > { %6086 = vmatprep.subr.bf16.mxu1 %v2872_v16  ;;  %5723 = vmatpush3.bf16.msra.mxu0 %v6331_v11 }
 0x51d   : > { %5724 = vmatprep.subr.bf16.mxu0 %v6332_v31 }
 0x51f   : > { %6087 = vmatpush3.bf16.msra.mxu1 %v2872_v16 }
 0x520   : > { %5828 = vmatprep.subr.bf16.mxu1 %v6328_v14  ;;  %5725 = vmatpush3.bf16.msra.mxu0 %v6333_v47 }
 0x521   : > { %5726 = vmatprep.subr.bf16.mxu0 %v6335_v33 }
 0x522   : > { %6089 = vmatmul.mubr.msk.bf16.vlgmr.msra.gmra.mrb[64].mxu1 %vm462_vm0, %v6307_v13 }
 0x523   : > { %6092 = vmatprep.mubr.msk.bf16.mxu1 %vm462_vm0, %v6308_v34  ;;  %5829 = vmatpush3.bf16.msra.mxu1 %v6330_v25  ;;  %v673_v34 = vmax.f32 %v549_v5, 0.0 }
 0x524   : > { %5830 = vmatprep.subr.bf16.mxu1 %v6334_v26  ;;  %5727 = vmatpush3.bf16.msra.mxu0 %v6337_v1  ;;  %v6346_v26 = vld [vmem:[%s8775_s4 + $0x3e0] sm:$0xff]  }
 0x525   : > { %5728 = vmatprep.subr.bf16.mxu0 %v6338_v45 }
 0x527   : > { %5831 = vmatpush3.bf16.msra.mxu1 %v6336_v28  ;;  %v6347_v28 = vld [vmem:[%s8775_s4 + $0x3a0] sm:$0xff]  }
 0x528   : > { %5832 = vmatprep.subr.bf16.mxu1 %v6340_v0  ;;  %5729 = vmatpush3.bf16.msra.mxu0 %v6339_v35  ;;  %v680_v0 = vmax.f32 %v578_v51, 0.0  ;;  %v681_v35 = vmax.f32 %v581_v9, 0.0  ;;  %v6351_v51 = vld [vmem:[%s8775_s4 + $0x3b0] sm:$0xff]  }
 0x529   : > { %5730 = vmatprep.subr.bf16.mxu0 %v6341_v32 }
 0x52a   : > { %6093 = vmatmul.mubr.msk.bf16.gmra.mrb[68].mxu1 %vm462_vm0, %v6309_v24 }
 0x52b   : > { %6096 = vmatprep.mubr.msk.bf16.mxu1 %vm462_vm0, %v6310_v30  ;;  %5833 = vmatpush3.bf16.msra.mxu1 %v6342_v37 }
 0x52c   : > { %5731 = vmatpush3.bf16.msra.mxu0 %v6343_v29 }
 0x532   : > { %6097 = vmatmul.mubr.msk.bf16.gmra.mrb[72].mxu1 %vm462_vm0, %v6311_v46 }
 0x533   : > { %6100 = vmatprep.mubr.msk.bf16.mxu1 %vm462_vm0, %v6312_v20  ;;  %v562_v20 = vadd.f32 %v7616_v22, %v6561_v57  ;;  %v6344_v57 = vld [vmem:[%s8775_s4 + $0x3d8] sm:$0xff]  }
 0x534   : > { %5834 = vmatprep.subr.bf16.mxu1 %v6344_v57 }
 0x53a   : > { %6101 = vmatmul.mubr.msk.bf16.gmra.mrb[76].mxu1 %vm462_vm0, %v6313_v2 }
 0x53b   : > { %6104 = vmatprep.mubr.msk.bf16.mxu1 %vm462_vm0, %v6314_v48  ;;  %v573_v48 = vadd.f32 %v6563_v58, %v7616_v22 }
 0x542   : > { %6105 = vmatmul.mubr.msk.bf16.gmra.mrb[80].mxu1 %vm462_vm0, %v6315_v43  ;;  %v565_v43 = vadd.f32 %v7616_v22, %v6565_v59  ;;  %v586_v59 = vadd.f32 %v6567_v60, %v7616_v22  ;;  %v589_v60 = vadd.f32 %v8813_v38, %v7616_v22 }
 0x543   : > { %6108 = vmatprep.mubr.msk.bf16.mxu1 %vm462_vm0, %v6316_v42  ;;  %v676_v42 = vmax.f32 %v562_v20, 0.0  ;;  %v8817_v20 = vld [vmem:[#allocation9_spill] sm:$0xff] }
 0x544   : > { %v682_v47 = vmax.f32 %v586_v59, 0.0  ;;  %v683_v44 = vmax.f32 %v589_v60, 0.0 }
 0x54a   : > { %6109 = vmatmul.mubr.msk.bf16.gmra.mrb[84].mxu1 %vm462_vm0, %v6317_v27 }
 0x54b   : > { %6112 = vmatprep.mubr.msk.bf16.mxu1 %vm462_vm0, %v6318_v15  ;;  %v6345_v15 = vld [vmem:[%s8775_s4 + $0x398] sm:$0xff]  }
 0x54c   : > { %5835 = vmatpush3.bf16.msra.mxu1 %v6345_v15 }
 0x54d   : > { %5836 = vmatprep.subr.bf16.mxu1 %v6346_v26 }
 0x550   : > { %5837 = vmatpush3.bf16.msra.mxu1 %v6347_v28 }
 0x552   : > { %6113 = vmatmul.mubr.msk.bf16.gmra.mrb[88].mxu1 %vm462_vm0, %v6319_v3  ;;  %v679_v3 = vmax.f32 %v573_v48, 0.0 }
 0x553   : > { %6116 = vmatprep.mubr.msk.bf16.mxu1 %vm462_vm0, %v6320_v21 }
 0x55a   : > { %6117 = vmatmul.mubr.msk.bf16.gmra.mrb[92].mxu1 %vm462_vm0, %v6321_v19  ;;  %v677_v19 = vmax.f32 %v565_v43, 0.0 }
 0x5f5   : > { %v6090_v16 = vpop.f32.mrb[64].mxu1 }
 0x5f6   : > { %v3164_v49 = vadd.f32 %v6090_v16, %v674_v52  ;;  %v3035_v13 = vpop.f32.mrb[65].mxu1 }
 0x5f7   : > { %v3162_v24 = vadd.f32 %v3035_v13, %v672_v62  ;;  %v6091_v30 = vpop.f32.mrb[66].mxu1  ;;  %v8815_v13 = vld [vmem:[#allocation7_spill] sm:$0xff] }
 0x5f8   : > { %3236 = vst.msk [vmem:[#allocation4 + $0x31] sm:$0xff] %vm462_vm0, %v3164_v49  ;;  %v3165_v55 = vadd.f32 %v6091_v30, %v675_v53  ;;  %v3038_v46 = vpop.f32.mrb[67].mxu1  ;;  %v6348_v53 = vld [vmem:[%s8775_s4 + $0x3e8] sm:$0xff]  }
 0x5f9   : > { %3234 = vst.msk [vmem:[#allocation4 + $0x19] sm:$0xff] %vm462_vm0, %v3162_v24  ;;  %v3163_v2 = vadd.f32 %v3038_v46, %v673_v34  ;;  %v6349_v49 = vld [vmem:[%s8775_s4 + $0x3a8] sm:$0xff]   ;;  %v602_v34 = vadd.f32 %v8815_v13, %v7616_v22  ;;  %5838 = vmatprep.subr.bf16.mxu1 %v6348_v53 }
 0x5fa   : > { %3237 = vst.msk [vmem:[#allocation4 + $0x39] sm:$0xff] %vm462_vm0, %v3165_v55  ;;  %v8816_v55 = vld [vmem:[#allocation8_spill] sm:$0xff]  ;;  %5839 = vmatpush3.bf16.msra.mxu1 %v6349_v49  ;;  %v8822_v49 = vld [vmem:[#allocation14_spill] sm:$0xff] }
 0x5fb   : > { %3235 = vst.msk [vmem:[#allocation4 + $0x21] sm:$0xff] %vm462_vm0, %v3163_v2  ;;  %v594_v46 = vadd.f32 %v7616_v22, %v8816_v55  ;;  %v605_v2 = vadd.f32 %v8817_v20, %v7616_v22  ;;  %v613_v13 = vadd.f32 %v7616_v22, %v8822_v49 }
 0x5fd   : > { %v6094_v27 = vpop.f32.mrb[68].mxu1  ;;  %v684_v38 = vmax.f32 %v594_v46, 0.0 }
 0x5fe   : > { %v3168_v58 = vadd.f32 %v6094_v27, %v678_v56  ;;  %v3051_v21 = vpop.f32.mrb[69].mxu1 }
 0x5ff   : > { %v3166_v12 = vadd.f32 %v3051_v21, %v676_v42  ;;  %v6095_v8 = vpop.f32.mrb[70].mxu1  ;;  %v7678_v6 = vld [vmem:[#allocation4 + $0x30] sm:$0xff]  ;;  %v8818_v42 = vld [vmem:[#allocation10_spill] sm:$0xff] }
 0x600   : > { %3240 = vst.msk [vmem:[#allocation4 + $0x61] sm:$0xff] %vm462_vm0, %v3168_v58  ;;  %v3169_v40 = vadd.f32 %v6095_v8, %v679_v3  ;;  %v3054_v50 = vpop.f32.mrb[71].mxu1  ;;  %v7659_v7 = vld [vmem:[#allocation4 + $0x18] sm:$0xff]  ;;  %v3394_v45 = vrot.slane %v7678_v6, 1  ;;  %v597_v27 = vadd.f32 %v7616_v22, %v8818_v42 }
 0x601   : > { %3238 = vst.msk [vmem:[#allocation4 + $0x49] sm:$0xff] %vm462_vm0, %v3166_v12  ;;  %v3167_v63 = vadd.f32 %v3054_v50, %v677_v19  ;;  %v7664_v10 = vld [vmem:[#allocation4 + $0x38] sm:$0xff]  ;;  %v7666_v4 = vld [vmem:[#allocation4 + $0x40] sm:$0x3]  ;;  %v3389_v36 = vrot.slane %v7659_v7, 1  ;;  %v6350_v50 = vld [vmem:[%s8775_s4 + $0x3f0] sm:$0xff]  }
 0x602   : > { %3241 = vst.msk [vmem:[#allocation4 + $0x69] sm:$0xff] %vm462_vm0, %v3169_v40  ;;  %v7673_v41 = vld [vmem:[#allocation4 + $0x20] sm:$0xff]  ;;  %v7676_v61 = vld [vmem:[#allocation4 + $0x28] sm:$0x3]  ;;  %v3395_v14 = vrot.slane %v7664_v10, 1  ;;  %v3397_v31 = vrot.slane %v7666_v4, 1  ;;  %v7704_v29 = vpack.c.bf16 %v7664_v10, %v7678_v6  ;;  %5840 = vmatprep.subr.bf16.mxu1 %v6350_v50 }
 0x603   : > { %3239 = vst.msk [vmem:[#allocation4 + $0x51] sm:$0xff] %vm462_vm0, %v3167_v63  ;;  %v7684_v17 = vpack.c.bf16 %v7673_v41, %v7659_v7  ;;  %v3390_v25 = vrot.slane %v7673_v41, 1  ;;  %v3392_v11 = vrot.slane %v7676_v61, 1  ;;  %v686_v63 = vmax.f32 %v602_v34, 0.0  ;;  %5841 = vmatpush3.bf16.msra.mxu1 %v6351_v51 }
 0x604   : > { %v3396_v62 = vsel %vm1351_vm6, %v3394_v45, %v3395_v14  ;;  %v3398_v16 = vsel %vm1351_vm6, %v3395_v14, %v3397_v31  ;;  %v687_v14 = vmax.f32 %v605_v2, 0.0  ;;  %v6353_v45 = vld [vmem:[%s8775_s4 + $0x3b8] sm:$0xff]   ;;  %v689_v51 = vmax.f32 %v613_v13, 0.0 }
 0x605   : > { %v6098_v33 = vpop.f32.mrb[72].mxu1  ;;  %3744 = vrot.lane.b32.xlu0 %v7684_v17, %s6371_s26  ;;  %v3391_v37 = vsel %vm1351_vm6, %v3389_v36, %v3390_v25  ;;  %v3393_v1 = vsel %vm1351_vm6, %v3390_v25, %v3392_v11  ;;  %v7735_v57 = vpack.c.bf16 %v3398_v16, %v3396_v62  ;;  %v685_v25 = vmax.f32 %v597_v27, 0.0 }
 0x606   : > { %v3172_v18 = vadd.f32 %v6098_v33, %v682_v47  ;;  %v3067_v32 = vpop.f32.mrb[73].mxu1  ;;  %v7700_v23 = vpack.c.bf16 %v3393_v1, %v3391_v37  ;;  %v6352_v1 = vld [vmem:[%s8775_s4 + $0x3f8] sm:$0xff]   ;;  %v3522_v13 = vrot.slane %v7678_v6, 2 }
 0x607   : > { %v3170_v5 = vadd.f32 %v3067_v32, %v680_v0  ;;  %v6099_v52 = vpop.f32.mrb[74].mxu1  ;;  %v7742_v21 = vld [vmem:[#allocation4 + $0x60] sm:$0xff]  ;;  %5842 = vmatprep.subr.bf16.mxu1 %v6352_v1 }
 0x608   : > { %3244 = vst.msk [vmem:[#allocation4 + $0x91] sm:$0xff] %vm462_vm0, %v3172_v18  ;;  %v3173_v24 = vadd.f32 %v6099_v52, %v683_v44  ;;  %v3070_v30 = vpop.f32.mrb[75].mxu1  ;;  %3698 = vrot.lane.b32.xlu1 %v7700_v23, %s6371_s26  ;;  %v7719_v54 = vld [vmem:[#allocation4 + $0x48] sm:$0xff]  ;;  %v3404_v36 = vrot.slane %v7742_v21, 1  ;;  %v8819_v44 = vld [vmem:[#allocation11_spill] sm:$0xff]  ;;  %5843 = vmatpush3.bf16.msra.mxu1 %v6353_v45 }
 0x609   : > { %3242 = vst.msk [vmem:[#allocation4 + $0x79] sm:$0xff] %vm462_vm0, %v3170_v5  ;;  %v3171_v48 = vadd.f32 %v3070_v30, %v681_v35  ;;  %3746 = vrot.lane.b32.xlu0 %v7704_v29, %s6371_s26  ;;  %v7728_v43 = vld [vmem:[#allocation4 + $0x68] sm:$0xff]  ;;  %v7730_v56 = vld [vmem:[#allocation4 + $0x70] sm:$0x3]  ;;  %v3399_v3 = vrot.slane %v7719_v54, 1  ;;  %v618_v35 = vadd.f32 %v8819_v44, %v7616_v22  ;;  %v8823_v1 = vld [vmem:[#allocation15_spill] sm:$0xff] }
 0x60a   : > { %3245 = vst.msk [vmem:[#allocation4 + $0x99] sm:$0xff] %vm462_vm0, %v3173_v24  ;;  %v7737_v15 = vld [vmem:[#allocation4 + $0x50] sm:$0xff]  ;;  %v7740_v58 = vld [vmem:[#allocation4 + $0x58] sm:$0x3]  ;;  %v3405_v19 = vrot.slane %v7728_v43, 1  ;;  %v3407_v40 = vrot.slane %v7730_v56, 1  ;;  %v7770_v0 = vpack.c.bf16 %v7728_v43, %v7742_v21  ;;  %v634_v45 = vadd.f32 %v8823_v1, %v7616_v22 }
 0x60b   : > { %3243 = vst.msk [vmem:[#allocation4 + $0x81] sm:$0xff] %vm462_vm0, %v3171_v48  ;;  %v7748_v12 = vpack.c.bf16 %v7737_v15, %v7719_v54  ;;  %v3400_v8 = vrot.slane %v7737_v15, 1  ;;  %v3402_v59 = vrot.slane %v7740_v58, 1  ;;  %v8820_v18 = vld [vmem:[#allocation12_spill] sm:$0xff]  ;;  %v8821_v5 = vld [vmem:[#allocation13_spill] sm:$0xff] }
 0x60c   : > { %3700 = vrot.lane.b32.xlu1 %v7735_v57, %s6371_s26  ;;  %v3406_v33 = vsel %vm1351_vm6, %v3404_v36, %v3405_v19  ;;  %v3408_v37 = vsel %vm1351_vm6, %v3405_v19, %v3407_v40  ;;  %v610_v32 = vadd.f32 %v7616_v22, %v8820_v18  ;;  %v621_v52 = vadd.f32 %v8821_v5, %v7616_v22  ;;  %v8826_v5 = vld [vmem:[#allocation18_spill] sm:$0xff] }
 0x60d   : > { %v6102_v60 = vpop.f32.mrb[76].mxu1  ;;  %3748 = vrot.lane.b32.xlu0 %v7748_v12, %s6371_s26  ;;  %v3401_v39 = vsel %vm1351_vm6, %v3399_v3, %v3400_v8  ;;  %v3403_v9 = vsel %vm1351_vm6, %v3400_v8, %v3402_v59  ;;  %v7801_v55 = vpack.c.bf16 %v3408_v37, %v3406_v33  ;;  %v690_v59 = vmax.f32 %v618_v35, 0.0  ;;  %v8825_v35 = vld [vmem:[#allocation17_spill] sm:$0xff] }
 0x60e   : > { %v3176_v11 = vadd.f32 %v6102_v60, %v686_v63  ;;  %v3083_v31 = vpop.f32.mrb[77].mxu1  ;;  %v7766_v26 = vpack.c.bf16 %v3403_v9, %v3401_v39  ;;  %v688_v40 = vmax.f32 %v610_v32, 0.0  ;;  %v691_v50 = vmax.f32 %v621_v52, 0.0 }
 0x60f   : > { %v3174_v28 = vadd.f32 %v3083_v31, %v684_v38  ;;  %v6103_v47 = vpop.f32.mrb[78].mxu1  ;;  %v7808_v48 = vld [vmem:[#allocation4 + $0x90] sm:$0xff]  ;;  %v3518_v9 = vrot.slane %v7673_v41, 2  ;;  %v8824_v41 = vld [vmem:[#allocation16_spill] sm:$0xff]  ;;  %v637_v18 = vadd.f32 %v8825_v35, %v7616_v22  ;;  %v629_v52 = vadd.f32 %v7616_v22, %v8826_v5 }
 0x610   : > { %3248 = vst.msk [vmem:[#allocation4 + $0xc1] sm:$0xff] %vm462_vm0, %v3176_v11  ;;  %v3177_v62 = vadd.f32 %v6103_v47, %v687_v14  ;;  %v3086_v16 = vpop.f32.mrb[79].mxu1  ;;  %3702 = vrot.lane.b32.xlu1 %v7766_v26, %s6371_s26  ;;  %v7789_v53 = vld [vmem:[#allocation4 + $0x78] sm:$0xff]  ;;  %v3414_v39 = vrot.slane %v7808_v48, 1  ;;  %v3520_v11 = vrot.slane %v7676_v61, 2  ;;  %v626_v44 = vadd.f32 %v7616_v22, %v8824_v41 }
 0x611   : > { %3246 = vst.msk [vmem:[#allocation4 + $0xa9] sm:$0xff] %vm462_vm0, %v3174_v28  ;;  %v3175_v34 = vadd.f32 %v3086_v16, %v685_v25  ;;  %3750 = vrot.lane.b32.xlu0 %v7770_v0, %s6371_s26  ;;  %v7796_v24 = vld [vmem:[#allocation4 + $0x98] sm:$0xff]  ;;  %v7798_v30 = vld [vmem:[#allocation4 + $0xa0] sm:$0x3]  ;;  %v3409_v20 = vrot.slane %v7789_v53, 1  ;;  %v3523_v16 = vrot.slane %v7664_v10, 2 }
 0x612   : > { %3249 = vst.msk [vmem:[#allocation4 + $0xc9] sm:$0xff] %vm462_vm0, %v3177_v62  ;;  %v7803_v46 = vld [vmem:[#allocation4 + $0x80] sm:$0xff]  ;;  %v7806_v2 = vld [vmem:[#allocation4 + $0x88] sm:$0x3]  ;;  %v3415_v42 = vrot.slane %v7796_v24, 1  ;;  %v3417_v8 = vrot.slane %v7798_v30, 1  ;;  %v7832_v47 = vpack.c.bf16 %v7796_v24, %v7808_v48 }
 0x613   : > { %3247 = vst.msk [vmem:[#allocation4 + $0xb1] sm:$0xff] %vm462_vm0, %v3175_v34  ;;  %v7814_v27 = vpack.c.bf16 %v7803_v46, %v7789_v53  ;;  %v3410_v3 = vrot.slane %v7803_v46, 1  ;;  %v3412_v19 = vrot.slane %v7806_v2, 1  ;;  %v3517_v62 = vrot.slane %v7659_v7, 2 }
 0x614   : > { %3704 = vrot.lane.b32.xlu1 %v7801_v55, %s6371_s26  ;;  %v3416_v33 = vsel %vm1351_vm6, %v3414_v39, %v3415_v42  ;;  %v3418_v37 = vsel %vm1351_vm6, %v3415_v42, %v3417_v8  ;;  %v3525_v8 = vrot.slane %v7666_v4, 2  ;;  %v693_v39 = vmax.f32 %v629_v52, 0.0  ;;  %v8827_v4 = vld [vmem:[#allocation19_spill] sm:$0xff] }
 0x615   : > { %v6106_v63 = vpop.f32.mrb[80].mxu1  ;;  %3752 = vrot.lane.b32.xlu0 %v7814_v27, %s6371_s26  ;;  %v3411_v38 = vsel %vm1351_vm6, %v3409_v20, %v3410_v3  ;;  %v3413_v60 = vsel %vm1351_vm6, %v3410_v3, %v3412_v19  ;;  %v7854_v34 = vpack.c.bf16 %v3418_v37, %v3416_v33  ;;  %v3519_v6 = vsel %vm1388_vm7, %v3517_v62, %v3518_v9 }
 0x616   : > { %v3180_v36 = vadd.f32 %v6106_v63, %v690_v59  ;;  %v3099_v14 = vpop.f32.mrb[81].mxu1  ;;  %v7827_v25 = vpack.c.bf16 %v3413_v60, %v3411_v38  ;;  %v3521_v19 = vsel %vm1388_vm7, %v3518_v9, %v3520_v11  ;;  %v7875_v59 = vld [vmem:[%s8775_s4 + $0x400] sm:$0xff]   ;;  %v695_v60 = vmax.f32 %v637_v18, 0.0 }
 0x617   : > { %v3178_v31 = vadd.f32 %v3099_v14, %v688_v40  ;;  %v6107_v28 = vpop.f32.mrb[82].mxu1  ;;  %v694_v40 = vmax.f32 %v634_v45, 0.0  ;;  %v650_v9 = vadd.f32 %v8827_v4, %v7616_v22  ;;  %v7887_v14 = vld [vmem:[#allocation4 + $0xc0] sm:$0xff]  ;;  %v3524_v11 = vsel %vm1388_vm7, %v3522_v13, %v3523_v16  ;;  %6120 = vmatprep.subr.bf16.mxu0 %v7875_v59  ;;  %6160 = vmatprep.subr.bf16.mxu1 %v7875_v59  ;;  %v8829_v13 = vld [vmem:[#allocation21_spill] sm:$0xff] }
 0x618   : > { %3252 = vst.msk [vmem:[#allocation4 + $0xf1] sm:$0xff] %vm462_vm0, %v3180_v36  ;;  %v3181_v61 = vadd.f32 %v6107_v28, %v691_v50  ;;  %v3102_v32 = vpop.f32.mrb[83].mxu1  ;;  %3706 = vrot.lane.b32.xlu1 %v7827_v25, %s6371_s26  ;;  %v7856_v20 = vld [vmem:[#allocation4 + $0xa8] sm:$0xff]  ;;  %v692_v50 = vmax.f32 %v626_v44, 0.0  ;;  %v7895_v1 = vpack.c.bf16 %v3521_v19, %v3519_v6  ;;  %v3526_v35 = vsel %vm1388_vm7, %v3523_v16, %v3525_v8  ;;  %v8830_v16 = vld [vmem:[#allocation22_spill] sm:$0xff] }
 0x619   : > { %3250 = vst.msk [vmem:[#allocation4 + $0xd9] sm:$0xff] %vm462_vm0, %v3178_v31  ;;  %v3179_v49 = vadd.f32 %v3102_v32, %v689_v51  ;;  %3754 = vrot.lane.b32.xlu0 %v7832_v47, %s6371_s26  ;;  %v7867_v10 = vld [vmem:[#allocation4 + $0xc8] sm:$0xff]  ;;  %v7881_v38 = vld [vmem:[#allocation4 + $0xd0] sm:$0x3]  ;;  %v3419_v28 = vrot.slane %v7856_v20, 1  ;;  %v653_v6 = vadd.f32 %v8829_v13, %v7616_v22  ;;  %v645_v19 = vadd.f32 %v7616_v22, %v8830_v16 }
 0x61a   : > { %3253 = vst.msk [vmem:[#allocation4 + $0xf9] sm:$0xff] %vm462_vm0, %v3181_v61  ;;  %v7858_v42 = vld [vmem:[#allocation4 + $0xb0] sm:$0xff]  ;;  %v7860_v3 = vld [vmem:[#allocation4 + $0xb8] sm:$0x3]  ;;  %v7893_v37 = vpack.c.bf16 %v7867_v10, %v7887_v14  ;;  %v3425_v44 = vrot.slane %v7867_v10, 1  ;;  %v3427_v18 = vrot.slane %v7881_v38, 1 }
 0x61b   : > { %3251 = vst.msk [vmem:[#allocation4 + $0xe1] sm:$0xff] %vm462_vm0, %v3179_v49  ;;  %v7865_v7 = vpack.c.bf16 %v7858_v42, %v7856_v20  ;;  %v3420_v51 = vrot.slane %v7858_v42, 1  ;;  %v3422_v63 = vrot.slane %v7860_v3, 1  ;;  %v8828_v61 = vld [vmem:[#allocation20_spill] sm:$0xff] }
 0x61c   : > { %3708 = vrot.lane.b32.xlu1 %v7854_v34, %s6371_s26  ;;  %v642_v32 = vadd.f32 %v7616_v22, %v8828_v61  ;;  %v3428_v4 = vsel %vm1351_vm6, %v3425_v44, %v3427_v18  ;;  %v3533_v18 = vrot.slane %v7728_v43, 2 }
 0x61d   : > { %v6110_v36 = vpop.f32.mrb[84].mxu1  ;;  %3756 = vrot.lane.b32.xlu0 %v7865_v7, %s6371_s26  ;;  %v3421_v62 = vsel %vm1351_vm6, %v3419_v28, %v3420_v51  ;;  %v3423_v49 = vsel %vm1351_vm6, %v3420_v51, %v3422_v63  ;;  %v3528_v51 = vrot.slane %v7737_v15, 2  ;;  %v699_v28 = vmax.f32 %v653_v6, 0.0  ;;  %v8831_v15 = vld [vmem:[#allocation23_spill] sm:$0xff] }
 0x61e   : > { %v3184_v31 = vadd.f32 %v6110_v36, %v694_v40  ;;  %v3115_v33 = vpop.f32.mrb[85].mxu1  ;;  %v3424_v40 = vrot.slane %v7887_v14, 1  ;;  %v7922_v63 = vpack.c.bf16 %v3423_v49, %v3421_v62  ;;  %v696_v36 = vmax.f32 %v642_v32, 0.0 }
 0x61f   : > { %v3182_v45 = vadd.f32 %v3115_v33, %v692_v50  ;;  %v6111_v41 = vpop.f32.mrb[86].mxu1  ;;  %v7918_v50 = vpack.c.bf16 %v3526_v35, %v3524_v11  ;;  %v3530_v11 = vrot.slane %v7740_v58, 2  ;;  %v697_v33 = vmax.f32 %v645_v19, 0.0 }
 0x620   : > { %3256 = vst.msk [vmem:[#allocation4 + $0x121] sm:$0xff] %vm462_vm0, %v3184_v31  ;;  %v3185_v5 = vadd.f32 %v6111_v41, %v695_v60  ;;  %v3118_v52 = vpop.f32.mrb[87].mxu1  ;;  %3758 = vrot.lane.b32.xlu1 %v7893_v37, %s6371_s26  ;;  %v3426_v60 = vsel %vm1351_vm6, %v3424_v40, %v3425_v44  ;;  %v3527_v41 = vrot.slane %v7719_v54, 2  ;;  %v3532_v44 = vrot.slane %v7742_v21, 2 }
 0x621   : > { %3254 = vst.msk [vmem:[#allocation4 + $0x109] sm:$0xff] %vm462_vm0, %v3182_v45  ;;  %v3183_v8 = vadd.f32 %v3118_v52, %v693_v39  ;;  %3792 = vrot.lane.b32.xlu0 %v7895_v1, %s6371_s26  ;;  %v698_v39 = vmax.f32 %v650_v9, 0.0  ;;  %v666_v45 = vadd.f32 %v8831_v15, %v7616_v22  ;;  %v7940_v58 = vpack.c.bf16 %v3428_v4, %v3426_v60  ;;  %v7948_v49 = vld [vmem:[#allocation4 + $0xf8] sm:$0xff]  ;;  %v7958_v40 = vld [vmem:[#allocation4 + $0x100] sm:$0x3]  ;;  %v8833_v60 = vld [vmem:[#allocation24_spill] sm:$0xff] }
 0x622   : > { %3257 = vst.msk [vmem:[#allocation4 + $0x129] sm:$0xff] %vm462_vm0, %v3185_v5  ;;  %v7928_v31 = vld [vmem:[#allocation4 + $0xe0] sm:$0xff]  ;;  %v7936_v9 = vld [vmem:[#allocation4 + $0xe8] sm:$0x3]  ;;  %v7942_v5 = vld [vmem:[#allocation4 + $0xd8] sm:$0xff]  ;;  %v3529_v13 = vsel %vm1388_vm7, %v3527_v41, %v3528_v51  ;;  %v3535_v21 = vrot.slane %v7730_v56, 2  ;;  %v3531_v19 = vsel %vm1388_vm7, %v3528_v51, %v3530_v11  ;;  %v658_v4 = vadd.f32 %v7616_v22, %v8833_v60 }
 0x623   : > { %3255 = vst.msk [vmem:[#allocation4 + $0x111] sm:$0xff] %vm462_vm0, %v3183_v8  ;;  %8832 = vst [vmem:[#allocation5_spill] sm:$0xff] %v7940_v58  ;;  %v7946_v54 = vpack.c.bf16 %v7928_v31, %v7942_v5  ;;  %v3430_v16 = vrot.slane %v7928_v31, 1  ;;  %v3432_v8 = vrot.slane %v7936_v9, 1  ;;  %v8834_v56 = vld [vmem:[#allocation25_spill] sm:$0xff]  ;;  %v8835_v15 = vld [vmem:[#allocation26_spill] sm:$0xff] }
 0x624   : > { %3794 = vrot.lane.b32.xlu1 %v7918_v50, %s6371_s26  ;;  %v661_v51 = vadd.f32 %v7616_v22, %v8835_v15  ;;  %v3429_v11 = vrot.slane %v7942_v5, 1 }
 0x625   : > { %v6114_v35 = vpop.f32.mrb[88].mxu1  ;;  %3710 = vrot.lane.b32.xlu0 %v7922_v63, %s6371_s26 }
 0x626   : > { %v3188_v61 = vadd.f32 %v6114_v35, %v698_v39  ;;  %v3131_v32 = vpop.f32.mrb[89].mxu1  ;;  %v669_v39 = vadd.f32 %v8834_v56, %v7616_v22  ;;  %v3534_v35 = vsel %vm1388_vm7, %v3532_v44, %v3533_v18  ;;  %v3437_v22 = vrot.slane %v7958_v40, 1 }
 0x627   : > { %v3186_v52 = vadd.f32 %v3131_v32, %v696_v36  ;;  %v6115_v62 = vpop.f32.mrb[90].mxu1  ;;  %v3536_v32 = vsel %vm1388_vm7, %v3533_v18, %v3535_v21 }
 0x628   : > { %3260 = vst.msk [vmem:[#allocation4 + $0x151] sm:$0xff] %vm462_vm0, %v3188_v61  ;;  %v3189_v43 = vadd.f32 %v6115_v62, %v699_v28  ;;  %v3134_v6 = vpop.f32.mrb[91].mxu1  ;;  %3712 = vrot.lane.b32.xlu1 %v7940_v58, %s6371_s26  ;;  %v7967_v28 = vld [vmem:[#allocation4 + $0xf0] sm:$0xff]  ;;  %v7980_v61 = vpack.c.bf16 %v3531_v19, %v3529_v13  ;;  %v3431_v62 = vsel %vm1351_vm6, %v3429_v11, %v3430_v16  ;;  %v703_v13 = vmax.f32 %v669_v39, 0.0 }
 0x629   : > { %3258 = vst.msk [vmem:[#allocation4 + $0x139] sm:$0xff] %vm462_vm0, %v3186_v52  ;;  %v3187_v36 = vadd.f32 %v3134_v6, %v697_v33  ;;  %3760 = vrot.lane.b32.xlu0 %v7946_v54, %s6371_s26  ;;  %v7975_v41 = vpack.c.bf16 %v7948_v49, %v7967_v28  ;;  %v3435_v33 = vrot.slane %v7948_v49, 1  ;;  %v702_v52 = vmax.f32 %v666_v45, 0.0 }
 0x62a   : > { %3261 = vst.msk [vmem:[#allocation4 + $0x159] sm:$0xff] %vm462_vm0, %v3189_v43  ;;  %v3433_v43 = vsel %vm1351_vm6, %v3430_v16, %v3432_v8  ;;  %v700_v6 = vmax.f32 %v658_v4, 0.0  ;;  %v3434_v44 = vrot.slane %v7967_v28, 1  ;;  %v701_v19 = vmax.f32 %v661_v51, 0.0  ;;  %v8001_v39 = vld [vmem:[#allocation4 + $0x110] sm:$0xff] }
 0x62b   : > { %3259 = vst.msk [vmem:[#allocation4 + $0x141] sm:$0xff] %vm462_vm0, %v3187_v36  ;;  %v7991_v56 = vpack.c.bf16 %v3536_v32, %v3534_v35  ;;  %v7993_v15 = vpack.c.bf16 %v3433_v43, %v3431_v62  ;;  %v3438_v16 = vsel %vm1351_vm6, %v3435_v33, %v3437_v22  ;;  %v3538_v8 = vrot.slane %v7803_v46, 2  ;;  %v8022_v62 = vld [vmem:[#allocation4 + $0x128] sm:$0xff] }
 0x62c   : > { %3762 = vrot.lane.b32.xlu1 %v7975_v41, %s6371_s26  ;;  %v3436_v11 = vsel %vm1351_vm6, %v3434_v44, %v3435_v33  ;;  %v3540_v51 = vrot.slane %v7806_v2, 2  ;;  %v8007_v33 = vld [vmem:[#allocation4 + $0x118] sm:$0x3]  ;;  %v3537_v46 = vrot.slane %v7789_v53, 2  ;;  %v3543_v32 = vrot.slane %v7796_v24, 2 }
 0x62d   : > { %v6118_v60 = vpop.f32.mrb[92].mxu1  ;;  %3796 = vrot.lane.b32.xlu0 %v7980_v61, %s6371_s26  ;;  %v8012_v22 = vpack.c.bf16 %v3438_v16, %v3436_v11  ;;  %v3542_v2 = vrot.slane %v7808_v48, 2  ;;  %v3545_v53 = vrot.slane %v7798_v30, 2  ;;  %v3440_v24 = vrot.slane %v8001_v39, 1  ;;  %v8031_v44 = vld [vmem:[#allocation4 + $0x130] sm:$0x3] }
 0x62e   : > { %v3192_v18 = vadd.f32 %v6118_v60, %v702_v52  ;;  %v3147_v21 = vpop.f32.mrb[93].mxu1  ;;  %v8014_v52 = vld [vmem:[#allocation4 + $0x108] sm:$0xff]  ;;  %v3539_v43 = vsel %vm1388_vm7, %v3537_v46, %v3538_v8  ;;  %v3442_v48 = vrot.slane %v8007_v33, 1  ;;  %v8035_v60 = vld [vmem:[#allocation4 + $0x120] sm:$0xff] }
 0x62f   : > { %v3190_v45 = vadd.f32 %v3147_v21, %v700_v6  ;;  %v6119_v36 = vpop.f32.mrb[94].mxu1  ;;  %v3541_v6 = vsel %vm1388_vm7, %v3538_v8, %v3540_v51  ;;  %v3439_v30 = vrot.slane %v8014_v52, 1  ;;  %v3444_v8 = vrot.slane %v8035_v60, 1 }
 0x630   : > { %3264 = vst.msk [vmem:[#allocation4 + $0x181] sm:$0xff] %vm462_vm0, %v3192_v18  ;;  %v3193_v4 = vadd.f32 %v6119_v36, %v703_v13  ;;  %v3150_v58 = vpop.f32.mrb[95].mxu1  ;;  %3798 = vrot.lane.b32.xlu1 %v7991_v56, %s6371_s26  ;;  %v8040_v13 = vpack.c.bf16 %v8022_v62, %v8035_v60  ;;  %v3445_v18 = vrot.slane %v8022_v62, 1  ;;  %v8044_v21 = vpack.c.bf16 %v3541_v6, %v3539_v43 }
 0x631   : > { %3262 = vst.msk [vmem:[#allocation4 + $0x169] sm:$0xff] %vm462_vm0, %v3190_v45  ;;  %v3191_v35 = vadd.f32 %v3150_v58, %v701_v19  ;;  %3714 = vrot.lane.b32.xlu0 %v7993_v15, %s6371_s26  ;;  %v8020_v58 = vpack.c.bf16 %v8001_v39, %v8014_v52  ;;  %v3544_v19 = vsel %vm1388_vm7, %v3542_v2, %v3543_v32  ;;  %v3447_v36 = vrot.slane %v8031_v44, 1 }
 0x632   : > { %3265 = vst.msk [vmem:[#allocation4 + $0x189] sm:$0xff] %vm462_vm0, %v3193_v4  ;;  %v3546_v45 = vsel %vm1388_vm7, %v3543_v32, %v3545_v53  ;;  %v3441_v11 = vsel %vm1351_vm6, %v3439_v30, %v3440_v24  ;;  %v3443_v16 = vsel %vm1351_vm6, %v3440_v24, %v3442_v48  ;;  %v3548_v32 = vrot.slane %v7858_v42, 2  ;;  %v8064_v2 = vld [vmem:[#allocation4 + $0x140] sm:$0xff]  ;;  %v8069_v24 = vld [vmem:[#allocation4 + $0x148] sm:$0x3]  ;;  %v8075_v30 = vld [vmem:[#allocation4 + $0x138] sm:$0xff] }
 0x633   : > { %3263 = vst.msk [vmem:[#allocation4 + $0x171] sm:$0xff] %vm462_vm0, %v3191_v35  ;;  %v8055_v4 = vpack.c.bf16 %v3546_v45, %v3544_v19  ;;  %v8057_v51 = vpack.c.bf16 %v3443_v16, %v3441_v11  ;;  %v3446_v35 = vsel %vm1351_vm6, %v3444_v8, %v3445_v18  ;;  %v3448_v46 = vsel %vm1351_vm6, %v3445_v18, %v3447_v36  ;;  %v8095_v11 = vld [vmem:[#allocation4 + $0x150] sm:$0xff] }
 0x634   : > { %3716 = vrot.lane.b32.xlu1 %v8012_v22, %s6371_s26  ;;  %v3550_v53 = vrot.slane %v7860_v3, 2  ;;  %v3547_v43 = vrot.slane %v7856_v20, 2  ;;  %v3553_v6 = vrot.slane %v7867_v10, 2  ;;  %v8073_v48 = vpack.c.bf16 %v3448_v46, %v3446_v35  ;;  %v8082_v3 = vld [vmem:[#allocation4 + $0x158] sm:$0xff] }
 0x635   : > { %3764 = vrot.lane.b32.xlu0 %v8020_v58, %s6371_s26  ;;  %8836 = vst [vmem:[#allocation6_spill] sm:$0xff] %v8057_v51  ;;  %v3552_v42 = vrot.slane %v7887_v14, 2  ;;  %v8080_v19 = vpack.c.bf16 %v8064_v2, %v8075_v30  ;;  %v3555_v18 = vrot.slane %v7881_v38, 2  ;;  %v3450_v20 = vrot.slane %v8064_v2, 1  ;;  %v8091_v14 = vld [vmem:[#allocation4 + $0x160] sm:$0x3] }
 0x636   : > { %8837 = vst [vmem:[#allocation7_spill] sm:$0xff] %v8073_v48  ;;  %v3549_v10 = vsel %vm1388_vm7, %v3547_v43, %v3548_v32  ;;  %v3551_v45 = vsel %vm1388_vm7, %v3548_v32, %v3550_v53  ;;  %v3452_v36 = vrot.slane %v8069_v24, 1  ;;  %v3449_v38 = vrot.slane %v8075_v30, 1 }
 0x637   : > { %v8100_v16 = vpack.c.bf16 %v8082_v3, %v8095_v11  ;;  %v3554_v8 = vsel %vm1388_vm7, %v3552_v42, %v3553_v6  ;;  %v3455_v35 = vrot.slane %v8082_v3, 1  ;;  %v8104_v46 = vpack.c.bf16 %v3551_v45, %v3549_v10 }
 0x638   : > { %3766 = vrot.lane.b32.xlu1 %v8040_v13, %s6371_s26  ;;  %v3556_v32 = vsel %vm1388_vm7, %v3553_v6, %v3555_v18  ;;  %v3457_v53 = vrot.slane %v8091_v14, 1  ;;  %v3451_v43 = vsel %vm1351_vm6, %v3449_v38, %v3450_v20  ;;  %v3558_v45 = vrot.slane %v7928_v31, 2  ;;  %v8136_v31 = vld [vmem:[#allocation4 + $0x168] sm:$0xff] }
 0x639   : > { %3800 = vrot.lane.b32.xlu0 %v8044_v21, %s6371_s26  ;;  %8838 = vst [vmem:[#allocation8_spill] sm:$0xff] %v8100_v16  ;;  %v8115_v42 = vpack.c.bf16 %v3556_v32, %v3554_v8  ;;  %v3562_v32 = vrot.slane %v7967_v28, 2  ;;  %v8154_v28 = vld [vmem:[#allocation4 + $0x180] sm:$0xff] }
 0x63a   : > { %v3458_v18 = vsel %vm1351_vm6, %v3455_v35, %v3457_v53  ;;  %v8124_v38 = vld [vmem:[#allocation4 + $0x170] sm:$0xff]  ;;  %v8131_v8 = vld [vmem:[#allocation4 + $0x178] sm:$0x3] }
 0x63c   : > { %3802 = vrot.lane.b32.xlu1 %v8055_v4, %s6371_s26 }
 0x63d   : > { %3718 = vrot.lane.b32.xlu0 %v8057_v51, %s6371_s26  ;;  %v3454_v51 = vrot.slane %v8095_v11, 1 }
 0x63f   : > { %v3456_v6 = vsel %vm1351_vm6, %v3454_v51, %v3455_v35  ;;  %v3557_v51 = vrot.slane %v7942_v5, 2 }
 0x640   : > { %3720 = vrot.lane.b32.xlu1 %v8073_v48, %s6371_s26  ;;  %v3453_v48 = vsel %vm1351_vm6, %v3450_v20, %v3452_v36  ;;  %v3560_v20 = vrot.slane %v7936_v9, 2  ;;  %v3563_v36 = vrot.slane %v7948_v49, 2  ;;  %v8134_v35 = vpack.c.bf16 %v3458_v18, %v3456_v6  ;;  %v8143_v49 = vld [vmem:[#allocation4 + $0x188] sm:$0xff] }
 0x641   : > { %3768 = vrot.lane.b32.xlu0 %v8080_v19, %s6371_s26  ;;  %v8117_v10 = vpack.c.bf16 %v3453_v48, %v3451_v43  ;;  %v3565_v48 = vrot.slane %v7958_v40, 2  ;;  %v8141_v9 = vpack.c.bf16 %v8124_v38, %v8136_v31  ;;  %v3460_v40 = vrot.slane %v8124_v38, 1 }
 0x642   : > { %8840 = vst [vmem:[#allocation10_spill] sm:$0xff] %v8134_v35  ;;  %v3559_v53 = vsel %vm1388_vm7, %v3557_v51, %v3558_v45  ;;  %v3561_v5 = vsel %vm1388_vm7, %v3558_v45, %v3560_v20  ;;  %v3462_v43 = vrot.slane %v8131_v8, 1  ;;  %v3573_v6 = vrot.slane %v8022_v62, 2 }
 0x643   : > { %8839 = vst [vmem:[#allocation9_spill] sm:$0xff] %v8117_v10  ;;  %8841 = vst [vmem:[#allocation11_spill] sm:$0xff] %v8141_v9  ;;  %v3564_v18 = vsel %vm1388_vm7, %v3562_v32, %v3563_v36  ;;  %v8162_v45 = vpack.c.bf16 %v8143_v49, %v8154_v28  ;;  %v3575_v20 = vrot.slane %v8031_v44, 2  ;;  %v3572_v62 = vrot.slane %v8035_v60, 2 }
 0x644   : > { %3770 = vrot.lane.b32.xlu1 %v8100_v16, %s6371_s26  ;;  %v3459_v16 = vrot.slane %v8136_v31, 1  ;;  %v8166_v51 = vpack.c.bf16 %v3561_v5, %v3559_v53  ;;  %v3567_v32 = vrot.slane %v8014_v52, 2  ;;  %v3578_v60 = vrot.slane %v8064_v2, 2  ;;  %v3316_v2 = vld [vmem:[#allocation4 + $0x190] sm:$0x3] }
 0x645   : > { %3804 = vrot.lane.b32.xlu0 %v8104_v46, %s6371_s26  ;;  %v3574_v44 = vsel %vm1388_vm7, %v3572_v62, %v3573_v6  ;;  %v3576_v52 = vsel %vm1388_vm7, %v3573_v6, %v3575_v20  ;;  %v3590_v62 = vrot.slane %v8131_v8, 2 }
 0x648   : > { %3806 = vrot.lane.b32.xlu1 %v8115_v42, %s6371_s26 }
 0x649   : > { %3722 = vrot.lane.b32.xlu0 %v8117_v10, %s6371_s26  ;;  %v3566_v10 = vsel %vm1388_vm7, %v3563_v36, %v3565_v48  ;;  %v3463_v36 = vsel %vm1351_vm6, %v3460_v40, %v3462_v43  ;;  %v3580_v43 = vrot.slane %v8069_v24, 2  ;;  %v8200_v24 = vld [vmem:[#allocation4 + $0x198] sm:$0xff] }
 0x64a   : > { %v8176_v48 = vpack.c.bf16 %v3566_v10, %v3564_v18  ;;  %v3577_v10 = vrot.slane %v8075_v30, 2  ;;  %v3582_v18 = vrot.slane %v8095_v11, 2  ;;  %v8202_v30 = vld [vmem:[#allocation4 + $0x1a0] sm:$0xff]  ;;  %v3588_v11 = vrot.slane %v8124_v38, 2 }
 0x64b   : > { %v3581_v20 = vsel %vm1388_vm7, %v3578_v60, %v3580_v43  ;;  %v3664_v38 = vrot.slane %v8200_v24, 1  ;;  %v3655_v43 = vrot.slane %v3316_v2, 2 }
 0x64c   : > { %3724 = vrot.lane.b32.xlu1 %v8134_v35, %s6371_s26  ;;  %v3568_v35 = vrot.slane %v8001_v39, 2  ;;  %v3461_v39 = vsel %vm1351_vm6, %v3459_v16, %v3460_v40  ;;  %v3585_v40 = vrot.slane %v8091_v14, 2  ;;  %v3579_v14 = vsel %vm1388_vm7, %v3577_v10, %v3578_v60 }
 0x64d   : > { %3772 = vrot.lane.b32.xlu0 %v8141_v9, %s6371_s26  ;;  %v3570_v9 = vrot.slane %v8007_v33, 2  ;;  %v3583_v33 = vrot.slane %v8082_v3, 2  ;;  %v8183_v5 = vpack.c.bf16 %v3463_v36, %v3461_v39  ;;  %v8194_v3 = vpack.c.bf16 %v3576_v52, %v3574_v44 }
 0x64e   : > { %v3569_v53 = vsel %vm1388_vm7, %v3567_v32, %v3568_v35  ;;  %v8208_v32 = vld [vmem:[#allocation4 + $0x1a8] sm:$0x3]  ;;  %v3645_v39 = vrot.slane %v8143_v49, 1  ;;  %v3647_v36 = vrot.slane %v3316_v2, 1  ;;  %v3587_v44 = vrot.slane %v8136_v31, 2 }
 0x64f   : > { %v3571_v16 = vsel %vm1388_vm7, %v3568_v35, %v3570_v9  ;;  %v3584_v35 = vsel %vm1388_vm7, %v3582_v18, %v3583_v33  ;;  %v3586_v9 = vsel %vm1388_vm7, %v3583_v33, %v3585_v40  ;;  %v3665_v33 = vrot.slane %v8202_v30, 1 }
 0x650   : > { %3774 = vrot.lane.b32.xlu1 %v8162_v45, %s6371_s26  ;;  %v8196_v6 = vpack.c.bf16 %v3571_v16, %v3569_v53  ;;  %v3644_v60 = vrot.slane %v8154_v28, 1  ;;  %v8219_v8 = vpack.c.bf16 %v3586_v9, %v3584_v35  ;;  %v8221_v52 = vpack.c.bf16 %v3581_v20, %v3579_v14 }
 0x651   : > { %3808 = vrot.lane.b32.xlu0 %v8166_v51, %s6371_s26  ;;  %v3667_v53 = vrot.slane %v8208_v32, 1  ;;  %v3653_v16 = vrot.slane %v8143_v49, 2  ;;  %v3589_v40 = vsel %vm1388_vm7, %v3587_v44, %v3588_v11  ;;  %v3591_v31 = vsel %vm1388_vm7, %v3588_v11, %v3590_v62  ;;  %v6359_v44 = vld [vmem:[#allocation4] sm:$0xff] }
 0x652   : > { %v3646_v10 = vsel %vm1351_vm6, %v3644_v60, %v3645_v39  ;;  %v3648_v18 = vsel %vm1351_vm6, %v3645_v39, %v3647_v36  ;;  %v3652_v35 = vrot.slane %v8154_v28, 2  ;;  %v8234_v14 = vpack.c.bf16 %v3591_v31, %v3589_v40  ;;  %v6358_v39 = vld [vmem:[#allocation4 + $0x10] sm:$0x3]  ;;  %v3697_v31 = vpop.permute.xlu1 %3696 }
 0x653   : > { %v3666_v49 = vsel %vm1351_vm6, %v3664_v38, %v3665_v33  ;;  %v3668_v9 = vsel %vm1351_vm6, %v3665_v33, %v3667_v53  ;;  %v8238_v11 = vpack.c.bf16 %v3648_v18, %v3646_v10  ;;  %v3656_v20 = vsel %vm1388_vm7, %v3653_v16, %v3655_v43  ;;  %v6360_v33 = vld [vmem:[#allocation4 + $0x8] sm:$0xff] }
 0x654   : > { %3810 = vrot.lane.b32.xlu1 %v8176_v48, %s6371_s26  ;;  %v3654_v2 = vsel %vm1388_vm7, %v3652_v35, %v3653_v16  ;;  %v3671_v28 = vpack.c.bf16 %v3668_v9, %v3666_v49  ;;  %v3515_v36 = vrot.slane %v6358_v39, 2  ;;  %v3512_v38 = vrot.slane %v6359_v44, 2  ;;  %v6355_v49 = vld [vmem:[%s8775_s4 + $0x408] sm:$0xff]  }
 0x655   : > { %3726 = vrot.lane.b32.xlu0 %v8183_v5, %s6371_s26  ;;  %v8246_v62 = vpack.c.bf16 %v3656_v20, %v3654_v2  ;;  %v3513_v60 = vrot.slane %v6360_v33, 2  ;;  %v3320_v40 = vpack.c.bf16 %v6360_v33, %v6359_v44 }
 0x657   : > { %v3514_v53 = vsel %vm1388_vm7, %v3512_v38, %v3513_v60  ;;  %v3516_v16 = vsel %vm1388_vm7, %v3513_v60, %v3515_v36  ;;  %v3832_v10 = vsel %vm462_vm0, %v3320_v40, %v3697_v31  ;;  %v6357_v38 = vld [vmem:[%s8775_s4 + $0x418] sm:$0xff]  }
 0x658   : > { %3814 = vrot.lane.b32.xlu1 %v8194_v3, %s6371_s26  ;;  %v3624_v43 = vpack.c.bf16 %v3516_v16, %v3514_v53 }
 0x659   : > { %3812 = vrot.lane.b32.xlu0 %v8196_v6, %s6371_s26 }
 0x65c   : > { %3818 = vrot.lane.b32.xlu1 %v8219_v8, %s6371_s26 }
 0x65d   : > { %3816 = vrot.lane.b32.xlu0 %v8221_v52, %s6371_s26 }
 0x660   : > { %3820 = vrot.lane.b32.xlu1 %v8234_v14, %s6371_s26 }
 0x661   : > { %3826 = vrot.lane.b32.xlu0 %v8238_v11, %s6371_s26 }
 0x664   : > { %3822 = vrot.lane.b32.xlu1 %v8246_v62, %s6371_s26 }
 0x665   : > { %3828 = vrot.lane.b32.xlu0 %v3671_v28, %s6371_s26  ;;  %v6356_v28 = vld [vmem:[%s8775_s4 + $0x410] sm:$0xff]  }
 0x677   : > { %v3745_v18 = vpop.permute.xlu0 %3744 }
 0x678   : > { %v3896_v35 = vsel %vm462_vm0, %v3624_v43, %v3745_v18 }
 0x679   : > { %4389 = vmatprep.mubr.bf16.mxu0 %v3896_v35 }
 0x67a   : > { %v3699_v9 = vpop.permute.xlu1 %3698  ;;  %4390 = vmatmul.mubr.bf16.vlgmr.msra.gmra.mrb[76].mxu0 %v3832_v10 }
 0x67b   : > { %v3747_v2 = vpop.permute.xlu0 %3746  ;;  %6121 = vmatpush3.bf16.msra.mxu0 %v7875_v59 }
 0x67c   : > { %v3900_v20 = vsel %vm462_vm0, %v7895_v1, %v3747_v2  ;;  %6122 = vmatprep.subr.bf16.mxu0 %v6355_v49  ;;  %v3836_v1 = vsel %vm462_vm0, %v7684_v17, %v3699_v9 }
 0x67d   : > { %4397 = vmatprep.mubr.bf16.mxu0 %v3900_v20 }
 0x67e   : > { %v3701_v39 = vpop.permute.xlu1 %3700 }
 0x67f   : > { %v3749_v36 = vpop.permute.xlu0 %3748  ;;  %v3840_v44 = vsel %vm462_vm0, %v7704_v29, %v3701_v39  ;;  %6123 = vmatpush3.bf16.msra.mxu0 %v6355_v49 }
 0x680   : > { %4550 = vmatprep.mubr.bf16.mxu1 %v3840_v44  ;;  %6124 = vmatprep.subr.bf16.mxu0 %v6356_v28  ;;  %v3904_v60 = vsel %vm462_vm0, %v7918_v50, %v3749_v36 }
 0x682   : > { %v3703_v33 = vpop.permute.xlu1 %3702  ;;  %4398 = vmatmul.mubr.bf16.gmra.mrb[80].mxu0 %v3836_v1 }
 0x683   : > { %v3751_v53 = vpop.permute.xlu0 %3750  ;;  %4405 = vmatprep.mubr.bf16.mxu0 %v3904_v60  ;;  %6125 = vmatpush3.bf16.msra.mxu0 %v6356_v28  ;;  %v3844_v18 = vsel %vm462_vm0, %v7748_v12, %v3703_v33 }
 0x684   : > { %6126 = vmatprep.subr.bf16.mxu0 %v6357_v38  ;;  %v3908_v31 = vsel %vm462_vm0, %v7980_v61, %v3751_v53 }
 0x686   : > { %v3705_v29 = vpop.permute.xlu1 %3704 }
 0x687   : > { %v3753_v16 = vpop.permute.xlu0 %3752  ;;  %6127 = vmatpush3.bf16.msra.mxu0 %v6357_v38  ;;  %v3848_v12 = vsel %vm462_vm0, %v7770_v0, %v3705_v29 }
 0x688   : > { %v3912_v9 = vsel %vm462_vm0, %v7991_v56, %v3753_v16 }
 0x68a   : > { %v3707_v40 = vpop.permute.xlu1 %3706  ;;  %4406 = vmatmul.mubr.bf16.gmra.mrb[84].mxu0 %v3840_v44 }
 0x68b   : > { %v3755_v43 = vpop.permute.xlu0 %3754  ;;  %4413 = vmatprep.mubr.bf16.mxu0 %v3908_v31  ;;  %v3852_v0 = vsel %vm462_vm0, %v7814_v27, %v3707_v40 }
 0x68c   : > { %v3916_v1 = vsel %vm462_vm0, %v8044_v21, %v3755_v43 }
 0x68e   : > { %v3709_v17 = vpop.permute.xlu1 %3708 }
 0x68f   : > { %v3757_v10 = vpop.permute.xlu0 %3756  ;;  %v3856_v31 = vsel %vm462_vm0, %v7832_v47, %v3709_v17 }
 0x690   : > { %v3920_v53 = vsel %vm462_vm0, %v8055_v4, %v3757_v10 }
 0x692   : > { %v3759_v35 = vpop.permute.xlu1 %3758  ;;  %4414 = vmatmul.mubr.bf16.gmra.mrb[88].mxu0 %v3844_v18 }
 0x693   : > { %v3793_v2 = vpop.permute.xlu0 %3792  ;;  %4421 = vmatprep.mubr.bf16.mxu0 %v3912_v9  ;;  %v3924_v27 = vsel %vm462_vm0, %v8104_v46, %v3759_v35 }
 0x694   : > { %v3960_v20 = vsel %vm462_vm0, %v7700_v23, %v3793_v2 }
 0x695   : > { %4551 = vmatmul.mubr.bf16.vlgmr.msra.gmra.mrb[96].mxu1 %v3960_v20 }
 0x696   : > { %v3795_v39 = vpop.permute.xlu1 %3794  ;;  %4558 = vmatprep.mubr.bf16.mxu1 %v3844_v18  ;;  %6164 = vmatpush3.bf16.msra.mxu1 %v7875_v59 }
 0x697   : > { %v3711_v36 = vpop.permute.xlu0 %3710  ;;  %6161 = vmatprep.subr.bf16.mxu1 %v6355_v49  ;;  %v3964_v23 = vsel %vm462_vm0, %v7735_v57, %v3795_v39 }
 0x69a   : > { %v3713_v44 = vpop.permute.xlu1 %3712  ;;  %4422 = vmatmul.mubr.bf16.gmra.mrb[92].mxu0 %v3848_v12  ;;  %6165 = vmatpush3.bf16.msra.mxu1 %v6355_v49 }
 0x69b   : > { %v3761_v33 = vpop.permute.xlu0 %3760  ;;  %4429 = vmatprep.mubr.bf16.mxu0 %v3916_v1  ;;  %6162 = vmatprep.subr.bf16.mxu1 %v6356_v28  ;;  %v3864_v35 = vsel %vm462_vm0, %v7893_v37, %v3713_v44 }
 0x69c   : > { %v3928_v10 = vsel %vm462_vm0, %v8115_v42, %v3761_v33  ;;  %v8842_v33 = vld [vmem:[#allocation5_spill] sm:$0xff] }
 0x69d   : > { %4559 = vmatmul.mubr.bf16.gmra.mrb[100].mxu1 %v3964_v23 }
 0x69e   : > { %v3763_v60 = vpop.permute.xlu1 %3762  ;;  %4566 = vmatprep.mubr.bf16.mxu1 %v3848_v12  ;;  %6166 = vmatpush3.bf16.msra.mxu1 %v6356_v28 }
 0x69f   : > { %v3797_v59 = vpop.permute.xlu0 %3796  ;;  %6163 = vmatprep.subr.bf16.mxu1 %v6357_v38 }
 0x6a0   : > { %v3968_v57 = vsel %vm462_vm0, %v7766_v26, %v3797_v59  ;;  %v3860_v26 = vsel %vm462_vm0, %v7865_v7, %v3711_v36  ;;  %v3932_v7 = vsel %vm462_vm0, %v8166_v51, %v3763_v60 }
 0x6a2   : > { %4430 = vmatmul.mubr.bf16.gmra.mrb[96].mxu0 %v3852_v0  ;;  %6167 = vmatpush3.bf16.msra.mxu1 %v6357_v38  ;;  %v3799_v49 = vpop.permute.xlu1 %3798 }
 0x6a3   : > { %v3715_v29 = vpop.permute.xlu0 %3714  ;;  %4437 = vmatprep.mubr.bf16.mxu0 %v3920_v53  ;;  %v3972_v38 = vsel %vm462_vm0, %v7801_v55, %v3799_v49 }
 0x6a4   : > { %v3868_v39 = vsel %vm462_vm0, %v7946_v54, %v3715_v29 }
 0x6a5   : > { %4567 = vmatmul.mubr.bf16.gmra.mrb[104].mxu1 %v3968_v57 }
 0x6a6   : > { %4574 = vmatprep.mubr.bf16.mxu1 %v3852_v0  ;;  %v3717_v28 = vpop.permute.xlu1 %3716 }
 0x6a7   : > { %v3765_v16 = vpop.permute.xlu0 %3764 }
 0x6a8   : > { %v3936_v37 = vsel %vm462_vm0, %v8176_v48, %v3765_v16 }
 0x6aa   : > { %4438 = vmatmul.mubr.bf16.gmra.mrb[100].mxu0 %v3856_v31  ;;  %v3767_v43 = vpop.permute.xlu1 %3766 }
 0x6ab   : > { %4445 = vmatprep.mubr.bf16.mxu0 %v3924_v27  ;;  %v3801_v40 = vpop.permute.xlu0 %3800  ;;  %v3940_v1 = vsel %vm462_vm0, %v8196_v6, %v3767_v43 }
 0x6ac   : > { %v3976_v17 = vsel %vm462_vm0, %v7827_v25, %v3801_v40  ;;  %v8844_v40 = vld [vmem:[#allocation8_spill] sm:$0xff] }
 0x6ad   : > { %4575 = vmatmul.mubr.bf16.gmra.mrb[108].mxu1 %v3972_v38 }
 0x6ae   : > { %4582 = vmatprep.mubr.bf16.mxu1 %v3856_v31  ;;  %v3803_v18 = vpop.permute.xlu1 %3802 }
 0x6af   : > { %v3719_v47 = vpop.permute.xlu0 %3718  ;;  %v3980_v2 = vsel %vm462_vm0, %v7854_v34, %v3803_v18  ;;  %v3872_v34 = vsel %vm462_vm0, %v7975_v41, %v3717_v28  ;;  %v8847_v18 = vld [vmem:[#allocation9_spill] sm:$0xff] }
 0x6b0   : > { %v3876_v59 = vsel %vm462_vm0, %v8020_v58, %v3719_v47  ;;  %v8846_v47 = vld [vmem:[#allocation11_spill] sm:$0xff] }
 0x6b2   : > { %4446 = vmatmul.mubr.bf16.gmra.mrb[104].mxu0 %v3860_v26  ;;  %v3721_v9 = vpop.permute.xlu1 %3720 }
 0x6b3   : > { %4453 = vmatprep.mubr.bf16.mxu0 %v3928_v10  ;;  %v3769_v55 = vpop.permute.xlu0 %3768  ;;  %v3880_v29 = vsel %vm462_vm0, %v8040_v13, %v3721_v9  ;;  %v8843_v13 = vld [vmem:[#allocation6_spill] sm:$0xff] }
 0x6b4   : > { %v3944_v41 = vsel %vm462_vm0, %v8194_v3, %v3769_v55  ;;  %v8848_v9 = vld [vmem:[#allocation10_spill] sm:$0xff] }
 0x6b5   : > { %4583 = vmatmul.mubr.bf16.gmra.mrb[112].mxu1 %v3976_v17 }
 0x6b6   : > { %4590 = vmatprep.mubr.bf16.mxu1 %v3860_v26  ;;  %v3771_v25 = vpop.permute.xlu1 %3770 }
 0x6b7   : > { %v3805_v20 = vpop.permute.xlu0 %3804  ;;  %v3948_v57 = vsel %vm462_vm0, %v8221_v52, %v3771_v25 }
 0x6b8   : > { %v3984_v36 = vsel %vm462_vm0, %v7922_v63, %v3805_v20  ;;  %v3660_v20 = vpack.c.bf16 %v8202_v30, %v8200_v24 }
 0x6ba   : > { %4454 = vmatmul.mubr.bf16.gmra.mrb[108].mxu0 %v3864_v35  ;;  %v3807_v44 = vpop.permute.xlu1 %3806 }
 0x6bb   : > { %4461 = vmatprep.mubr.bf16.mxu0 %v3932_v7  ;;  %v3723_v12 = vpop.permute.xlu0 %3722  ;;  %v3988_v23 = vsel %vm462_vm0, %v8842_v33, %v3807_v44 }
 0x6bd   : > { %4591 = vmatmul.mubr.bf16.gmra.mrb[116].mxu1 %v3980_v2 }
 0x6be   : > { %4598 = vmatprep.mubr.bf16.mxu1 %v3864_v35  ;;  %v3725_v60 = vpop.permute.xlu1 %3724 }
 0x6bf   : > { %v3773_v54 = vpop.permute.xlu0 %3772 }
 0x6c0   : > { %v3952_v31 = vsel %vm462_vm0, %v8219_v8, %v3773_v54 }
 0x6c2   : > { %4462 = vmatmul.mubr.bf16.gmra.mrb[112].mxu0 %v3868_v39  ;;  %v3775_v0 = vpop.permute.xlu1 %3774 }
 0x6c3   : > { %4469 = vmatprep.mubr.bf16.mxu0 %v3936_v37  ;;  %v3809_v63 = vpop.permute.xlu0 %3808  ;;  %v3956_v43 = vsel %vm462_vm0, %v8234_v14, %v3775_v0  ;;  %v3672_v37 = vrot.slane %v8200_v24, 2 }
 0x6c4   : > { %v3992_v53 = vsel %vm462_vm0, %v7993_v15, %v3809_v63  ;;  %v3884_v15 = vsel %vm462_vm0, %v8080_v19, %v3723_v12  ;;  %v8845_v19 = vld [vmem:[#allocation7_spill] sm:$0xff]  ;;  %v3675_v12 = vrot.slane %v8208_v32, 2 }
 0x6c5   : > { %4599 = vmatmul.mubr.bf16.gmra.mrb[120].mxu1 %v3984_v36  ;;  %v3673_v36 = vrot.slane %v8202_v30, 2  ;;  %v8402_v63 = vld [vmem:[%s8776_s5 + $0x6] ss:$0 sm:$0xff] }
 0x6c6   : > { %4606 = vmatprep.mubr.bf16.mxu1 %v3868_v39  ;;  %v3811_v49 = vpop.permute.xlu1 %3810 }
 0x6c7   : > { %v3727_v58 = vpop.permute.xlu0 %3726  ;;  %v3996_v16 = vsel %vm462_vm0, %v8012_v22, %v3811_v49  ;;  %v3888_v22 = vsel %vm462_vm0, %v8844_v40, %v3725_v60 }
 0x6c8   : > { %v3892_v17 = vsel %vm462_vm0, %v8846_v47, %v3727_v58 }
 0x6ca   : > { %4470 = vmatmul.mubr.bf16.gmra.mrb[116].mxu0 %v3872_v34  ;;  %v3815_v38 = vpop.permute.xlu1 %3814 }
 0x6cb   : > { %4477 = vmatprep.mubr.bf16.mxu0 %v3940_v1  ;;  %v3813_v28 = vpop.permute.xlu0 %3812  ;;  %v4004_v26 = vsel %vm462_vm0, %v8845_v19, %v3815_v38 }
 0x6cc   : > { %v4000_v27 = vsel %vm462_vm0, %v8843_v13, %v3813_v28 }
 0x6cd   : > { %4607 = vmatmul.mubr.bf16.gmra.mrb[124].mxu1 %v3988_v23 }
 0x6ce   : > { %4614 = vmatprep.mubr.bf16.mxu1 %v3872_v34  ;;  %v3819_v35 = vpop.permute.xlu1 %3818 }
 0x6cf   : > { %v3817_v10 = vpop.permute.xlu0 %3816  ;;  %v4012_v2 = vsel %vm462_vm0, %v8848_v9, %v3819_v35 }
 0x6d0   : > { %v4008_v55 = vsel %vm462_vm0, %v8847_v18, %v3817_v10 }
 0x6d2   : > { %4478 = vmatmul.mubr.bf16.gmra.mrb[120].mxu0 %v3876_v59  ;;  %v3821_v39 = vpop.permute.xlu1 %3820 }
 0x6d3   : > { %4485 = vmatprep.mubr.bf16.mxu0 %v3944_v41  ;;  %v3827_v7 = vpop.permute.xlu0 %3826 }
 0x6d5   : > { %4615 = vmatmul.mubr.bf16.gmra.mrb[128].mxu1 %v3992_v53 }
 0x6d6   : > { %4622 = vmatprep.mubr.bf16.mxu1 %v3876_v59 }
 0x6d7   : > { %v3829_v25 = vpop.permute.xlu0 %3828 }
 0x6da   : > { %4486 = vmatmul.mubr.bf16.gmra.mrb[124].mxu0 %v3880_v29 }
 0x6db   : > { %4493 = vmatprep.mubr.bf16.mxu0 %v3948_v57 }
 0x6dd   : > { %4623 = vmatmul.mubr.bf16.gmra.mrb[132].mxu1 %v3996_v16 }
 0x6de   : > { %4630 = vmatprep.mubr.bf16.mxu1 %v3880_v29 }
 0x6e2   : > { %4494 = vmatmul.mubr.bf16.gmra.mrb[128].mxu0 %v3884_v15 }
 0x6e3   : > { %4501 = vmatprep.mubr.bf16.mxu0 %v3952_v31 }
 0x6e5   : > { %4631 = vmatmul.mubr.bf16.gmra.mrb[136].mxu1 %v4000_v27 }
 0x6e6   : > { %4638 = vmatprep.mubr.bf16.mxu1 %v3884_v15 }
 0x6ea   : > { %4502 = vmatmul.mubr.bf16.gmra.mrb[132].mxu0 %v3888_v22 }
 0x6eb   : > { %4509 = vmatprep.mubr.bf16.mxu0 %v3956_v43 }
 0x6ed   : > { %4639 = vmatmul.mubr.bf16.gmra.mrb[140].mxu1 %v4004_v26 }
 0x6ee   : > { %4646 = vmatprep.mubr.bf16.mxu1 %v3888_v22 }
 0x6f2   : > { %4510 = vmatmul.mubr.bf16.gmra.mrb[136].mxu0 %v3892_v17 }
 0x6f3   : > { %6128 = vmatprep.mubr.msk.bf16.mxu0 %vm462_vm0, %v7918_v50  ;;  %v4024_v50 = vsel %vm462_vm0, %v8162_v45, %v3827_v7  ;;  %v3823_v45 = vpop.permute.xlu1 %3822 }
 0x6f5   : > { %4647 = vmatmul.mubr.bf16.gmra.mrb[144].mxu1 %v4008_v55 }
 0x6f6   : > { %4654 = vmatprep.mubr.bf16.mxu1 %v3892_v17 }
 0x6fa   : > { %6129 = vmatmul.mubr.msk.bf16.vlgmr.msra.gmra.mrb[140].mxu0 %vm462_vm0, %v7980_v61  ;;  %v4028_v61 = vsel %vm462_vm0, %v3660_v20, %v3829_v25 }
 0x6fb   : > { %6132 = vmatprep.mubr.msk.bf16.mxu0 %vm462_vm0, %v7991_v56  ;;  %v4016_v56 = vsel %vm462_vm0, %v8183_v5, %v3821_v39  ;;  %v3676_v5 = vsel %vm1388_vm7, %v3673_v36, %v3675_v12 }
 0x6fd   : > { %4655 = vmatmul.mubr.bf16.gmra.mrb[148].mxu1 %v4012_v2 }
 0x6fe   : > { %4662 = vmatprep.mubr.bf16.mxu1 %v4024_v50 }
 0x702   : > { %6133 = vmatmul.mubr.msk.bf16.gmra.mrb[144].mxu0 %vm462_vm0, %v8044_v21  ;;  %v4020_v21 = vsel %vm462_vm0, %v8238_v11, %v3823_v45 }
 0x703   : > { %6136 = vmatprep.mubr.msk.bf16.mxu0 %vm462_vm0, %v8055_v4  ;;  %v3674_v4 = vsel %vm1388_vm7, %v3672_v37, %v3673_v36 }
 0x704   : > { %v3679_v24 = vpack.c.bf16 %v3676_v5, %v3674_v4 }
 0x705   : > { %4663 = vmatmul.mubr.bf16.gmra.mrb[152].mxu1 %v4016_v56 }
 0x706   : > { %4670 = vmatprep.mubr.bf16.mxu1 %v4028_v61 }
 0x70a   : > { %6137 = vmatmul.mubr.msk.bf16.gmra.mrb[148].mxu0 %vm462_vm0, %v8104_v46 }
 0x70b   : > { %6140 = vmatprep.mubr.msk.bf16.mxu0 %vm462_vm0, %v8115_v42 }
 0x70d   : > { %4671 = vmatmul.mubr.bf16.gmra.mrb[156].mxu1 %v4020_v21 }
 0x70e   : > { %6156 = vmatprep.mubr.msk.bf16.mxu1 %vm462_vm0, %v8246_v62 }
 0x712   : > { %6141 = vmatmul.mubr.msk.bf16.gmra.mrb[152].mxu0 %vm462_vm0, %v8166_v51 }
 0x713   : > { %6144 = vmatprep.mubr.msk.bf16.mxu0 %vm462_vm0, %v8176_v48 }
 0x715   : > { %6157 = vmatmul.mubr.msk.bf16.vlgmr.msra.gmra.mrb[160].mxu1 %vm462_vm0, %v3679_v24 }
 0x71a   : > { %6145 = vmatmul.mubr.msk.bf16.gmra.mrb[156].mxu0 %vm462_vm0, %v8196_v6 }
 0x71b   : > { %6148 = vmatprep.mubr.msk.bf16.mxu0 %vm462_vm0, %v8194_v3 }
 0x722   : > { %6149 = vmatmul.mubr.msk.bf16.gmra.mrb[160].mxu0 %vm462_vm0, %v8221_v52 }
 0x723   : > { %6152 = vmatprep.mubr.msk.bf16.mxu0 %vm462_vm0, %v8219_v8 }
 0x72a   : > { %6153 = vmatmul.mubr.msk.bf16.gmra.mrb[164].mxu0 %vm462_vm0, %v8234_v14 }
 0x74d   : > { %v5732_v46 = vpop.f32.mrb[76].mxu0 }
 0x74e   : > { %v5733_v42 = vpop.f32.mrb[77].mxu0 }
 0x74f   : > { %v5734_v51 = vadd.f32 %v5733_v42, %v5732_v46  ;;  %v5735_v48 = vpop.f32.mrb[78].mxu0 }
 0x750   : > { %v5736_v30 = vpop.f32.mrb[79].mxu0 }
 0x751   : > { %v5737_v32 = vadd.f32 %v5736_v30, %v5735_v48  ;;  %v4392_v57 = vadd.f32 %v5734_v51, %v8402_v63 }
 0x753   : > { %v4395_v15 = vadd.f32 %v5737_v32, %v8402_v63 }
 0x755   : > { %v5738_v11 = vpop.f32.mrb[80].mxu0 }
 0x756   : > { %v5739_v6 = vpop.f32.mrb[81].mxu0 }
 0x757   : > { %v5740_v62 = vadd.f32 %v5739_v6, %v5738_v11  ;;  %v5741_v44 = vpop.f32.mrb[82].mxu0 }
 0x758   : > { %v5742_v3 = vpop.f32.mrb[83].mxu0 }
 0x759   : > { %v5743_v34 = vadd.f32 %v5742_v3, %v5741_v44  ;;  %v4400_v17 = vadd.f32 %v5740_v62, %v8402_v63 }
 0x75b   : > { %v4403_v7 = vadd.f32 %v5743_v34, %v8402_v63 }
 0x75d   : > { %v5744_v1 = vpop.f32.mrb[84].mxu0 }
 0x75e   : > { %v5745_v52 = vpop.f32.mrb[85].mxu0 }
 0x75f   : > { %v5746_v54 = vadd.f32 %v5745_v52, %v5744_v1  ;;  %v5747_v33 = vpop.f32.mrb[86].mxu0 }
 0x760   : > { %v5748_v8 = vpop.f32.mrb[87].mxu0 }
 0x761   : > { %v5749_v23 = vadd.f32 %v5748_v8, %v5747_v33  ;;  %v4408_v12 = vadd.f32 %v5746_v54, %v8402_v63 }
 0x763   : > { %v4411_v24 = vadd.f32 %v5749_v23, %v8402_v63 }
 0x765   : > { %v5750_v60 = vpop.f32.mrb[88].mxu0 }
 0x766   : > { %v5751_v14 = vpop.f32.mrb[89].mxu0 }
 0x767   : > { %v5752_v59 = vadd.f32 %v5751_v14, %v5750_v60  ;;  %v5753_v41 = vpop.f32.mrb[90].mxu0 }
 0x768   : > { %v5754_v0 = vpop.f32.mrb[91].mxu0  ;;  %v5844_v53 = vpop.f32.mrb[96].mxu1 }
 0x769   : > { %v5755_v49 = vadd.f32 %v5754_v0, %v5753_v41  ;;  %v5845_v29 = vpop.f32.mrb[97].mxu1  ;;  %v4416_v34 = vadd.f32 %v5752_v59, %v8402_v63 }
 0x76a   : > { %v5846_v58 = vadd.f32 %v5845_v29, %v5844_v53  ;;  %v5847_v16 = vpop.f32.mrb[98].mxu1 }
 0x76b   : > { %v5848_v28 = vpop.f32.mrb[99].mxu1  ;;  %v4419_v33 = vadd.f32 %v5755_v49, %v8402_v63 }
 0x76c   : > { %v5849_v31 = vadd.f32 %v5848_v28, %v5847_v16  ;;  %v8406_v13 = vadd.f32 %v5846_v58, %v4392_v57 }
 0x76d   : > { %v5756_v27 = vpop.f32.mrb[92].mxu0 }
 0x76e   : > { %v5757_v38 = vpop.f32.mrb[93].mxu0  ;;  %v8408_v40 = vadd.f32 %v5849_v31, %v4395_v15 }
 0x76f   : > { %v5758_v22 = vadd.f32 %v5757_v38, %v5756_v27  ;;  %v5759_v43 = vpop.f32.mrb[94].mxu0 }
 0x770   : > { %v5760_v19 = vpop.f32.mrb[95].mxu0  ;;  %v5850_v26 = vpop.f32.mrb[100].mxu1 }
 0x771   : > { %v5761_v10 = vadd.f32 %v5760_v19, %v5759_v43  ;;  %v5851_v47 = vpop.f32.mrb[101].mxu1  ;;  %v4424_v59 = vadd.f32 %v5758_v22, %v8402_v63 }
 0x772   : > { %v5852_v18 = vadd.f32 %v5851_v47, %v5850_v26  ;;  %v5853_v55 = vpop.f32.mrb[102].mxu1 }
 0x773   : > { %v5854_v35 = vpop.f32.mrb[103].mxu1  ;;  %v4427_v49 = vadd.f32 %v5761_v10, %v8402_v63 }
 0x774   : > { %v5855_v9 = vadd.f32 %v5854_v35, %v5853_v55  ;;  %v8412_v2 = vadd.f32 %v5852_v18, %v4400_v17 }
 0x775   : > { %v5762_v50 = vpop.f32.mrb[96].mxu0 }
 0x776   : > { %v5763_v20 = vpop.f32.mrb[97].mxu0  ;;  %v8414_v25 = vadd.f32 %v5855_v9, %v4403_v7 }
 0x777   : > { %v5764_v39 = vadd.f32 %v5763_v20, %v5762_v50  ;;  %v5765_v61 = vpop.f32.mrb[98].mxu0 }
 0x778   : > { %v5766_v56 = vpop.f32.mrb[99].mxu0  ;;  %v5856_v45 = vpop.f32.mrb[104].mxu1 }
 0x779   : > { %v5767_v37 = vadd.f32 %v5766_v56, %v5765_v61  ;;  %v5857_v36 = vpop.f32.mrb[105].mxu1  ;;  %v4432_v22 = vadd.f32 %v5764_v39, %v8402_v63 }
 0x77a   : > { %v5858_v21 = vadd.f32 %v5857_v36, %v5856_v45  ;;  %v5859_v4 = vpop.f32.mrb[106].mxu1 }
 0x77b   : > { %v5860_v5 = vpop.f32.mrb[107].mxu1  ;;  %v4435_v10 = vadd.f32 %v5767_v37, %v8402_v63 }
 0x77c   : > { %v5861_v46 = vadd.f32 %v5860_v5, %v5859_v4  ;;  %v8418_v42 = vadd.f32 %v5858_v21, %v4408_v12 }
 0x77d   : > { %v5768_v51 = vpop.f32.mrb[100].mxu0 }
 0x77e   : > { %v5769_v48 = vpop.f32.mrb[101].mxu0  ;;  %v8420_v30 = vadd.f32 %v5861_v46, %v4411_v24 }
 0x77f   : > { %v5770_v32 = vadd.f32 %v5769_v48, %v5768_v51  ;;  %v5771_v11 = vpop.f32.mrb[102].mxu0 }
 0x780   : > { %v5772_v6 = vpop.f32.mrb[103].mxu0  ;;  %v5862_v62 = vpop.f32.mrb[108].mxu1 }
 0x781   : > { %v5773_v44 = vadd.f32 %v5772_v6, %v5771_v11  ;;  %v5863_v3 = vpop.f32.mrb[109].mxu1  ;;  %v4440_v39 = vadd.f32 %v5770_v32, %v8402_v63 }
 0x782   : > { %v5864_v1 = vadd.f32 %v5863_v3, %v5862_v62  ;;  %v5865_v52 = vpop.f32.mrb[110].mxu1 }
 0x783   : > { %v5866_v54 = vpop.f32.mrb[111].mxu1  ;;  %v4443_v37 = vadd.f32 %v5773_v44, %v8402_v63 }
 0x784   : > { %v5867_v8 = vadd.f32 %v5866_v54, %v5865_v52  ;;  %v8424_v23 = vadd.f32 %v5864_v1, %v4416_v34 }
 0x785   : > { %v5774_v60 = vpop.f32.mrb[104].mxu0 }
 0x786   : > { %v5775_v14 = vpop.f32.mrb[105].mxu0  ;;  %v8426_v41 = vadd.f32 %v5867_v8, %v4419_v33 }
 0x787   : > { %v5776_v0 = vadd.f32 %v5775_v14, %v5774_v60  ;;  %v5777_v53 = vpop.f32.mrb[106].mxu0 }
 0x788   : > { %v5778_v29 = vpop.f32.mrb[107].mxu0  ;;  %v5868_v57 = vpop.f32.mrb[112].mxu1 }
 0x789   : > { %v5779_v58 = vadd.f32 %v5778_v29, %v5777_v53  ;;  %v5869_v16 = vpop.f32.mrb[113].mxu1  ;;  %v4448_v32 = vadd.f32 %v5776_v0, %v8402_v63 }
 0x78a   : > { %v5870_v28 = vadd.f32 %v5869_v16, %v5868_v57  ;;  %v5871_v15 = vpop.f32.mrb[114].mxu1 }
 0x78b   : > { %v5872_v31 = vpop.f32.mrb[115].mxu1  ;;  %v4451_v44 = vadd.f32 %v5779_v58, %v8402_v63 }
 0x78c   : > { %v5873_v27 = vadd.f32 %v5872_v31, %v5871_v15  ;;  %v8430_v38 = vadd.f32 %v5870_v28, %v4424_v59 }
 0x78d   : > { %v5780_v43 = vpop.f32.mrb[108].mxu0 }
 0x78e   : > { %v5781_v19 = vpop.f32.mrb[109].mxu0  ;;  %v8432_v26 = vadd.f32 %v5873_v27, %v4427_v49 }
 0x78f   : > { %v5782_v47 = vadd.f32 %v5781_v19, %v5780_v43  ;;  %v5783_v17 = vpop.f32.mrb[110].mxu0 }
 0x790   : > { %v5784_v18 = vpop.f32.mrb[111].mxu0  ;;  %v5874_v55 = vpop.f32.mrb[116].mxu1 }
 0x791   : > { %v5785_v35 = vadd.f32 %v5784_v18, %v5783_v17  ;;  %v5875_v7 = vpop.f32.mrb[117].mxu1  ;;  %v4456_v0 = vadd.f32 %v5782_v47, %v8402_v63 }
 0x792   : > { %v5876_v9 = vadd.f32 %v5875_v7, %v5874_v55  ;;  %v5877_v50 = vpop.f32.mrb[118].mxu1 }
 0x793   : > { %v5878_v20 = vpop.f32.mrb[119].mxu1  ;;  %v4459_v58 = vadd.f32 %v5785_v35, %v8402_v63 }
 0x794   : > { %v5879_v61 = vadd.f32 %v5878_v20, %v5877_v50  ;;  %v8436_v56 = vadd.f32 %v5876_v9, %v4432_v22 }
 0x795   : > { %v5786_v45 = vpop.f32.mrb[112].mxu0 }
 0x796   : > { %v5787_v36 = vpop.f32.mrb[113].mxu0  ;;  %v8438_v12 = vadd.f32 %v5879_v61, %v4435_v10 }
 0x797   : > { %v5788_v21 = vadd.f32 %v5787_v36, %v5786_v45  ;;  %v5789_v4 = vpop.f32.mrb[114].mxu0 }
 0x798   : > { %v5790_v5 = vpop.f32.mrb[115].mxu0  ;;  %v5880_v24 = vpop.f32.mrb[120].mxu1 }
 0x799   : > { %v5791_v46 = vadd.f32 %v5790_v5, %v5789_v4  ;;  %v5881_v51 = vpop.f32.mrb[121].mxu1  ;;  %v4464_v47 = vadd.f32 %v5788_v21, %v8402_v63 }
 0x79a   : > { %v5882_v48 = vadd.f32 %v5881_v51, %v5880_v24  ;;  %v5883_v11 = vpop.f32.mrb[122].mxu1 }
 0x79b   : > { %v5884_v6 = vpop.f32.mrb[123].mxu1  ;;  %v4467_v35 = vadd.f32 %v5791_v46, %v8402_v63 }
 0x79c   : > { %v5885_v62 = vadd.f32 %v5884_v6, %v5883_v11  ;;  %v8442_v3 = vadd.f32 %v5882_v48, %v4440_v39 }
 0x79d   : > { %v5792_v34 = vpop.f32.mrb[116].mxu0 }
 0x79e   : > { %v5793_v1 = vpop.f32.mrb[117].mxu0  ;;  %v8444_v52 = vadd.f32 %v5885_v62, %v4443_v37 }
 0x79f   : > { %v5794_v54 = vadd.f32 %v5793_v1, %v5792_v34  ;;  %v5795_v33 = vpop.f32.mrb[118].mxu0 }
 0x7a0   : > { %v5796_v8 = vpop.f32.mrb[119].mxu0  ;;  %v5886_v60 = vpop.f32.mrb[124].mxu1 }
 0x7a1   : > { %v5797_v14 = vadd.f32 %v5796_v8, %v5795_v33  ;;  %v5887_v53 = vpop.f32.mrb[125].mxu1  ;;  %v4472_v21 = vadd.f32 %v5794_v54, %v8402_v63 }
 0x7a2   : > { %v5888_v29 = vadd.f32 %v5887_v53, %v5886_v60  ;;  %v5889_v57 = vpop.f32.mrb[126].mxu1 }
 0x7a3   : > { %v5890_v16 = vpop.f32.mrb[127].mxu1  ;;  %v4475_v46 = vadd.f32 %v5797_v14, %v8402_v63 }
 0x7a4   : > { %v5891_v59 = vadd.f32 %v5890_v16, %v5889_v57  ;;  %v8448_v28 = vadd.f32 %v5888_v29, %v4448_v32 }
 0x7a5   : > { %v5798_v15 = vpop.f32.mrb[120].mxu0 }
 0x7a6   : > { %v5799_v31 = vpop.f32.mrb[121].mxu0  ;;  %v8450_v49 = vadd.f32 %v5891_v59, %v4451_v44 }
 0x7a7   : > { %v5800_v27 = vadd.f32 %v5799_v31, %v5798_v15  ;;  %v5801_v43 = vpop.f32.mrb[122].mxu0 }
 0x7a8   : > { %v5802_v19 = vpop.f32.mrb[123].mxu0  ;;  %v5892_v17 = vpop.f32.mrb[128].mxu1 }
 0x7a9   : > { %v5803_v18 = vadd.f32 %v5802_v19, %v5801_v43  ;;  %v5893_v55 = vpop.f32.mrb[129].mxu1 }
 0x7aa   : > { %v5894_v7 = vadd.f32 %v5893_v55, %v5892_v17  ;;  %v5895_v22 = vpop.f32.mrb[130].mxu1 }
 0x7ab   : > { %v5896_v9 = vpop.f32.mrb[131].mxu1 }
 0x7ac   : > { %v5897_v50 = vadd.f32 %v5896_v9, %v5895_v22  ;;  %v8454_v20 = vadd.f32 %v5894_v7, %v4456_v0 }
 0x7ad   : > { %v5804_v10 = vpop.f32.mrb[124].mxu0 }
 0x7ae   : > { %v5805_v61 = vpop.f32.mrb[125].mxu0  ;;  %v8456_v45 = vadd.f32 %v5897_v50, %v4459_v58  ;;  %v4480_v58 = vadd.f32 %v5800_v27, %v8402_v63 }
 0x7af   : > { %v5806_v36 = vadd.f32 %v5805_v61, %v5804_v10  ;;  %v5807_v4 = vpop.f32.mrb[126].mxu0  ;;  %v4483_v61 = vadd.f32 %v5803_v18, %v8402_v63 }
 0x7b0   : > { %v5808_v5 = vpop.f32.mrb[127].mxu0  ;;  %v5898_v24 = vpop.f32.mrb[132].mxu1 }
 0x7b1   : > { %v5809_v51 = vadd.f32 %v5808_v5, %v5807_v4  ;;  %v5899_v39 = vpop.f32.mrb[133].mxu1 }
 0x7b2   : > { %v5900_v48 = vadd.f32 %v5899_v39, %v5898_v24  ;;  %v5901_v11 = vpop.f32.mrb[134].mxu1 }
 0x7b3   : > { %v5902_v6 = vpop.f32.mrb[135].mxu1 }
 0x7b4   : > { %v5903_v37 = vadd.f32 %v5902_v6, %v5901_v11  ;;  %v8460_v62 = vadd.f32 %v5900_v48, %v4464_v47 }
 0x7b5   : > { %v5810_v34 = vpop.f32.mrb[128].mxu0 }
 0x7b6   : > { %v5811_v1 = vpop.f32.mrb[129].mxu0  ;;  %v8462_v33 = vadd.f32 %v5903_v37, %v4467_v35 }
 0x7b7   : > { %v5812_v8 = vadd.f32 %v5811_v1, %v5810_v34  ;;  %v5813_v60 = vpop.f32.mrb[130].mxu0  ;;  %v4488_v34 = vadd.f32 %v5806_v36, %v8402_v63  ;;  %v8495_v36 = vld [vmem:[%s8776_s5 + $0x7] ss:$0 sm:$0xff] }
 0x7b8   : > { %v5814_v53 = vpop.f32.mrb[131].mxu0  ;;  %v5904_v32 = vpop.f32.mrb[136].mxu1 }
 0x7b9   : > { %v5815_v29 = vadd.f32 %v5814_v53, %v5813_v60  ;;  %v5905_v57 = vpop.f32.mrb[137].mxu1  ;;  %v4491_v53 = vadd.f32 %v5809_v51, %v8402_v63 }
 0x7ba   : > { %v5906_v16 = vadd.f32 %v5905_v57, %v5904_v32  ;;  %v5907_v44 = vpop.f32.mrb[138].mxu1 }
 0x7bb   : > { %v5908_v59 = vpop.f32.mrb[139].mxu1 }
 0x7bc   : > { %v5909_v15 = vadd.f32 %v5908_v59, %v5907_v44  ;;  %v8466_v31 = vadd.f32 %v5906_v16, %v4472_v21 }
 0x7bd   : > { %v5816_v43 = vpop.f32.mrb[132].mxu0 }
 0x7be   : > { %v5817_v19 = vpop.f32.mrb[133].mxu0  ;;  %v8468_v17 = vadd.f32 %v5909_v15, %v4475_v46 }
 0x7bf   : > { %v8470_v55 = vadd.f32 %v5817_v19, %v5816_v43  ;;  %v5819_v0 = vpop.f32.mrb[134].mxu0 }
 0x7c0   : > { %v5820_v7 = vpop.f32.mrb[135].mxu0  ;;  %v5910_v22 = vpop.f32.mrb[140].mxu1 }
 0x7c1   : > { %v8472_v9 = vadd.f32 %v5820_v7, %v5819_v0  ;;  %v5911_v54 = vpop.f32.mrb[141].mxu1 }
 0x7c2   : > { %v5912_v50 = vadd.f32 %v5911_v54, %v5910_v22  ;;  %v5913_v10 = vpop.f32.mrb[142].mxu1  ;;  %v4496_v54 = vadd.f32 %v5812_v8, %v8402_v63 }
 0x7c3   : > { %v5914_v14 = vpop.f32.mrb[143].mxu1 }
 0x7c4   : > { %v5915_v4 = vadd.f32 %v5914_v14, %v5913_v10  ;;  %v8476_v5 = vadd.f32 %v5912_v50, %v4480_v58  ;;  %v4499_v10 = vadd.f32 %v5815_v29, %v8402_v63 }
 0x7c5   : > { %v5822_v24 = vpop.f32.mrb[136].mxu0 }
 0x7c6   : > { %v5823_v39 = vpop.f32.mrb[137].mxu0  ;;  %v8478_v47 = vadd.f32 %v5915_v4, %v4483_v61 }
 0x7c7   : > { %v8480_v48 = vadd.f32 %v5823_v39, %v5822_v24  ;;  %v5825_v11 = vpop.f32.mrb[138].mxu0 }
 0x7c8   : > { %v5826_v6 = vpop.f32.mrb[139].mxu0  ;;  %v5916_v35 = vpop.f32.mrb[144].mxu1 }
 0x7c9   : > { %v8482_v37 = vadd.f32 %v5826_v6, %v5825_v11  ;;  %v5917_v27 = vpop.f32.mrb[145].mxu1 }
 0x7ca   : > { %v5918_v1 = vadd.f32 %v5917_v27, %v5916_v35  ;;  %v5919_v60 = vpop.f32.mrb[146].mxu1 }
 0x7cb   : > { %v5920_v18 = vpop.f32.mrb[147].mxu1 }
 0x7cc   : > { %v5921_v32 = vadd.f32 %v5920_v18, %v5919_v60  ;;  %v8486_v57 = vadd.f32 %v5918_v1, %v4488_v34 }
 0x7cd   : > { %v6130_v21 = vpop.f32.mrb[140].mxu0 }
 0x7ce   : > { %v4722_v16 = vadd.f32 %v6130_v21, %v8412_v2  ;;  %v4713_v44 = vpop.f32.mrb[141].mxu0  ;;  %v8489_v59 = vadd.f32 %v5921_v32, %v4491_v53 }
 0x7cf   : > { %v4714_v46 = vadd.f32 %v4713_v44, %v8406_v13  ;;  %v6131_v15 = vpop.f32.mrb[142].mxu0 }
 0x7d0   : > { %v4842_v43 = vmax.f32 %v4722_v16, 0.0  ;;  %v4725_v51 = vadd.f32 %v6131_v15, %v8414_v25  ;;  %v5922_v19 = vpop.f32.mrb[148].mxu1  ;;  %v4716_v0 = vpop.f32.mrb[143].mxu0 }
 0x7d1   : > { %v4840_v7 = vmax.f32 %v4714_v46, 0.0  ;;  %v4717_v22 = vadd.f32 %v4716_v0, %v8408_v40  ;;  %v5923_v2 = vpop.f32.mrb[149].mxu1 }
 0x7d2   : > { %v5924_v58 = vadd.f32 %v5923_v2, %v5922_v19  ;;  %v5925_v50 = vpop.f32.mrb[150].mxu1  ;;  %v4879_v13 = vmul.f32 %v8495_v36, %v4842_v43  ;;  %v4843_v14 = vmax.f32 %v4725_v51, 0.0 }
 0x7d3   : > { %v4841_v61 = vmax.f32 %v4717_v22, 0.0  ;;  %v5926_v4 = vpop.f32.mrb[151].mxu1  ;;  %v4877_v39 = vmul.f32 %v8495_v36, %v4840_v7 }
 0x7d4   : > { %v5927_v24 = vadd.f32 %v5926_v4, %v5925_v50  ;;  %v4915_v25 = vsel %vm462_vm0, %v4879_v13, 0.0  ;;  %v8504_v11 = vadd.f32 %v5924_v58, %v4496_v54 }
 0x7d5   : > { %v6134_v40 = vpop.f32.mrb[144].mxu0  ;;  %4916 = vadd.xlane.f32.xlu0 %v4915_v25  ;;  %v4878_v8 = vmul.f32 %v8495_v36, %v4841_v61  ;;  %v4909_v32 = vsel %vm462_vm0, %v4877_v39, 0.0 }
 0x7d6   : > { %v8508_v6 = vadd.f32 %v6134_v40, %v8424_v23  ;;  %v4729_v35 = vpop.f32.mrb[145].mxu0  ;;  %v8510_v27 = vadd.f32 %v5927_v24, %v4499_v10  ;;  %v4880_v23 = vmul.f32 %v8495_v36, %v4843_v14  ;;  %v4512_v10 = vadd.f32 %v8480_v48, %v8402_v63 }
 0x7d7   : > { %v8513_v29 = vadd.f32 %v4729_v35, %v8418_v42  ;;  %v6135_v34 = vpop.f32.mrb[146].mxu0  ;;  %v4912_v1 = vsel %vm462_vm0, %v4878_v8, 0.0  ;;  %v4504_v42 = vadd.f32 %v8470_v55, %v8402_v63 }
 0x7d8   : > { %v8517_v60 = vadd.f32 %v6135_v34, %v8426_v41  ;;  %v5928_v18 = vpop.f32.mrb[152].mxu1  ;;  %v4732_v53 = vpop.f32.mrb[147].mxu0  ;;  %4913 = vadd.xlane.f32.xlu1 %v4912_v1  ;;  %v4507_v41 = vadd.f32 %v8472_v9, %v8402_v63  ;;  %v4918_v51 = vsel %vm462_vm0, %v4880_v23, 0.0 }
 0x7d9   : > { %v8522_v21 = vadd.f32 %v4732_v53, %v8420_v30  ;;  %v5929_v16 = vpop.f32.mrb[153].mxu1  ;;  %4910 = vadd.xlane.f32.xlu0 %v4909_v32 }
 0x7da   : > { %v5930_v44 = vadd.f32 %v5929_v16, %v5928_v18  ;;  %v5931_v46 = vpop.f32.mrb[154].mxu1  ;;  %v4846_v16 = vmax.f32 %v8508_v6, 0.0 }
 0x7db   : > { %v5932_v15 = vpop.f32.mrb[155].mxu1 }
 0x7dc   : > { %v5933_v43 = vadd.f32 %v5932_v15, %v5931_v46  ;;  %v4665_v19 = vadd.f32 %v5930_v44, %v4504_v42  ;;  %v4847_v15 = vmax.f32 %v8517_v60, 0.0 }
 0x7dd   : > { %v6138_v0 = vpop.f32.mrb[148].mxu0  ;;  %4919 = vadd.xlane.f32.xlu0 %v4918_v51 }
 0x7de   : > { %v8530_v30 = vadd.f32 %v6138_v0, %v8436_v56  ;;  %v4745_v7 = vpop.f32.mrb[149].mxu0  ;;  %v4668_v22 = vadd.f32 %v5933_v43, %v4507_v41 }
 0x7df   : > { %v8533_v2 = vadd.f32 %v4745_v7, %v8430_v38  ;;  %v6139_v55 = vpop.f32.mrb[150].mxu0  ;;  %v4515_v38 = vadd.f32 %v8482_v37, %v8402_v63 }
 0x7e0   : > { %v8536_v54 = vadd.f32 %v6139_v55, %v8438_v12  ;;  %v5934_v58 = vpop.f32.mrb[156].mxu1  ;;  %v4748_v9 = vpop.f32.mrb[151].mxu0 }
 0x7e1   : > { %v8539_v50 = vadd.f32 %v4748_v9, %v8432_v26  ;;  %v5935_v13 = vpop.f32.mrb[157].mxu1 }
 0x7e2   : > { %v5936_v56 = vadd.f32 %v5935_v13, %v5934_v58  ;;  %v5937_v14 = vpop.f32.mrb[158].mxu1  ;;  %v4883_v58 = vmul.f32 %v8495_v36, %v4846_v16  ;;  %v4884_v13 = vmul.f32 %v8495_v36, %v4847_v15 }
 0x7e3   : > { %v5938_v61 = vpop.f32.mrb[159].mxu1 }
 0x7e4   : > { %v5939_v4 = vadd.f32 %v5938_v61, %v5937_v14  ;;  %v4673_v24 = vadd.f32 %v5936_v56, %v4512_v10  ;;  %v4927_v10 = vsel %vm462_vm0, %v4883_v58, 0.0  ;;  %v4851_v61 = vmax.f32 %v8536_v54, 0.0 }
 0x7e5   : > { %v6142_v25 = vpop.f32.mrb[152].mxu0 }
 0x7e6   : > { %v8546_v12 = vadd.f32 %v6142_v25, %v8448_v28  ;;  %v4761_v39 = vpop.f32.mrb[153].mxu0  ;;  %v4676_v40 = vadd.f32 %v5939_v4, %v4515_v38 }
 0x7e7   : > { %v8549_v26 = vadd.f32 %v4761_v39, %v8442_v3  ;;  %v6143_v8 = vpop.f32.mrb[154].mxu0 }
 0x7e8   : > { %v8552_v48 = vadd.f32 %v6143_v8, %v8450_v49  ;;  %v4764_v35 = vpop.f32.mrb[155].mxu0  ;;  %v6158_v34 = vpop.f32.mrb[160].mxu1 }
 0x7e9   : > { %v8555_v1 = vadd.f32 %v4764_v35, %v8444_v52  ;;  %v4834_v63 = vadd.f32 %v6158_v34, %v4673_v24  ;;  %v4825_v37 = vpop.f32.mrb[161].mxu1  ;;  %v4848_v24 = vmax.f32 %v8533_v2, 0.0 }
 0x7ea   : > { %v4826_v18 = vadd.f32 %v4825_v37, %v4665_v19  ;;  %v6159_v53 = vpop.f32.mrb[162].mxu1  ;;  %v4844_v19 = vmax.f32 %v8513_v29, 0.0  ;;  %v4845_v29 = vmax.f32 %v8522_v21, 0.0  ;;  %v4930_v21 = vsel %vm462_vm0, %v4884_v13, 0.0 }
 0x7eb   : > { %v4870_v28 = vmax.f32 %v4834_v63, 0.0  ;;  %v4837_v32 = vadd.f32 %v6159_v53, %v4676_v40  ;;  %v4828_v23 = vpop.f32.mrb[163].mxu1 }
 0x7ec   : > { %v4868_v3 = vmax.f32 %v4826_v18, 0.0  ;;  %v4829_v42 = vadd.f32 %v4828_v23, %v4668_v22  ;;  %v4881_v56 = vmul.f32 %v8495_v36, %v4844_v19  ;;  %v4882_v4 = vmul.f32 %v8495_v36, %v4845_v29 }
 0x7ed   : > { %v8559_v44 = vmul.f32 %v8495_v36, %v4870_v28  ;;  %v4871_v49 = vmax.f32 %v4837_v32, 0.0  ;;  %v6146_v46 = vpop.f32.mrb[156].mxu0  ;;  %v4885_v28 = vmul.f32 %v8495_v36, %v4848_v24 }
 0x7ee   : > { %v4869_v52 = vmax.f32 %v4829_v42, 0.0  ;;  %v8563_v41 = vadd.f32 %v6146_v46, %v8460_v62  ;;  %v4777_v43 = vpop.f32.mrb[157].mxu0  ;;  %v4905_v51 = vmul.f32 %v8495_v36, %v4868_v3  ;;  %v4921_v35 = vsel %vm462_vm0, %v4881_v56, 0.0 }
 0x7ef   : > { %v8568_v6 = vmul.f32 %v8495_v36, %v4871_v49  ;;  %v8571_v0 = vadd.f32 %v4777_v43, %v8454_v20  ;;  %v6147_v7 = vpop.f32.mrb[158].mxu0  ;;  %v4924_v2 = vsel %vm462_vm0, %v4882_v4, 0.0  ;;  %v4855_v42 = vmax.f32 %v8552_v48, 0.0 }
 0x7f0   : > { %v8574_v22 = vadd.f32 %v6147_v7, %v8462_v33  ;;  %v4780_v60 = vpop.f32.mrb[159].mxu0  ;;  %v4993_v55 = vsel %vm462_vm0, %v4905_v51, 0.0  ;;  %v4906_v62 = vmul.f32 %v8495_v36, %v4869_v52  ;;  %v4850_v33 = vmax.f32 %v8530_v30, 0.0 }
 0x7f1   : > { %v8580_v9 = vadd.f32 %v4780_v60, %v8456_v45  ;;  %4994 = vadd.xlane.f32.xlu1 %v4993_v55  ;;  %v4933_v43 = vsel %vm462_vm0, %v4885_v28, 0.0  ;;  %v4852_v51 = vmax.f32 %v8549_v26, 0.0 }
 0x7f2   : > { %v4996_v20 = vsel %vm462_vm0, %v4906_v62, 0.0  ;;  %v4887_v54 = vmul.f32 %v8495_v36, %v4850_v33 }
 0x7f3   : > { %4997 = vadd.xlane.f32.xlu0 %v4996_v20  ;;  %v4892_v20 = vmul.f32 %v8495_v36, %v4855_v42 }
 0x7f4   : > { %v4939_v32 = vsel %vm462_vm0, %v4887_v54, 0.0 }
 0x7f5   : > { %v6150_v14 = vpop.f32.mrb[160].mxu0  ;;  %4928 = vadd.xlane.f32.xlu1 %v4927_v10  ;;  %v4889_v10 = vmul.f32 %v8495_v36, %v4852_v51 }
 0x7f6   : > { %v4802_v45 = vadd.f32 %v6150_v14, %v8476_v5  ;;  %v4793_v38 = vpop.f32.mrb[161].mxu0  ;;  %v4849_v5 = vmax.f32 %v8539_v50, 0.0  ;;  %v4854_v50 = vmax.f32 %v8546_v12, 0.0  ;;  %v4954_v14 = vsel %vm462_vm0, %v4892_v20, 0.0 }
 0x7f7   : > { %v4794_v25 = vadd.f32 %v4793_v38, %v8466_v31  ;;  %v6151_v30 = vpop.f32.mrb[162].mxu0  ;;  %4931 = vadd.xlane.f32.xlu0 %v4930_v21  ;;  %v4888_v31 = vmul.f32 %v8495_v36, %v4851_v61  ;;  %v4857_v21 = vmax.f32 %v8580_v9, 0.0 }
 0x7f8   : > { %v4862_v39 = vmax.f32 %v4802_v45, 0.0  ;;  %v4805_v40 = vadd.f32 %v6151_v30, %v8478_v47  ;;  %v4796_v8 = vpop.f32.mrb[163].mxu0  ;;  %v4886_v3 = vmul.f32 %v8495_v36, %v4849_v5  ;;  %v4891_v55 = vmul.f32 %v8495_v36, %v4854_v50 }
 0x7f9   : > { %v4860_v34 = vmax.f32 %v4794_v25, 0.0  ;;  %v4797_v63 = vadd.f32 %v4796_v8, %v8468_v17  ;;  %4922 = vadd.xlane.f32.xlu1 %v4921_v35  ;;  %v4942_v15 = vsel %vm462_vm0, %v4888_v31, 0.0  ;;  %v4856_v45 = vmax.f32 %v8571_v0, 0.0  ;;  %v8664_v31 = vld [vmem:[%s8776_s5 + $0x8] ss:$0 sm:$0xff] }
 0x7fa   : > { %v4863_v37 = vmax.f32 %v4805_v40, 0.0  ;;  %v8602_v18 = vmul.f32 %v8495_v36, %v4862_v39  ;;  %v4936_v62 = vsel %vm462_vm0, %v4886_v3, 0.0  ;;  %v4894_v30 = vmul.f32 %v8495_v36, %v4857_v21 }
 0x7fb   : > { %v8605_v47 = vmul.f32 %v8495_v36, %v4860_v34  ;;  %v4861_v53 = vmax.f32 %v4797_v63, 0.0  ;;  %4925 = vadd.xlane.f32.xlu0 %v4924_v2  ;;  %v4893_v25 = vmul.f32 %v8495_v36, %v4856_v45  ;;  %v5002_v2 = vsel %vm462_vm0, %v8568_v6, 0.0 }
 0x7fc   : > { %v4900_v17 = vmul.f32 %v8495_v36, %v4863_v37  ;;  %v4960_v9 = vsel %vm462_vm0, %v4894_v30, 0.0  ;;  %v4975_v40 = vsel %vm462_vm0, %v8602_v18, 0.0  ;;  %v4999_v37 = vsel %vm462_vm0, %v8559_v44, 0.0 }
 0x7fd   : > { %v4898_v23 = vmul.f32 %v8495_v36, %v4861_v53  ;;  %v6154_v16 = vpop.f32.mrb[164].mxu0  ;;  %4940 = vadd.xlane.f32.xlu1 %v4939_v32  ;;  %v4957_v39 = vsel %vm462_vm0, %v4893_v25, 0.0  ;;  %v4969_v35 = vsel %vm462_vm0, %v8605_v47, 0.0 }
 0x7fe   : > { %v4818_v49 = vadd.f32 %v6154_v16, %v8504_v11  ;;  %v4809_v46 = vpop.f32.mrb[165].mxu0  ;;  %v4978_v8 = vsel %vm462_vm0, %v4900_v17, 0.0 }
 0x7ff   : > { %v4810_v52 = vadd.f32 %v4809_v46, %v8486_v57  ;;  %v6155_v12 = vpop.f32.mrb[166].mxu0  ;;  %4943 = vadd.xlane.f32.xlu0 %v4942_v15  ;;  %v4853_v57 = vmax.f32 %v8555_v1, 0.0  ;;  %v4859_v1 = vmax.f32 %v8574_v22, 0.0 }
 0x800   : > { %v4866_v19 = vmax.f32 %v4818_v49, 0.0  ;;  %v4821_v7 = vadd.f32 %v6155_v12, %v8510_v27  ;;  %v4812_v60 = vpop.f32.mrb[167].mxu0  ;;  %v4858_v27 = vmax.f32 %v8563_v41, 0.0  ;;  %v4945_v41 = vsel %vm462_vm0, %v4889_v10, 0.0 }
 0x801   : > { %v4864_v48 = vmax.f32 %v4810_v52, 0.0  ;;  %v4813_v11 = vadd.f32 %v4812_v60, %v8489_v59  ;;  %4934 = vadd.xlane.f32.xlu1 %v4933_v43  ;;  %v4951_v59 = vsel %vm462_vm0, %v4891_v55, 0.0  ;;  %v4890_v61 = vmul.f32 %v8495_v36, %v4853_v57 }
 0x802   : > { %v4903_v58 = vmul.f32 %v8495_v36, %v4866_v19  ;;  %v4867_v29 = vmax.f32 %v4821_v7, 0.0  ;;  %v4895_v38 = vmul.f32 %v8495_v36, %v4858_v27  ;;  %v4896_v24 = vmul.f32 %v8495_v36, %v4859_v1 }
 0x803   : > { %v4901_v26 = vmul.f32 %v8495_v36, %v4864_v48  ;;  %v4865_v13 = vmax.f32 %v4813_v11, 0.0  ;;  %4937 = vadd.xlane.f32.xlu0 %v4936_v62  ;;  %v4948_v4 = vsel %vm462_vm0, %v4890_v61, 0.0 }
 0x804   : > { %v4904_v33 = vmul.f32 %v8495_v36, %v4867_v29  ;;  %v4963_v22 = vsel %vm462_vm0, %v4895_v38, 0.0  ;;  %v4966_v0 = vsel %vm462_vm0, %v4896_v24, 0.0  ;;  %v4987_v54 = vsel %vm462_vm0, %v4903_v58, 0.0 }
 0x805   : > { %v4902_v56 = vmul.f32 %v8495_v36, %v4865_v13  ;;  %4952 = vadd.xlane.f32.xlu1 %v4951_v59  ;;  %v4972_v36 = vsel %vm462_vm0, %v4898_v23, 0.0  ;;  %v4981_v34 = vsel %vm462_vm0, %v4901_v26, 0.0 }
 0x806   : > { %v4990_v5 = vsel %vm462_vm0, %v4904_v33, 0.0 }
 0x807   : > { %4955 = vadd.xlane.f32.xlu0 %v4954_v14  ;;  %v4984_v63 = vsel %vm462_vm0, %v4902_v56, 0.0 }
 0x809   : > { %4946 = vadd.xlane.f32.xlu1 %v4945_v41 }
 0x80b   : > { %4949 = vadd.xlane.f32.xlu0 %v4948_v4 }
 0x80d   : > { %4964 = vadd.xlane.f32.xlu1 %v4963_v22 }
 0x80f   : > { %4967 = vadd.xlane.f32.xlu0 %v4966_v0 }
 0x811   : > { %4958 = vadd.xlane.f32.xlu1 %v4957_v39 }
 0x813   : > { %4961 = vadd.xlane.f32.xlu0 %v4960_v9 }
 0x815   : > { %4976 = vadd.xlane.f32.xlu1 %v4975_v40 }
 0x817   : > { %4979 = vadd.xlane.f32.xlu0 %v4978_v8 }
 0x819   : > { %4970 = vadd.xlane.f32.xlu1 %v4969_v35 }
 0x81b   : > { %4973 = vadd.xlane.f32.xlu0 %v4972_v36 }
 0x81d   : > { %4988 = vadd.xlane.f32.xlu1 %v4987_v54 }
 0x81f   : > { %4991 = vadd.xlane.f32.xlu0 %v4990_v5 }
 0x821   : > { %4982 = vadd.xlane.f32.xlu1 %v4981_v34 }
 0x823   : > { %4985 = vadd.xlane.f32.xlu0 %v4984_v63 }
 0x825   : > { %5000 = vadd.xlane.f32.xlu1 %v4999_v37 }
 0x827   : > { %5003 = vadd.xlane.f32.xlu0 %v5002_v2 }
 0x862   : > { %v4917_v18 = vpop.xlane.xlu0 %4916 }
 0x863   : > { %v5012_v47 = vadd.f32 %v8664_v31, %v4917_v18 }
 0x865   : > { %v5044_v44 = vmax.f32 %v5012_v47, 0.0  ;;  %v4914_v6 = vpop.xlane.xlu1 %4913 }
 0x866   : > { %v5011_v53 = vadd.f32 %v8664_v31, %v4914_v6  ;;  %v4911_v28 = vpop.xlane.xlu0 %4910 }
 0x867   : > { %5077 = vst.msk [vmem:[%s8671_s18 + $0x10] sm:$0xff] %vm5074_vm8, %v5044_v44  ;;  %v5010_v50 = vadd.f32 %v8664_v31, %v4911_v28 }
 0x868   : > { %v5043_v17 = vmax.f32 %v5011_v53, 0.0 }
 0x869   : > { %v5042_v32 = vmax.f32 %v5010_v50, 0.0 }
 0x86a   : > { %5076 = vst.msk [vmem:[%s8671_s18 + $0x8] sm:$0xff] %vm5074_vm8, %v5043_v17  ;;  %v4920_v23 = vpop.xlane.xlu0 %4919 }
 0x86b   : > { %5075 = vst.msk [vmem:[%s8671_s18] sm:$0xff] %vm5074_vm8, %v5042_v32  ;;  %v5013_v16 = vadd.f32 %v8664_v31, %v4920_v23 }
 0x86d   : > { %v5045_v3 = vmax.f32 %v5013_v16, 0.0 }
 0x86f   : > { %5078 = vst.msk [vmem:[%s8671_s18 + $0x18] sm:$0xff] %vm5074_vm8, %v5045_v3 }
 0x87e   : > { %v4995_v42 = vpop.xlane.xlu1 %4994 }
 0x87f   : > { %v5038_v49 = vadd.f32 %v8664_v31, %v4995_v42 }
 0x880   : > { %v4998_v46 = vpop.xlane.xlu0 %4997 }
 0x881   : > { %v5070_v15 = vmax.f32 %v5038_v49, 0.0  ;;  %v5039_v52 = vadd.f32 %v8664_v31, %v4998_v46 }
 0x882   : > { %v4929_v12 = vpop.xlane.xlu1 %4928 }
 0x883   : > { %5103 = vst.msk [vmem:[%s8671_s18 + $0xe0] sm:$0xff] %vm5074_vm8, %v5070_v15  ;;  %v5071_v43 = vmax.f32 %v5039_v52, 0.0  ;;  %v5016_v51 = vadd.f32 %v8664_v31, %v4929_v12 }
 0x884   : > { %v4932_v19 = vpop.xlane.xlu0 %4931 }
 0x885   : > { %5104 = vst.msk [vmem:[%s8671_s18 + $0xe8] sm:$0xff] %vm5074_vm8, %v5071_v43  ;;  %v5048_v7 = vmax.f32 %v5016_v51, 0.0  ;;  %v5017_v60 = vadd.f32 %v8664_v31, %v4932_v19 }
 0x886   : > { %v4923_v55 = vpop.xlane.xlu1 %4922 }
 0x887   : > { %5081 = vst.msk [vmem:[%s8671_s18 + $0x30] sm:$0xff] %vm5074_vm8, %v5048_v7  ;;  %v5049_v48 = vmax.f32 %v5017_v60, 0.0  ;;  %v5014_v11 = vadd.f32 %v8664_v31, %v4923_v55 }
 0x888   : > { %v4926_v62 = vpop.xlane.xlu0 %4925 }
 0x889   : > { %5082 = vst.msk [vmem:[%s8671_s18 + $0x38] sm:$0xff] %vm5074_vm8, %v5049_v48  ;;  %v5046_v57 = vmax.f32 %v5014_v11, 0.0  ;;  %v5015_v58 = vadd.f32 %v8664_v31, %v4926_v62 }
 0x88a   : > { %v4941_v29 = vpop.xlane.xlu1 %4940 }
 0x88b   : > { %5079 = vst.msk [vmem:[%s8671_s18 + $0x20] sm:$0xff] %vm5074_vm8, %v5046_v57  ;;  %v5047_v20 = vmax.f32 %v5015_v58, 0.0  ;;  %v5020_v26 = vadd.f32 %v8664_v31, %v4941_v29 }
 0x88c   : > { %v4944_v13 = vpop.xlane.xlu0 %4943 }
 0x88d   : > { %5080 = vst.msk [vmem:[%s8671_s18 + $0x28] sm:$0xff] %vm5074_vm8, %v5047_v20  ;;  %v5052_v27 = vmax.f32 %v5020_v26, 0.0  ;;  %v5021_v33 = vadd.f32 %v8664_v31, %v4944_v13 }
 0x88e   : > { %v4935_v59 = vpop.xlane.xlu1 %4934 }
 0x88f   : > { %5085 = vst.msk [vmem:[%s8671_s18 + $0x50] sm:$0xff] %vm5074_vm8, %v5052_v27  ;;  %v5053_v10 = vmax.f32 %v5021_v33, 0.0  ;;  %v5018_v56 = vadd.f32 %v8664_v31, %v4935_v59 }
 0x890   : > { %v4938_v1 = vpop.xlane.xlu0 %4937 }
 0x891   : > { %5086 = vst.msk [vmem:[%s8671_s18 + $0x58] sm:$0xff] %vm5074_vm8, %v5053_v10  ;;  %v5050_v14 = vmax.f32 %v5018_v56, 0.0  ;;  %v5019_v61 = vadd.f32 %v8664_v31, %v4938_v1 }
 0x892   : > { %v4953_v45 = vpop.xlane.xlu1 %4952 }
 0x893   : > { %5083 = vst.msk [vmem:[%s8671_s18 + $0x40] sm:$0xff] %vm5074_vm8, %v5050_v14  ;;  %v5051_v41 = vmax.f32 %v5019_v61, 0.0  ;;  %v5024_v38 = vadd.f32 %v8664_v31, %v4953_v45 }
 0x894   : > { %v4956_v21 = vpop.xlane.xlu0 %4955 }
 0x895   : > { %5084 = vst.msk [vmem:[%s8671_s18 + $0x48] sm:$0xff] %vm5074_vm8, %v5051_v41  ;;  %v5056_v4 = vmax.f32 %v5024_v38, 0.0  ;;  %v5025_v24 = vadd.f32 %v8664_v31, %v4956_v21 }
 0x896   : > { %v4947_v22 = vpop.xlane.xlu1 %4946 }
 0x897   : > { %5089 = vst.msk [vmem:[%s8671_s18 + $0x70] sm:$0xff] %vm5074_vm8, %v5056_v4  ;;  %v5057_v25 = vmax.f32 %v5025_v24, 0.0  ;;  %v5022_v30 = vadd.f32 %v8664_v31, %v4947_v22 }
 0x898   : > { %v4950_v0 = vpop.xlane.xlu0 %4949 }
 0x899   : > { %5090 = vst.msk [vmem:[%s8671_s18 + $0x78] sm:$0xff] %vm5074_vm8, %v5057_v25  ;;  %v5054_v39 = vmax.f32 %v5022_v30, 0.0  ;;  %v5023_v9 = vadd.f32 %v8664_v31, %v4950_v0 }
 0x89a   : > { %v4965_v40 = vpop.xlane.xlu1 %4964 }
 0x89b   : > { %5087 = vst.msk [vmem:[%s8671_s18 + $0x60] sm:$0xff] %vm5074_vm8, %v5054_v39  ;;  %v5055_v8 = vmax.f32 %v5023_v9, 0.0  ;;  %v5028_v35 = vadd.f32 %v8664_v31, %v4965_v40 }
 0x89c   : > { %v4968_v36 = vpop.xlane.xlu0 %4967 }
 0x89d   : > { %5088 = vst.msk [vmem:[%s8671_s18 + $0x68] sm:$0xff] %vm5074_vm8, %v5055_v8  ;;  %v5060_v54 = vmax.f32 %v5028_v35, 0.0  ;;  %v5029_v5 = vadd.f32 %v8664_v31, %v4968_v36 }
 0x89e   : > { %v4959_v34 = vpop.xlane.xlu1 %4958 }
 0x89f   : > { %5093 = vst.msk [vmem:[%s8671_s18 + $0x90] sm:$0xff] %vm5074_vm8, %v5060_v54  ;;  %v5061_v63 = vmax.f32 %v5029_v5, 0.0  ;;  %v5026_v37 = vadd.f32 %v8664_v31, %v4959_v34 }
 0x8a0   : > { %v4962_v2 = vpop.xlane.xlu0 %4961 }
 0x8a1   : > { %5094 = vst.msk [vmem:[%s8671_s18 + $0x98] sm:$0xff] %vm5074_vm8, %v5061_v63  ;;  %v5058_v18 = vmax.f32 %v5026_v37, 0.0  ;;  %v5027_v47 = vadd.f32 %v8664_v31, %v4962_v2 }
 0x8a2   : > { %v4977_v44 = vpop.xlane.xlu1 %4976 }
 0x8a3   : > { %5091 = vst.msk [vmem:[%s8671_s18 + $0x80] sm:$0xff] %vm5074_vm8, %v5058_v18  ;;  %v5059_v6 = vmax.f32 %v5027_v47, 0.0  ;;  %v5032_v53 = vadd.f32 %v8664_v31, %v4977_v44 }
 0x8a4   : > { %v4980_v28 = vpop.xlane.xlu0 %4979 }
 0x8a5   : > { %5092 = vst.msk [vmem:[%s8671_s18 + $0x88] sm:$0xff] %vm5074_vm8, %v5059_v6  ;;  %v5064_v50 = vmax.f32 %v5032_v53, 0.0  ;;  %v5033_v17 = vadd.f32 %v8664_v31, %v4980_v28 }
 0x8a6   : > { %v4971_v32 = vpop.xlane.xlu1 %4970 }
 0x8a7   : > { %5097 = vst.msk [vmem:[%s8671_s18 + $0xb0] sm:$0xff] %vm5074_vm8, %v5064_v50  ;;  %v5065_v23 = vmax.f32 %v5033_v17, 0.0  ;;  %v5030_v16 = vadd.f32 %v8664_v31, %v4971_v32 }
 0x8a8   : > { %v4974_v3 = vpop.xlane.xlu0 %4973 }
 0x8a9   : > { %5098 = vst.msk [vmem:[%s8671_s18 + $0xb8] sm:$0xff] %vm5074_vm8, %v5065_v23  ;;  %v5062_v42 = vmax.f32 %v5030_v16, 0.0  ;;  %v5031_v49 = vadd.f32 %v8664_v31, %v4974_v3 }
 0x8aa   : > { %v4989_v46 = vpop.xlane.xlu1 %4988 }
 0x8ab   : > { %5095 = vst.msk [vmem:[%s8671_s18 + $0xa0] sm:$0xff] %vm5074_vm8, %v5062_v42  ;;  %v5063_v15 = vmax.f32 %v5031_v49, 0.0  ;;  %v5036_v52 = vadd.f32 %v8664_v31, %v4989_v46 }
 0x8ac   : > { %v4992_v12 = vpop.xlane.xlu0 %4991 }
 0x8ad   : > { %5096 = vst.msk [vmem:[%s8671_s18 + $0xa8] sm:$0xff] %vm5074_vm8, %v5063_v15  ;;  %v5068_v43 = vmax.f32 %v5036_v52, 0.0  ;;  %v5037_v51 = vadd.f32 %v8664_v31, %v4992_v12 }
 0x8ae   : > { %v4983_v19 = vpop.xlane.xlu1 %4982 }
 0x8af   : > { %5101 = vst.msk [vmem:[%s8671_s18 + $0xd0] sm:$0xff] %vm5074_vm8, %v5068_v43  ;;  %v5069_v7 = vmax.f32 %v5037_v51, 0.0  ;;  %v5034_v60 = vadd.f32 %v8664_v31, %v4983_v19 }
 0x8b0   : > { %v4986_v55 = vpop.xlane.xlu0 %4985 }
 0x8b1   : > { %5102 = vst.msk [vmem:[%s8671_s18 + $0xd8] sm:$0xff] %vm5074_vm8, %v5069_v7  ;;  %v5066_v48 = vmax.f32 %v5034_v60, 0.0  ;;  %v5035_v11 = vadd.f32 %v8664_v31, %v4986_v55 }
 0x8b2   : > { %v5001_v62 = vpop.xlane.xlu1 %5000 }
 0x8b3   : > { %5099 = vst.msk [vmem:[%s8671_s18 + $0xc0] sm:$0xff] %vm5074_vm8, %v5066_v48  ;;  %v5067_v57 = vmax.f32 %v5035_v11, 0.0  ;;  %v5040_v58 = vadd.f32 %v8664_v31, %v5001_v62 }
 0x8b4   : > { %v5004_v29 = vpop.xlane.xlu0 %5003 }
 0x8b5   : > { %5100 = vst.msk [vmem:[%s8671_s18 + $0xc8] sm:$0xff] %vm5074_vm8, %v5067_v57  ;;  %v5072_v20 = vmax.f32 %v5040_v58, 0.0  ;;  %v5041_v26 = vadd.f32 %v8664_v31, %v5004_v29 }
 0x8b7   : > { %5105 = vst.msk [vmem:[%s8671_s18 + $0xf0] sm:$0xff] %vm5074_vm8, %v5072_v20  ;;  %v5073_v13 = vmax.f32 %v5041_v26, 0.0 }
 0x8b9   : > { %5106 = vst.msk [vmem:[%s8671_s18 + $0xf8] sm:$0xff] %vm5074_vm8, %v5073_v13 }
 0x8ba PF: > { %s16_s21 = sadd.s32 1, %s6367_s21  }
 0x8bb   : > { %p13_p4 = scmp.ge.s32.totalorder %s16_s21, 4  }
 0x8bd   :  { %15 = sbr.rel (!%p13_p4) target bundleno = 1 (0x1), region = 89 }

</bundles_post_ra>
